<compile_context>
chip_gen: v7x
topology: tpu7x:2x2x1
jax: 0.10.0
libtpu: 0.0.40
codegen_flags: <defaults>
</compile_context>

<pallas_src>
import jax
import jax.numpy as jnp
from jax.experimental import pallas as pl
from jax.experimental.pallas import tpu as pltpu


def el_head_kernel(sel_ref, bert_ref, pool_w_ref, pool_b_ref,
                   w1_ref, b1_ref, w2_ref, b2_ref, out_ref):
    bert = bert_ref[...]                        # (Bb, S, H) bf16, never upcast wholesale
    sel = bert.dtype.type and sel_ref[...]      # (Bb, 2, S) bf16, rows = [begin, end]

    # begin/end weighted sums as ONE batched MXU contraction, f32 accumulation.
    # Same dot_general structure as the flash-attn 'bqk,bkd->bqd' einsum.
    vecs = jnp.einsum('bks,bsh->bkh', sel, bert,
                      preferred_element_type=jnp.float32)         # (Bb, 2, H) f32
    begin_vec = vecs[:, 0, :]                                     # (Bb, H)
    end_vec = vecs[:, 1, :]                                       # (Bb, H)

    # Fused synthetic pooler: clsout = tanh(bert[:, 0, :] @ pool_w + pool_b).
    cls_row = bert[:, 0, :]                                       # (Bb, H) bf16
    clsout = jnp.tanh(
        jnp.dot(cls_row, pool_w_ref[...],
                preferred_element_type=jnp.float32) + pool_b_ref[...])   # (Bb, H)

    # cat((cls, begin_vec, end_vec)) @ W1 + b1 as ONE bf16 MXU dot (K = 2304).
    feat = jnp.concatenate([clsout, begin_vec, end_vec],
                           axis=-1).astype(jnp.bfloat16)          # (Bb, 3H)
    h = jnp.dot(feat, w1_ref[...],
                preferred_element_type=jnp.float32) + b1_ref[...]     # (Bb, 128)

    # Dropout(0.15) is identity in eval mode.
    h = jnp.maximum(h, 0.0)                                       # ReLU

    # Lane-dense classifier: W2 zero-padded (128, 2) -> (128, 128).
    logits = jnp.dot(h, w2_ref[...],
                     preferred_element_type=jnp.float32) + b2_ref[...]   # (Bb, 128)

    s = jax.nn.sigmoid(logits)                  # cols >= 2 are padding junk
    col = jax.lax.broadcasted_iota(jnp.int32, s.shape, 1)
    # sigmoid bounds values to (0, 1) -> exp is safe without max-subtraction.
    e = jnp.where(col < 2, jnp.exp(s), 0.0)
    denom = jnp.sum(e, axis=-1, keepdims=True)
    # softmax over the 2 real classes; squeeze(1) on [B, 2] is a no-op.
    out_ref[...] = e * pl.reciprocal(denom, approx=True)


def el_head(bert_out, begin, end, pool_w, pool_b, w1t, b1, w2t, b2, *,
            b_block=8):
    B, S, H = bert_out.shape
    nb = pl.cdiv(B, b_block)
    b_pad = nb * b_block
    if b_pad != B:                              # pad batch to a full block
        bert_out = jnp.pad(bert_out, ((0, b_pad - B), (0, 0), (0, 0)))
        begin = jnp.pad(begin, ((0, b_pad - B), (0, 0)))
        end = jnp.pad(end, ((0, b_pad - B), (0, 0)))

    # Single (B, 2, S) bf16 selector: row 0 = begin mask, row 1 = end mask.
    sel = jnp.stack([begin, end], axis=1).astype(jnp.bfloat16)

    # Zero-pad the 2-wide classifier to a full 128-lane block (lane-dense
    # matmul + unmasked stores); wrapper slices back to (B, 2).
    w2_pad = jnp.zeros((128, 128), jnp.float32).at[:, :2].set(
        w2t.astype(jnp.float32))
    b2_pad = jnp.zeros((1, 128), jnp.float32).at[0, :2].set(
        b2.astype(jnp.float32))

    res = lambda i: (0, 0)                      # resident-weight index map

    out = pl.pallas_call(
        el_head_kernel,
        out_shape=jax.ShapeDtypeStruct((b_pad, 128), jnp.float32),
        grid=(nb,),
        in_specs=[
            pl.BlockSpec((b_block, 2, S), lambda i: (i, 0, 0)),   # sel  (bf16)
            pl.BlockSpec((b_block, S, H), lambda i: (i, 0, 0)),   # bert (bf16)
            pl.BlockSpec((H, H), res),                            # pool_w (bf16)
            pl.BlockSpec((1, H), res),                            # pool_b (f32)
            pl.BlockSpec((3 * H, 128), res),                      # W1^T  (bf16)
            pl.BlockSpec((1, 128), res),                          # b1    (f32)
            pl.BlockSpec((128, 128), res),                        # W2^T padded
            pl.BlockSpec((1, 128), res),                          # b2 padded
        ],
        out_specs=pl.BlockSpec((b_block, 128), lambda i: (i, 0)),
        compiler_params=pltpu.CompilerParams(
            dimension_semantics=("parallel",)),
    )(sel, bert_out.astype(jnp.bfloat16),
      pool_w.astype(jnp.bfloat16), pool_b.reshape(1, -1).astype(jnp.float32),
      w1t.astype(jnp.bfloat16), b1.reshape(1, -1).astype(jnp.float32),
      w2_pad, b2_pad)
    return out[:B, :2]


def synthetic_bert(ids, mask, seg, emb, seg_emb):
    # TODO(synk): BertModel.from_pretrained('./bert_pretrain') has no in-script
    # equivalent (pretrained checkpoint); a deterministic embedding sum stands
    # in for encoded[10].  The pooler producing clsout is fused into the kernel.
    bert_out = emb[ids] + seg_emb[seg]                      # (B, S, H)
    return bert_out * mask[:, :, None].astype(bert_out.dtype)


if __name__ == "__main__":
    # H=768 is fixed by linear1 (768*3 -> 128); B=16 exercises the batch grid
    # (two grid steps at b_block=8) while staying small.
    B, S, H, VOCAB = 16, 8, 768, 100

    key = jax.random.PRNGKey(0)
    (k_ids, k_begin, k_end, k_emb, k_seg, k_pw, k_pb,
     k_w1, k_b1, k_w2, k_b2) = jax.random.split(key, 11)

    # forward() inputs: sample = (ids, mask, seg, begin, end)
    ids = jax.random.randint(k_ids, (B, S), 0, VOCAB)
    mask = jnp.ones((B, S), dtype=jnp.int32)
    seg = jnp.zeros((B, S), dtype=jnp.int32)
    begin = jax.nn.one_hot(jax.random.randint(k_begin, (B,), 0, S), S,
                           dtype=jnp.float32)
    end = jax.nn.one_hot(jax.random.randint(k_end, (B,), 0, S), S,
                         dtype=jnp.float32)

    # Synthetic BERT parameters (deterministic).
    emb = 0.02 * jax.random.normal(k_emb, (VOCAB, H), dtype=jnp.float32)
    seg_emb = 0.02 * jax.random.normal(k_seg, (2, H), dtype=jnp.float32)
    pool_w = 0.02 * jax.random.normal(k_pw, (H, H), dtype=jnp.float32)
    pool_b = 0.02 * jax.random.normal(k_pb, (H,), dtype=jnp.float32)

    # Head parameters (linear1: 2304 -> 128, linear2: 128 -> 2), pre-transposed.
    w1t = 0.02 * jax.random.normal(k_w1, (3 * H, 128), dtype=jnp.float32)
    b1 = 0.02 * jax.random.normal(k_b1, (128,), dtype=jnp.float32)
    w2t = 0.02 * jax.random.normal(k_w2, (128, 2), dtype=jnp.float32)
    b2 = 0.02 * jax.random.normal(k_b2, (2,), dtype=jnp.float32)

    bert_out = synthetic_bert(ids, mask, seg, emb, seg_emb)

    out = el_head(bert_out, begin, end, pool_w, pool_b, w1t, b1, w2t, b2,
                  b_block=8)
    out = jax.block_until_ready(out)

    assert out.shape == (B, 2)
    assert bool(jnp.all(jnp.isfinite(out)))
    # softmax rows sum to ~1 (EUP approximate reciprocal => loose tolerance)
    assert bool(jnp.all(jnp.abs(jnp.sum(out, axis=-1) - 1.0) < 1e-2))
    print("KERNEL_OK")
</pallas_src>

<mosaic_0001>
module attributes {stable_mosaic.version = 11 : i64} {
  func.func @el_head_kernel(%arg0: i32, %arg1: memref<8x2x8xbf16, #tpu.memory_space<vmem>>, %arg2: memref<8x8x768xbf16, #tpu.memory_space<vmem>>, %arg3: memref<768x768xbf16, #tpu.memory_space<vmem>>, %arg4: memref<1x768xf32, #tpu.memory_space<vmem>>, %arg5: memref<2304x128xbf16, #tpu.memory_space<vmem>>, %arg6: memref<1x128xf32, #tpu.memory_space<vmem>>, %arg7: memref<128x128xf32, #tpu.memory_space<vmem>>, %arg8: memref<1x128xf32, #tpu.memory_space<vmem>>, %arg9: memref<8x128xf32, #tpu.memory_space<vmem>>) attributes {dimension_semantics = [#tpu.dimension_semantics<parallel>], iteration_bounds = array<i64: 2>, scalar_prefetch = 0 : i64, scratch_operands = 0 : i64, tpu.core_type = #tpu.core_type<tc>, window_params = [{transform_indices = @transform_0, window_bounds = array<i64: 8, 2, 8>}, {transform_indices = @transform_1, window_bounds = array<i64: 8, 8, 768>}, {pipeline_mode = #tpu.pipeline_mode<synchronous>, transform_indices = @transform_2, window_bounds = array<i64: 768, 768>}, {pipeline_mode = #tpu.pipeline_mode<synchronous>, transform_indices = @transform_3, window_bounds = array<i64: 1, 768>}, {pipeline_mode = #tpu.pipeline_mode<synchronous>, transform_indices = @transform_4, window_bounds = array<i64: 2304, 128>}, {pipeline_mode = #tpu.pipeline_mode<synchronous>, transform_indices = @transform_5, window_bounds = array<i64: 1, 128>}, {pipeline_mode = #tpu.pipeline_mode<synchronous>, transform_indices = @transform_6, window_bounds = array<i64: 128, 128>}, {pipeline_mode = #tpu.pipeline_mode<synchronous>, transform_indices = @transform_7, window_bounds = array<i64: 1, 128>}, {transform_indices = @transform_8, window_bounds = array<i64: 8, 128>}]} {
    %c0 = arith.constant 0 : index
    %c0_0 = arith.constant 0 : index
    %c0_1 = arith.constant 0 : index
    %0 = vector.load %arg2[%c0, %c0_0, %c0_1] : memref<8x8x768xbf16, #tpu.memory_space<vmem>>, vector<8x8x768xbf16>
    %c0_2 = arith.constant 0 : index
    %c0_3 = arith.constant 0 : index
    %c0_4 = arith.constant 0 : index
    %1 = vector.load %arg1[%c0_2, %c0_3, %c0_4] : memref<8x2x8xbf16, #tpu.memory_space<vmem>>, vector<8x2x8xbf16>
    "tpu.trace_start"() <{level = 10 : i32, message = "bks,bsh->bkh"}> : () -> ()
    %cst = arith.constant dense<0.000000e+00> : vector<8x2x768xf32>
    %2 = tpu.matmul %1, %0, %cst {dimension_numbers = #tpu.dot_dimension_numbers<[2], [1], [1], [2], [0, 0, 0, 1, 1, 2], [0], [0]>} : vector<8x2x8xbf16>, vector<8x8x768xbf16>, vector<8x2x768xf32> -> vector<8x2x768xf32>
    "tpu.trace_stop"() : () -> ()
    %3 = vector.extract_strided_slice %2 {offsets = [0, 0, 0], sizes = [8, 1, 768], strides = [1, 1, 1]} : vector<8x2x768xf32> to vector<8x1x768xf32>
    %4 = vector.shape_cast %3 : vector<8x1x768xf32> to vector<8x768xf32>
    %5 = vector.extract_strided_slice %2 {offsets = [0, 1, 0], sizes = [8, 1, 768], strides = [1, 1, 1]} : vector<8x2x768xf32> to vector<8x1x768xf32>
    %6 = vector.shape_cast %5 : vector<8x1x768xf32> to vector<8x768xf32>
    %7 = vector.extract_strided_slice %0 {offsets = [0, 0, 0], sizes = [8, 1, 768], strides = [1, 1, 1]} : vector<8x8x768xbf16> to vector<8x1x768xbf16>
    %8 = vector.shape_cast %7 : vector<8x1x768xbf16> to vector<8x768xbf16>
    %c0_5 = arith.constant 0 : index
    %c0_6 = arith.constant 0 : index
    %9 = vector.load %arg3[%c0_5, %c0_6] : memref<768x768xbf16, #tpu.memory_space<vmem>>, vector<768x768xbf16>
    %cst_7 = arith.constant dense<0.000000e+00> : vector<8x768xf32>
    %10 = tpu.matmul %8, %9, %cst_7 {dimension_numbers = #tpu.dot_dimension_numbers<[1], [0], [0], [1], [0, 0, 1, 1], [], []>} : vector<8x768xbf16>, vector<768x768xbf16>, vector<8x768xf32> -> vector<8x768xf32>
    %c0_8 = arith.constant 0 : index
    %c0_9 = arith.constant 0 : index
    %11 = vector.load %arg4[%c0_8, %c0_9] : memref<1x768xf32, #tpu.memory_space<vmem>>, vector<1x768xf32>
    %12 = vector.broadcast %11 : vector<1x768xf32> to vector<8x768xf32>
    %13 = arith.addf %10, %12 : vector<8x768xf32>
    %14 = math.tanh %13 : vector<8x768xf32>
    %15 = tpu.concatenate %14, %4, %6 in 1 : vector<8x768xf32>, vector<8x768xf32>, vector<8x768xf32> -> vector<8x2304xf32>
    %16 = arith.truncf %15 : vector<8x2304xf32> to vector<8x2304xbf16>
    %c0_10 = arith.constant 0 : index
    %c0_11 = arith.constant 0 : index
    %17 = vector.load %arg5[%c0_10, %c0_11] : memref<2304x128xbf16, #tpu.memory_space<vmem>>, vector<2304x128xbf16>
    %cst_12 = arith.constant dense<0.000000e+00> : vector<8x128xf32>
    %18 = tpu.matmul %16, %17, %cst_12 {dimension_numbers = #tpu.dot_dimension_numbers<[1], [0], [0], [1], [0, 0, 1, 1], [], []>} : vector<8x2304xbf16>, vector<2304x128xbf16>, vector<8x128xf32> -> vector<8x128xf32>
    %c0_13 = arith.constant 0 : index
    %c0_14 = arith.constant 0 : index
    %19 = vector.load %arg6[%c0_13, %c0_14] : memref<1x128xf32, #tpu.memory_space<vmem>>, vector<1x128xf32>
    %20 = vector.broadcast %19 : vector<1x128xf32> to vector<8x128xf32>
    %21 = arith.addf %18, %20 : vector<8x128xf32>
    %cst_15 = arith.constant 0.000000e+00 : f32
    %22 = vector.broadcast %cst_15 : f32 to vector<8x128xf32>
    %23 = arith.maximumf %21, %22 : vector<8x128xf32>
    %c0_16 = arith.constant 0 : index
    %c0_17 = arith.constant 0 : index
    %24 = vector.load %arg7[%c0_16, %c0_17] : memref<128x128xf32, #tpu.memory_space<vmem>>, vector<128x128xf32>
    %cst_18 = arith.constant dense<0.000000e+00> : vector<8x128xf32>
    %25 = tpu.matmul %23, %24, %cst_18 {dimension_numbers = #tpu.dot_dimension_numbers<[1], [0], [0], [1], [0, 0, 1, 1], [], []>} : vector<8x128xf32>, vector<128x128xf32>, vector<8x128xf32> -> vector<8x128xf32>
    %c0_19 = arith.constant 0 : index
    %c0_20 = arith.constant 0 : index
    %26 = vector.load %arg8[%c0_19, %c0_20] : memref<1x128xf32, #tpu.memory_space<vmem>>, vector<1x128xf32>
    %27 = vector.broadcast %26 : vector<1x128xf32> to vector<8x128xf32>
    %28 = arith.addf %25, %27 : vector<8x128xf32>
    %29 = arith.negf %28 : vector<8x128xf32>
    %30 = math.exp %29 : vector<8x128xf32>
    %cst_21 = arith.constant 1.000000e+00 : f32
    %31 = vector.broadcast %cst_21 : f32 to vector<8x128xf32>
    %32 = arith.addf %31, %30 : vector<8x128xf32>
    %33 = arith.divf %31, %32 : vector<8x128xf32>
    %34 = tpu.iota {dimensions = array<i32: 1>} : vector<8x128xi32>
    %c2_i32 = arith.constant 2 : i32
    %35 = vector.broadcast %c2_i32 : i32 to vector<8x128xi32>
    %36 = arith.cmpi slt, %34, %35 : vector<8x128xi32>
    %37 = math.exp %33 : vector<8x128xf32>
    %cst_22 = arith.constant 0.000000e+00 : f32
    %38 = vector.broadcast %cst_22 : f32 to vector<8x128xf32>
    %39 = arith.select %36, %37, %38 : vector<8x128xi1>, vector<8x128xf32>
    %cst_23 = arith.constant dense<0.000000e+00> : vector<8xf32>
    %40 = vector.multi_reduction <add>, %39, %cst_23 [1] : vector<8x128xf32> to vector<8xf32>
    %41 = vector.shape_cast %40 : vector<8xf32> to vector<8x1xf32>
    %42 = tpu.reciprocal %41 {approx = true} : vector<8x1xf32> -> vector<8x1xf32>
    %43 = vector.broadcast %42 : vector<8x1xf32> to vector<8x128xf32>
    %44 = arith.mulf %39, %43 : vector<8x128xf32>
    %c0_24 = arith.constant 0 : index
    %c0_25 = arith.constant 0 : index
    %45 = vector.load %arg9[%c0_24, %c0_25] : memref<8x128xf32, #tpu.memory_space<vmem>>, vector<8x128xf32>
    tpu.vector_store %arg9[%c0_24, %c0_25], %44 {strides = array<i32>} : memref<8x128xf32, #tpu.memory_space<vmem>>, vector<8x128xf32>,
    return
  }
  func.func @transform_0(%arg0: i32) -> (i32, i32, i32) {
    %c0_i32 = arith.constant 0 : i32
    %c0_i32_0 = arith.constant 0 : i32
    %c0_i32_1 = arith.constant 0 : i32
    return %arg0, %c0_i32, %c0_i32_0 : i32, i32, i32
  }
  func.func @transform_1(%arg0: i32) -> (i32, i32, i32) {
    %c0_i32 = arith.constant 0 : i32
    %c0_i32_0 = arith.constant 0 : i32
    %c0_i32_1 = arith.constant 0 : i32
    return %arg0, %c0_i32, %c0_i32_0 : i32, i32, i32
  }
  func.func @transform_2(%arg0: i32) -> (i32, i32) {
    %c0_i32 = arith.constant 0 : i32
    %c0_i32_0 = arith.constant 0 : i32
    %c0_i32_1 = arith.constant 0 : i32
    return %c0_i32, %c0_i32_0 : i32, i32
  }
  func.func @transform_3(%arg0: i32) -> (i32, i32) {
    %c0_i32 = arith.constant 0 : i32
    %c0_i32_0 = arith.constant 0 : i32
    %c0_i32_1 = arith.constant 0 : i32
    return %c0_i32, %c0_i32_0 : i32, i32
  }
  func.func @transform_4(%arg0: i32) -> (i32, i32) {
    %c0_i32 = arith.constant 0 : i32
    %c0_i32_0 = arith.constant 0 : i32
    %c0_i32_1 = arith.constant 0 : i32
    return %c0_i32, %c0_i32_0 : i32, i32
  }
  func.func @transform_5(%arg0: i32) -> (i32, i32) {
    %c0_i32 = arith.constant 0 : i32
    %c0_i32_0 = arith.constant 0 : i32
    %c0_i32_1 = arith.constant 0 : i32
    return %c0_i32, %c0_i32_0 : i32, i32
  }
  func.func @transform_6(%arg0: i32) -> (i32, i32) {
    %c0_i32 = arith.constant 0 : i32
    %c0_i32_0 = arith.constant 0 : i32
    %c0_i32_1 = arith.constant 0 : i32
    return %c0_i32, %c0_i32_0 : i32, i32
  }
  func.func @transform_7(%arg0: i32) -> (i32, i32) {
    %c0_i32 = arith.constant 0 : i32
    %c0_i32_0 = arith.constant 0 : i32
    %c0_i32_1 = arith.constant 0 : i32
    return %c0_i32, %c0_i32_0 : i32, i32
  }
  func.func @transform_8(%arg0: i32) -> (i32, i32) {
    %c0_i32 = arith.constant 0 : i32
    %c0_i32_0 = arith.constant 0 : i32
    return %arg0, %c0_i32 : i32, i32
  }
}

</mosaic_0001>

<bundles_post_ra>
// kernel: tpu_custom_call.1
= control target key start
LH: loop header
LB: loop body
LE: loop exit
PB: predicated region body
PF: predicated region fallthrough
CT: control target
= control target key end

     0   :  { %s8956_s0 = inlined_call_operand.vmem [shape: bf16[16,2,8], index: 0, kind: input, shape index: {}]   ;;  %s8957_s1 = inlined_call_operand.hbm [shape: bf16[16,8,768], index: 1, kind: input, shape index: {}]   ;;  %s8958_s2 = inlined_call_operand.hbm [shape: bf16[768,768], index: 2, kind: input, shape index: {}]   ;;  %s8959_s3 = inlined_call_operand.hbm [shape: f32[1,768], index: 3, kind: input, shape index: {}]   ;;  %s8960_s4 = inlined_call_operand.hbm [shape: bf16[2304,128], index: 4, kind: input, shape index: {}]   ;;  %s8961_s5 = inlined_call_operand.hbm [shape: f32[1,128], index: 5, kind: input, shape index: {}]   ;;  %s8962_s6 = inlined_call_operand.hbm [shape: f32[128,128], index: 6, kind: input, shape index: {}]   ;;  %s8963_s7 = inlined_call_operand.hbm [shape: f32[1,128], index: 7, kind: input, shape index: {}]   ;;  %s8964_s8 = inlined_call_operand.hbm [shape: f32[16,128], index: 8, kind: output, shape index: {}]  }
   0x1   :  { %8970 = sst [smem:[#allocation20_spill]] %s8958_s2 }
   0x2   :  { %8971 = sst [smem:[#allocation21_spill]] %s8960_s4 }
   0x3   :  { %13 = vsyncpa [#allocation3], 0 }
   0x4   :  { %15 = vsyncpa [#allocation3 + $0x1], 0 }
   0x5   :  { %16 = vsyncpa [#allocation6], 0 }
   0x6   :  { %17 = vsyncpa [#allocation9], 0 }
   0x7   :  { %18 = vsyncpa [#allocation12], 0 }
   0x8   :  { %19 = vsyncpa [#allocation4], 0 }
   0x9   :  { %21 = vsyncpa [#allocation4 + $0x1], 0  ;;  %s8010_s27 = smov 0   ;;  %s8012_s28 = smov 0  }
   0xa   :  { %s8014_s29 = smov 0   ;;  %s8016_s30 = smov 0  }
   0xb LB: > { %s7947_s9 = smov [#allocation5]   ;;  %s8031_s11 = sadd.s32 4294967295, %s7945_s30   ;;  %s7945_s30 = sphi %s8016_s30, %s8997_s30   ;;  %s7941_s29 = sphi %s8014_s29, %s8996_s29   ;;  %s7937_s28 = sphi %s8012_s28, %s8995_s28   ;;  %s7933_s27 = sphi %s8010_s27, %s8994_s27  }
   0xc   : > { %s248_s10 = sshll.u32 %s7947_s9, 4  ;;  %p6046_p0 = scmp.ge.s32.totalorder %s7945_s30, 1  ;;  %s8036_s10 = int_to_ptr.vmem [resolvable:$true] %s248_s10 }
   0xd   : > { %p8966_p1 = scmp.eq.s32.totalorder %s8031_s11, 0  ;;  %p236_p2 = scmp.lt.s32.totalorder %s7945_s30, 3 }
   0xe   : > { %s7948_s13 = smov [#allocation8]   ;;  %s7949_s16 = smov [#allocation11]  }
   0xf   : > { %p8038_p3 = pnand %p6046_p0, %p236_p2  ;;  %s272_s14 = sshll.u32 %s7948_s13, 4  ;;  %s8051_s14 = int_to_ptr.vmem [resolvable:$true] %s272_s14 }
  0x10   : > { %s8053_s17 = sshll.u32 %s7949_s16, 4  ;;  %s8974_s2 = sld [smem:[#allocation20_spill]]  ;;  %s297_s17 = int_to_ptr.vmem [resolvable:$true] %s8053_s17 }
  0x11   : > { %s8972_s12 = scalar_select %p8038_p3, 1, 0 }
  0x12   : > { %p6936_p5 = pneg %p8038_p3 }
  0x14   : > { %p8047_p6 = pnand %p6936_p5, %p8966_p1 }
  0x16   : > { %s7669_s20 = scalar_lea.hbm %s8974_s2, 36864  ;;  %p8063_p8 = pneg %p8047_p6 }
  0x17   : > { %p7670_p7 = scmp.ne.s32.totalorder %s8974_s2, %s7669_s20  ;;  %p7676_p11 = scmp.lt.u32.totalorder %s7669_s20, %s8974_s2 }
  0x19   : > { %p7672_p9 = pnand %p8063_p8, %p7670_p7 }
  0x1b   : > { %p7673_p10 = pneg %p7672_p9 }
  0x1d   : > { %p7678_p12 = pnand %p7676_p11, %p7673_p10 }
  0x1f   : > { %7681 = shalt.err (!%p7678_p12)
}
  0x20   : > { %s7682_s26 = scalar_lea.vmem %s8036_s10, 36864  ;;  %p7690_p5 = scmp.lt.s32.totalorder %s8036_s10, %s8036_s10 }
  0x21   : > { %p7683_p13 = scmp.ne.s32.totalorder %s8036_s10, %s7682_s26  ;;  %p7691_p4 = scmp.lt.s32.totalorder %s7682_s26, %s7682_s26 }
  0x23   : > { %p7685_p0 = pnand %p7683_p13, %p8063_p8  ;;  %p7692_p7 = por %p7691_p4, %p7690_p5 }
  0x25   : > { %p7686_p2 = pneg %p7685_p0 }
  0x27   : > { %p7693_p9 = pnand %p7692_p7, %p7686_p2 }
  0x29   : > { %7696 = shalt.err (!%p7693_p9)
}
  0x2a   : > { %s8965_s9 = smov 384   ;;  %s8968_s13 = smov 24  }
  0x2b   : > { %6939 = dma.hbm_to_vmem [thread:$0]  (!%p8047_p6), %s8974_s2, 36864, %s8036_s10, [#allocation6], %s8965_s9, %s8965_s9, %s8968_s13  }
  0x2c   : > { %s8976_s4 = sld [smem:[#allocation21_spill]] }
  0x32   : > { %s7697_s21 = scalar_lea.hbm %s8976_s4, 18432 }
  0x33   : > { %p7698_p4 = scmp.ne.s32.totalorder %s8976_s4, %s7697_s21  ;;  %p7704_p12 = scmp.lt.u32.totalorder %s7697_s21, %s8976_s4 }
  0x35   : > { %p7700_p10 = pnand %p7698_p4, %p8063_p8 }
  0x37   : > { %p7701_p11 = pneg %p7700_p10 }
  0x39   : > { %p7706_p13 = pnand %p7704_p12, %p7701_p11 }
  0x3b   : > { %7709 = shalt.err (!%p7706_p13)
}
  0x3c   : > { %s7710_s10 = scalar_lea.vmem %s8051_s14, 18432  ;;  %p7718_p7 = scmp.lt.s32.totalorder %s8051_s14, %s8051_s14 }
  0x3d   : > { %p7711_p0 = scmp.ne.s32.totalorder %s8051_s14, %s7710_s10  ;;  %p7719_p9 = scmp.lt.s32.totalorder %s7710_s10, %s7710_s10 }
  0x3f   : > { %p7713_p2 = pnand %p7711_p0, %p8063_p8  ;;  %p7720_p4 = por %p7719_p9, %p7718_p7 }
  0x41   : > { %p7714_p5 = pneg %p7713_p2 }
  0x43   : > { %p7721_p10 = pnand %p7720_p4, %p7714_p5 }
  0x45   : > { %7724 = shalt.err (!%p7721_p10)
}
  0x46   : > { %s7952_s16 = smov 64   ;;  %s7953_s18 = smov 4  }
  0x47   : > { %6945 = dma.hbm_to_vmem [thread:$0]  (!%p8047_p6), %s8976_s4, 18432, %s8051_s14, [#allocation9], %s7952_s16, %s7952_s16, %s7953_s18  }
  0x48   : > { %s7725_s24 = scalar_lea.hbm %s8962_s6, 2048 }
  0x49   : > { %p7726_p11 = scmp.ne.s32.totalorder %s8962_s6, %s7725_s24  ;;  %p7732_p0 = scmp.lt.u32.totalorder %s7725_s24, %s8962_s6 }
  0x4b   : > { %p7728_p12 = pnand %p7726_p11, %p8063_p8 }
  0x4d   : > { %p7729_p13 = pneg %p7728_p12 }
  0x4f   : > { %p7734_p2 = pnand %p7732_p0, %p7729_p13 }
  0x51   : > { %7737 = shalt.err (!%p7734_p2)
}
  0x52   : > { %s7738_s19 = scalar_lea.vmem %s297_s17, 2048  ;;  %p7746_p4 = scmp.lt.s32.totalorder %s297_s17, %s297_s17 }
  0x53   : > { %p7739_p5 = scmp.ne.s32.totalorder %s297_s17, %s7738_s19  ;;  %p7747_p10 = scmp.lt.s32.totalorder %s7738_s19, %s7738_s19 }
  0x55   : > { %p7741_p7 = pnand %p7739_p5, %p8063_p8  ;;  %p7748_p1 = por %p7747_p10, %p7746_p4 }
  0x57   : > { %p7742_p9 = pneg %p7741_p7 }
  0x59   : > { %p7749_p3 = pnand %p7748_p1, %p7742_p9 }
  0x5b   : > { %7752 = shalt.err (!%p7749_p3)
}
  0x5c   : > { %s7954_s14 = smov 128   ;;  %s7955_s16 = smov 8  }
  0x5d   : > { %6951 = dma.hbm_to_vmem [thread:$0]  (!%p8047_p6), %s8962_s6, 2048, %s297_s17, [#allocation12], %s7954_s14, %s7954_s14, %s7955_s16  }
  0x5e   : > { %s7956_s20 = smov [#allocation7]   ;;  %s7957_s22 = smov [#allocation10]  }
  0x5f   : > { %s262_s21 = sshll.u32 %s7956_s20, 4  ;;  %s286_s24 = sshll.u32 %s7957_s22, 4  ;;  %s263_s21 = int_to_ptr.vmem [resolvable:$true] %s262_s21  ;;  %s287_s24 = int_to_ptr.vmem [resolvable:$true] %s286_s24 }
  0x60   : > { %s7753_s10 = scalar_lea.hbm %s8959_s3, 96 }
  0x61   : > { %p7754_p1 = scmp.ne.s32.totalorder %s8959_s3, %s7753_s10  ;;  %p7760_p12 = scmp.lt.u32.totalorder %s7753_s10, %s8959_s3 }
  0x63   : > { %p7756_p3 = pnand %p7754_p1, %p8063_p8 }
  0x65   : > { %p7757_p11 = pneg %p7756_p3 }
  0x67   : > { %p7762_p13 = pnand %p7760_p12, %p7757_p11 }
  0x69   : > { %7765 = shalt.err (!%p7762_p13)
}
  0x6a   : > { %s7766_s17 = scalar_lea.vmem %s263_s21, 96  ;;  %p7774_p7 = scmp.lt.s32.totalorder %s263_s21, %s263_s21 }
  0x6b   : > { %p7767_p0 = scmp.ne.s32.totalorder %s263_s21, %s7766_s17  ;;  %p7775_p9 = scmp.lt.s32.totalorder %s7766_s17, %s7766_s17 }
  0x6d   : > { %p7769_p2 = pnand %p7767_p0, %p8063_p8  ;;  %p7776_p4 = por %p7775_p9, %p7774_p7 }
  0x6f   : > { %p7770_p5 = pneg %p7769_p2 }
  0x71   : > { %p7777_p10 = pnand %p7776_p4, %p7770_p5 }
  0x73   : > { %7780 = shalt.err (!%p7777_p10)
}
  0x74   : > { %6942 = dma.hbm_to_vmem [thread:$0]  (!%p8047_p6), %s8959_s3, 96, %s263_s21, [#allocation6]  }
  0x75   : > { %s7781_s16 = scalar_lea.hbm %s8961_s5, 16 }
  0x76   : > { %p7782_p1 = scmp.ne.s32.totalorder %s8961_s5, %s7781_s16  ;;  %p7788_p12 = scmp.lt.u32.totalorder %s7781_s16, %s8961_s5 }
  0x78   : > { %p7784_p3 = pnand %p7782_p1, %p8063_p8 }
  0x7a   : > { %p7785_p11 = pneg %p7784_p3 }
  0x7c   : > { %p7790_p13 = pnand %p7788_p12, %p7785_p11 }
  0x7e   : > { %7793 = shalt.err (!%p7790_p13)
}
  0x7f   : > { %s7794_s25 = scalar_lea.vmem %s287_s24, 16  ;;  %s7801_s21 = scalar_lea.vmem %s287_s24, 32 }
  0x80   : > { %p7795_p0 = scmp.ne.s32.totalorder %s287_s24, %s7794_s25  ;;  %p7802_p7 = scmp.lt.s32.totalorder %s287_s24, %s287_s24 }
  0x81   : > { %p7803_p9 = scmp.lt.s32.totalorder %s7801_s21, %s7794_s25 }
  0x82   : > { %p7797_p2 = pnand %p7795_p0, %p8063_p8 }
  0x83   : > { %p7804_p4 = por %p7803_p9, %p7802_p7 }
  0x84   : > { %p7798_p5 = pneg %p7797_p2 }
  0x86   : > { %p7805_p10 = pnand %p7804_p4, %p7798_p5 }
  0x88   : > { %7808 = shalt.err (!%p7805_p10)
}
  0x89   : > { %6948 = dma.hbm_to_vmem [thread:$0]  (!%p8047_p6), %s8961_s5, 16, %s287_s24, [#allocation9]  }
  0x8a   : > { %s7958_s19 = smov [#allocation13]   ;;  %s7809_s2 = scalar_lea.hbm %s8963_s7, 16 }
  0x8b   : > { %s310_s17 = sshll.u32 %s7958_s19, 4  ;;  %p7810_p1 = scmp.ne.s32.totalorder %s8963_s7, %s7809_s2  ;;  %s311_s17 = int_to_ptr.vmem [resolvable:$true] %s310_s17 }
  0x8c   : > { %p7816_p12 = scmp.lt.u32.totalorder %s7809_s2, %s8963_s7 }
  0x8d   : > { %p7812_p3 = pnand %p7810_p1, %p8063_p8 }
  0x8f   : > { %p7813_p11 = pneg %p7812_p3 }
  0x91   : > { %p7818_p13 = pnand %p7816_p12, %p7813_p11 }
  0x93   : > { %7821 = shalt.err (!%p7818_p13)
}
  0x94   : > { %s7822_s24 = scalar_lea.vmem %s311_s17, 16  ;;  %s7829_s20 = scalar_lea.vmem %s311_s17, 32 }
  0x95   : > { %p7823_p0 = scmp.ne.s32.totalorder %s311_s17, %s7822_s24  ;;  %p7830_p7 = scmp.lt.s32.totalorder %s311_s17, %s311_s17 }
  0x96   : > { %p7831_p9 = scmp.lt.s32.totalorder %s7829_s20, %s7822_s24 }
  0x97   : > { %p7825_p2 = pnand %p7823_p0, %p8063_p8 }
  0x98   : > { %p7832_p4 = por %p7831_p9, %p7830_p7 }
  0x99   : > { %p7826_p5 = pneg %p7825_p2 }
  0x9b   : > { %p7833_p10 = pnand %p7832_p4, %p7826_p5 }
  0x9d   : > { %7836 = shalt.err (!%p7833_p10)
}
  0x9e   : > { %6954 = dma.hbm_to_vmem [thread:$0]  (!%p8047_p6), %s8963_s7, 16, %s311_s17, [#allocation12]  }
  0x9f   : > { %s6045_s23 = sadd.s32 4294967294, %s7945_s30   ;;  %s8185_s15 = sadd.s32 1, %s7945_s30  }
  0xa0   : > { %s57_s21 = ssub.s32 %s7945_s30, %s8185_s15  ;;  %s60_s26 = sadd.s32 1, %s7941_s29 }
  0xa1   : > { %p58_p8 = scmp.eq.s32.totalorder %s57_s21, 0  ;;  %p67_p1 = scmp.ne.s32.totalorder %s7941_s29, %s7937_s28 }
  0xa2   : > { %p68_p3 = scmp.eq.s32.totalorder %s7945_s30, 0  ;;  %p73_p11 = scmp.ne.s32.totalorder %s7937_s28, %s7933_s27 }
  0xa3   : > { %s8196_s10 = scalar_select %p58_p8, %s7941_s29, %s60_s26  }
  0xa4   : > { %p69_p12 = por %p68_p3, %p67_p1  ;;  %p8977_p13 = scmp.eq.s32.totalorder %s8031_s11, 0 }
  0xa5   : > { %p223_p6 = scmp.eq.s32.totalorder %s8031_s11, 1  ;;  %p229_p2 = scmp.eq.s32.totalorder %s6045_s23, 1 }
  0xa6   : > { %p8200_p0 = por %p8977_p13, %p73_p11  ;;  %p6969_p5 = scmp.lt.s32.totalorder %s7945_s30, 2 }
  0xa7   : > { %s329_s17 = sand.u32 1, %s7941_s29   ;;  %p8207_p7 = por %p223_p6, %p67_p1 }
  0xa8   : > { %p8211_p9 = por %p229_p2, %p73_p11  ;;  %s6905_s2 = smul.u32 192, %s329_s17 }
  0xa9   : > { %s8979_s13 = scalar_select %p8207_p7, 1, 0 }
  0xaa   : > { %s8980_s14 = scalar_select %p8211_p9, 1, 0 }
  0xab   : > { %s6906_s4 = smul.u32 3072, %s7945_s30  ;;  %p8216_p4 = pnand %p6969_p5, %p69_p12 }
  0xac   : > { %s333_s20 = scalar_lea.vmem [#allocation2], %s6905_s2  ;;  %s8227_s25 = scalar_lea.sflag [#allocation3], %s329_s17 }
  0xad   : > { %s8223_s24 = scalar_lea.hbm %s8957_s1, %s6906_s4  ;;  %s341_s22 = sshll.u32 %s333_s20, 4  ;;  %s8225_s22 = int_to_ptr.vmem [resolvable:$true] %s341_s22 }
  0xae   : > { %s7837_s23 = scalar_lea.hbm %s8223_s24, 3072  ;;  %p7839_p8 = pneg %p8216_p4 }
  0xaf   : > { %p7838_p10 = scmp.ne.s32.totalorder %s8223_s24, %s7837_s23  ;;  %s7842_s4 = scalar_lea.hbm %s8957_s1, 6144 }
  0xb0   : > { %p7843_p11 = scmp.lt.u32.totalorder %s8223_s24, %s8957_s1  ;;  %p7844_p12 = scmp.lt.u32.totalorder %s7842_s4, %s7837_s23 }
  0xb1   : > { %p7840_p1 = pnand %p7839_p8, %p7838_p10  ;;  %p7846_p6 = scmp.lt.u32.totalorder %s7837_s23, %s8223_s24 }
  0xb2   : > { %p7845_p13 = por %p7844_p12, %p7843_p11 }
  0xb3   : > { %p7841_p3 = pneg %p7840_p1 }
  0xb4   : > { %p7847_p2 = por %p7846_p6, %p7845_p13 }
  0xb6   : > { %p7848_p5 = pnand %p7847_p2, %p7841_p3 }
  0xb8   : > { %7851 = shalt.err (!%p7848_p5)
}
  0xb9   : > { %s7852_s17 = scalar_lea.vmem %s8225_s22, 3072  ;;  %s7959_s2 = smov [#allocation2]  }
  0xba   : > { %p7853_p10 = scmp.ne.s32.totalorder %s8225_s22, %s7852_s17  ;;  %s7857_s20 = sshll.u32 %s7959_s2, 4  ;;  %s7858_s20 = int_to_ptr.vmem [resolvable:$false] %s7857_s20 }
  0xbb   : > { %s7859_s21 = scalar_lea.vmem %s7858_s20, 6144  ;;  %p7860_p7 = scmp.lt.s32.totalorder %s8225_s22, %s7858_s20 }
  0xbc   : > { %p7855_p1 = pnand %p7853_p10, %p7839_p8  ;;  %p7861_p11 = scmp.lt.s32.totalorder %s7859_s21, %s7852_s17 }
  0xbe   : > { %p7856_p9 = pneg %p7855_p1  ;;  %p7862_p12 = por %p7861_p11, %p7860_p7 }
  0xc0   : > { %p7863_p13 = pnand %p7862_p12, %p7856_p9 }
  0xc2   : > { %7866 = shalt.err (!%p7863_p13)
}
  0xc3   : > { %s8982_s23 = smov 24   ;;  %s8983_s26 = smov 384  }
  0xc4   : > { %6958 = dma.hbm_to_vmem [thread:$0]  (!%p8216_p4), %s8223_s24, 3072, %s8225_s22, %s8227_s25, %s8983_s26, %s8983_s26, %s8982_s23  }
  0xc5   : > { %p8984_p8 = scmp.ne.s32.totalorder %s8972_s12, 0 }
  0xc6   : > { %s8261_s4 = sand.u32 (!%p8984_p8), 1, %s7937_s28  }
  0xc7   : > { %353 = sbr.rel (%p8984_p8) target bundleno = 1697 (0x6a1), region = 52  ;;  %s356_s18 = scalar_lea.sflag (!%p8984_p8), [#allocation3], %s8261_s4 }
  0xc8   : > { %s6907_s9 = smul.u32 (!%p8984_p8), 192, %s8261_s4 }
  0xca   : > { %s8265_s17 = scalar_lea.vmem (!%p8984_p8), [#allocation2], %s6907_s9 }
  0xce   : > { %7912 = dma.done.wait (%p8200_p0), %s356_s18, 3072  }
  0xcf   : > { %7914 = vsyncadd (%p8200_p0), %s356_s18, 4294964224  ;;  %p8985_p7 = scmp.eq.s32.totalorder %s8031_s11, 0 }
  0xd1   : > { %7916 = dma.done.wait (%p8985_p7), [#allocation6], 36960   ;;  %p8986_p9 = pmov %p8985_p7 }
  0xd2   : > { %p8987_p4 = pmov %p8985_p7 }
  0xd3   : > { %7918 = vsyncadd (%p8986_p9), [#allocation6], 4294930336 }
  0xd4   : > { %7920 = dma.done.wait (%p8987_p4), [#allocation9], 18448   ;;  %p8988_p3 = pmov %p8987_p4 }
  0xd6   : > { %7922 = vsyncadd (%p8988_p3), [#allocation9], 4294948848  ;;  %p8989_p6 = pmov %p8988_p3 }
  0xd7   : > { %p8990_p2 = pmov %p8988_p3 }
  0xd8   : > { %7924 = dma.done.wait (%p8989_p6), [#allocation12], 2064  }
  0xd9   : > { %7926 = vsyncadd (%p8990_p2), [#allocation12], 4294965232  ;;  %s6065_s12 = sshll.u32 %s8031_s11, 3  ;;  %v7960_v0 = vmov 0   ;;  %v427_v1 = vld [vmem:[%s8265_s17] sm:$0xff]  ;;  %vm478_vm0 = vcmask 1043456  }
  0xda   : > { %529 = vmatprep.mubr.bf16.mxu0 %v7960_v0  ;;  %570 = vmatprep.mubr.bf16.mxu1 %v7960_v0  ;;  %p421_p0 = scmp.lt.s32.totalorder %s6065_s12, 15  ;;  %v428_v2 = vld [vmem:[%s8265_s17 + $0x8] sm:$0xff]  ;;  %vm474_vm1 = vcmask 64512   ;;  %v6067_v3 = vcombine.high %v427_v1, %v427_v1  ;;  %v6066_v5 = vcombine.low %v427_v1, %v427_v1  ;;  %v429_v7 = vld [vmem:[%s8265_s17 + $0x10] sm:$0xff]  ;;  %v430_v8 = vld [vmem:[%s8265_s17 + $0x18] sm:$0xff]  ;;  %vm2102_vm2 = vcmask 1041409  }
  0xdb   : > { %v8288_v4 = vcombine.high %v428_v2, %v428_v2  ;;  %v8290_v6 = vcombine.low %v428_v2, %v428_v2  ;;  %v8299_v9 = vcombine.high %v429_v7, %v429_v7  ;;  %v8301_v10 = vcombine.low %v429_v7, %v429_v7  ;;  %v431_v15 = vld [vmem:[%s8265_s17 + $0x20] sm:$0xff]  ;;  %v432_v16 = vld [vmem:[%s8265_s17 + $0x28] sm:$0xff]  ;;  %v433_v26 = vld [vmem:[%s8265_s17 + $0x30] sm:$0xff]  ;;  %s6064_s22 = sshll.u32 %s8261_s4, 3  ;;  %s6598_s25 = sshll.u32 %s8031_s11, 7 }
  0xdc   : > { %s8999_s12 = smov (!%p421_p0, %s6065_s12), 15  ;;  %v6079_v11 = vcombine.high %v430_v8, %v430_v8  ;;  %v6078_v12 = vcombine.low %v430_v8, %v430_v8  ;;  %6072 = vmatprep.subr.msk.bf16.mxu0 %vm478_vm0, %v6067_v3  ;;  %v2054_v13 = vunpack.c.l.b16 %v6067_v3  ;;  %v480_v14 = vsel %vm478_vm0, %v6066_v5, 0  ;;  %v434_v39 = vld [vmem:[%s8265_s17 + $0x38] sm:$0xff]  ;;  %v435_v52 = vld [vmem:[%s8265_s17 + $0x40] sm:$0xff]  ;;  %v436_v3 = vld [vmem:[%s8265_s17 + $0x48] sm:$0xff]  ;;  %s419_s2 = scalar_lea.vmem [#allocation14], %s6064_s22 }
  0xdd   : > { %s8295_s24 = scalar_lea.vmem %s8956_s0, %s8999_s12  ;;  %6074 = vmatprep.subr.msk.bf16.mxu1 %vm478_vm0, %v8288_v4  ;;  %vm2105_vm3 = vcmask 1042434   ;;  %v2056_v17 = vunpack.c.l.b16 %v8288_v4  ;;  %498 = vmatpush1.bf16.msra.mxu0 %v480_v14  ;;  %v2053_v18 = vunpack.c.l.b16 %v6066_v5  ;;  %v486_v19 = vsel %vm478_vm0, %v8290_v6, 0  ;;  %v437_v7 = vld [vmem:[%s8265_s17 + $0x50] sm:$0xff]  ;;  %s5909_s20 = sshll.u32 %s419_s2, 4  ;;  %s8914_s20 = int_to_ptr.vmem [resolvable:$true] %s5909_s20 }
  0xde   : > { %v2055_v20 = vunpack.c.l.b16 %v8290_v6  ;;  %v451_v21 = vld [vmem:[%s8295_s24] sm:$0x1]  ;;  %539 = vmatpush1.bf16.msra.mxu1 %v486_v19  ;;  %6076 = vmatprep.subr.msk.bf16.mxu0 %vm478_vm0, %v8299_v9  ;;  %v2058_v22 = vunpack.c.l.b16 %v8299_v9  ;;  %v492_v23 = vsel %vm478_vm0, %v8301_v10, 0  ;;  %v2060_v24 = vunpack.c.l.b16 %v6079_v11  ;;  %v452_v57 = vld [vmem:[%s8295_s24 + $0x1] sm:$0x1]  ;;  %s8912_s26 = scalar_lea.hbm %s8964_s8, %s6598_s25  ;;  %s5896_s9 = scalar_lea.sflag [#allocation4], %s8261_s4 }
  0xdf   : > { %v2059_v25 = vunpack.c.l.b16 %v6078_v12  ;;  %6084 = vmatprep.subr.msk.bf16.mxu1 %vm478_vm0, %v6079_v11  ;;  %v639_v27 = vsel %vm478_vm0, %v6078_v12, 0  ;;  %v6081_v28 = vcombine.high %v431_v15, %v431_v15  ;;  %v6080_v29 = vcombine.low %v431_v15, %v431_v15  ;;  %v439_v19 = vld [vmem:[%s8265_s17 + $0x60] sm:$0xff]  ;;  %s7867_s18 = scalar_lea.vmem %s8914_s20, 128  ;;  %p8991_p10 = scmp.ne.s32.totalorder %s8979_s13, 0 }
  0xe0   : > { %v6083_v30 = vcombine.high %v432_v16, %v432_v16  ;;  %6073 = vmatmul.mubr.msk.bf16.vlgmr.msra.gmra.mrb[0].mxu0 %vm474_vm1, %v451_v21  ;;  %v2057_v31 = vunpack.c.l.b16 %v8301_v10  ;;  %v2122_v32 = vrot.slane %v2060_v24, 7  ;;  %v6082_v34 = vcombine.low %v432_v16, %v432_v16  ;;  %v438_v16 = vld [vmem:[%s8265_s17 + $0x58] sm:$0xff]  ;;  %p7868_p5 = scmp.ne.s32.totalorder %s8914_s20, %s7867_s18  ;;  %s7964_s11 = smov [#allocation14]  }
  0xe1   : > { %v2101_v33 = vrot.slane %v2059_v25, 7  ;;  %6075 = vmatmul.mubr.msk.bf16.vlgmr.msra.gmra.mrb[0].mxu1 %vm474_vm1, %v451_v21  ;;  %580 = vmatpush1.bf16.msra.mxu0 %v492_v23  ;;  %v2062_v35 = vunpack.c.l.b16 %v6081_v28  ;;  %v2061_v36 = vunpack.c.l.b16 %v6080_v29  ;;  %v6091_v38 = vcombine.high %v433_v26, %v433_v26 }
  0xe2   : > { %v2064_v37 = vunpack.c.l.b16 %v6083_v30  ;;  %v2123_v40 = vsel %vm2102_vm2, %v2122_v32, %v2054_v13  ;;  %657 = vmatpush1.bf16.msra.mxu1 %v639_v27  ;;  %611 = vmatprep.mubr.bf16.mxu0 %v7960_v0  ;;  %v2063_v42 = vunpack.c.l.b16 %v6082_v34  ;;  %v6090_v43 = vcombine.low %v433_v26, %v433_v26  ;;  %p7869_p1 = pnand %p7868_p5, %p8991_p10 }
  0xe3   : > { %v2103_v41 = vsel %vm2102_vm2, %v2101_v33, %v2053_v18  ;;  %688 = vmatprep.mubr.bf16.mxu1 %v7960_v0  ;;  %6086 = vmatprep.subr.msk.bf16.mxu0 %vm478_vm0, %v6081_v28  ;;  %v2150_v44 = vrot.slane %v2062_v35, 7  ;;  %v2136_v45 = vrot.slane %v2061_v36, 7  ;;  %v2066_v47 = vunpack.c.l.b16 %v6091_v38  ;;  %v8372_v33 = vld [vmem:[%s8265_s17 + $0x70] sm:$0xff] }
  0xe4   : > { %v2178_v46 = vrot.slane %v2064_v37, 7  ;;  %v645_v48 = vsel %vm478_vm0, %v6080_v29, 0  ;;  %6088 = vmatprep.subr.msk.bf16.mxu1 %vm478_vm0, %v6083_v30  ;;  %v2164_v49 = vrot.slane %v2063_v42, 7  ;;  %v2065_v50 = vunpack.c.l.b16 %v6090_v43  ;;  %v440_v29 = vld [vmem:[%s8265_s17 + $0x68] sm:$0xff]  ;;  %v453_v42 = vld [vmem:[%s8295_s24 + $0x2] sm:$0x1]  ;;  %p7870_p11 = pneg %p7869_p1 }
  0xe5   : > { %v6093_v51 = vcombine.high %v434_v39, %v434_v39  ;;  %v2151_v53 = vsel %vm2102_vm2, %v2150_v44, %v2056_v17  ;;  %v2137_v54 = vsel %vm2102_vm2, %v2136_v45, %v2055_v20  ;;  %v2124_v56 = vrot.slane %v2066_v47, 6 }
  0xe6   : > { %v2179_v55 = vsel %vm2102_vm2, %v2178_v46, %v2058_v22  ;;  %v2165_v58 = vsel %vm2102_vm2, %v2164_v49, %v2057_v31  ;;  %v2104_v59 = vrot.slane %v2065_v50, 6  ;;  %v6092_v61 = vcombine.low %v434_v39, %v434_v39 }
  0xe7   : > { %v2068_v60 = vunpack.c.l.b16 %v6093_v51  ;;  %v651_v62 = vsel %vm478_vm0, %v6082_v34, 0  ;;  %v8341_v63 = vsel %vm2105_vm3, %v2124_v56, %v2123_v40  ;;  %v6095_v1 = vcombine.high %v435_v52, %v435_v52  ;;  %v454_v56 = vld [vmem:[%s8295_s24 + $0x3] sm:$0x1] }
  0xe8   : > { %v6094_v2 = vcombine.low %v435_v52, %v435_v52  ;;  %6077 = vmatmul.mubr.msk.bf16.vlgmr.msra.gmra.mrb[4].mxu0 %vm474_vm1, %v451_v21  ;;  %v2106_v4 = vsel %vm2105_vm3, %v2104_v59, %v2103_v41  ;;  %v2067_v6 = vunpack.c.l.b16 %v6092_v61  ;;  %v6102_v12 = vcombine.low %v436_v3, %v436_v3 }
  0xe9   : > { %v2152_v5 = vrot.slane %v2068_v60, 6  ;;  %6085 = vmatmul.mubr.msk.bf16.vlgmr.msra.gmra.mrb[4].mxu1 %vm474_vm1, %v452_v57  ;;  %698 = vmatpush1.bf16.msra.mxu0 %v645_v48  ;;  %v2070_v8 = vunpack.c.l.b16 %v6095_v1  ;;  %v6104_v15 = vcombine.low %v437_v7, %v437_v7  ;;  %vm2108_vm4 = vcmask 1043459   ;;  %v8421_v60 = vld [vmem:[%s8265_s17 + $0xa8] sm:$0xff] }
  0xea   : > { %v2069_v9 = vunpack.c.l.b16 %v6094_v2  ;;  %739 = vmatpush1.bf16.msra.mxu1 %v651_v62  ;;  %729 = vmatprep.mubr.bf16.mxu0 %v7960_v0  ;;  %v2138_v11 = vrot.slane %v2067_v6, 6  ;;  %v2071_v18 = vunpack.c.l.b16 %v6102_v12  ;;  %v798_v23 = vsel %vm478_vm0, %v6090_v43, 0 }
  0xeb   : > { %v8350_v10 = vsel %vm2105_vm3, %v2152_v5, %v2151_v53  ;;  %770 = vmatprep.mubr.bf16.mxu1 %v7960_v0  ;;  %6096 = vmatprep.subr.msk.bf16.mxu0 %vm478_vm0, %v6091_v38  ;;  %v2180_v13 = vrot.slane %v2070_v8, 6  ;;  %v2073_v22 = vunpack.c.l.b16 %v6104_v15  ;;  %v6106_v25 = vcombine.low %v438_v16, %v438_v16  ;;  %v442_v53 = vld [vmem:[%s8265_s17 + $0x78] sm:$0xff] }
  0xec   : > { %v2166_v14 = vrot.slane %v2069_v9, 6  ;;  %6098 = vmatprep.subr.msk.bf16.mxu1 %vm478_vm0, %v6093_v51  ;;  %v2139_v17 = vsel %vm2105_vm3, %v2138_v11, %v2137_v54  ;;  %v2107_v24 = vrot.slane %v2071_v18, 5  ;;  %v804_v26 = vsel %vm478_vm0, %v6092_v61, 0  ;;  %v8410_v54 = vld [vmem:[%s8265_s17 + $0x90] sm:$0xff]  ;;  %v444_v18 = vld [vmem:[%s8265_s17 + $0x88] sm:$0xff] }
  0xed   : > { %v8359_v20 = vsel %vm2105_vm3, %v2180_v13, %v2179_v55  ;;  %v2140_v27 = vrot.slane %v2073_v22, 5  ;;  %v8364_v28 = vcombine.low %v439_v19, %v439_v19  ;;  %v8368_v30 = vcombine.high %v436_v3, %v436_v3 }
  0xee   : > { %v2167_v21 = vsel %vm2105_vm3, %v2166_v14, %v2165_v58  ;;  %v2109_v31 = vsel %vm2108_vm4, %v2107_v24, %v2106_v4  ;;  %v2075_v32 = vunpack.c.l.b16 %v6106_v25  ;;  %vm2111_vm5 = vcmask 1044484  }
  0xef   : > { %v2141_v34 = vsel %vm2108_vm4, %v2140_v27, %v2139_v17  ;;  %v2077_v35 = vunpack.c.l.b16 %v8364_v28  ;;  %v6116_v37 = vcombine.low %v440_v29, %v440_v29  ;;  %v8382_v39 = vcombine.low %v8372_v33, %v8372_v33  ;;  %v443_v17 = vld [vmem:[%s8265_s17 + $0x80] sm:$0xff] }
  0xf0   : > { %6087 = vmatmul.mubr.msk.bf16.vlgmr.msra.gmra.mrb[8].mxu0 %vm474_vm1, %v452_v57  ;;  %v2168_v36 = vrot.slane %v2075_v32, 5  ;;  %v810_v45 = vsel %vm478_vm0, %v6094_v2, 0  ;;  %v957_v47 = vsel %vm478_vm0, %v6102_v12, 0  ;;  %v8392_v48 = vcombine.high %v437_v7, %v437_v7  ;;  %v456_v27 = vld [vmem:[%s8295_s24 + $0x5] sm:$0x1] }
  0xf1   : > { %6089 = vmatmul.mubr.msk.bf16.vlgmr.msra.gmra.mrb[8].mxu1 %vm474_vm1, %v452_v57  ;;  %816 = vmatpush1.bf16.msra.mxu0 %v798_v23  ;;  %v2110_v38 = vrot.slane %v2077_v35, 4  ;;  %v2079_v41 = vunpack.c.l.b16 %v6116_v37  ;;  %v2081_v44 = vunpack.c.l.b16 %v8382_v39  ;;  %v8395_v50 = vcombine.high %v438_v16, %v438_v16  ;;  %v455_v16 = vld [vmem:[%s8295_s24 + $0x4] sm:$0x1] }
  0xf2   : > { %857 = vmatpush1.bf16.msra.mxu1 %v804_v26  ;;  %847 = vmatprep.mubr.bf16.mxu0 %v7960_v0  ;;  %v2169_v40 = vsel %vm2108_vm4, %v2168_v36, %v2167_v21  ;;  %v6126_v55 = vcombine.low %v442_v53, %v442_v53  ;;  %v963_v57 = vsel %vm478_vm0, %v6104_v15, 0  ;;  %v8418_v59 = vcombine.low %v8410_v54, %v8410_v54  ;;  %v446_v26 = vld [vmem:[%s8265_s17 + $0x98] sm:$0xff] }
  0xf3   : > { %888 = vmatprep.mubr.bf16.mxu1 %v7960_v0  ;;  %6100 = vmatprep.subr.msk.bf16.mxu0 %vm478_vm0, %v6095_v1  ;;  %v2112_v43 = vsel %vm2111_vm5, %v2110_v38, %v2109_v31  ;;  %v2142_v46 = vrot.slane %v2079_v41, 4  ;;  %v2170_v49 = vrot.slane %v2081_v44, 4  ;;  %v969_v61 = vsel %vm478_vm0, %v6106_v25, 0  ;;  %v450_v44 = vld [vmem:[%s8265_s17 + $0xb8] sm:$0xff] }
  0xf4   : > { %6108 = vmatprep.subr.msk.bf16.mxu1 %vm478_vm0, %v8368_v30  ;;  %v2083_v58 = vunpack.c.l.b16 %v6126_v55  ;;  %v8424_v62 = vcombine.high %v439_v19, %v439_v19  ;;  %v8427_v1 = vcombine.high %v440_v29, %v440_v29  ;;  %v2089_v2 = vunpack.c.l.b16 %v8418_v59 }
  0xf5   : > { %v8398_v51 = vsel %vm2111_vm5, %v2142_v46, %v2141_v34  ;;  %v8402_v52 = vsel %vm2111_vm5, %v2170_v49, %v2169_v40  ;;  %v8433_v3 = vcombine.low %v8421_v60, %v8421_v60  ;;  %vm2114_vm6 = vcmask 1045509   ;;  %v447_v34 = vld [vmem:[%s8265_s17 + $0xa0] sm:$0xff] }
  0xf6   : > { %v2113_v4 = vrot.slane %v2083_v58, 3  ;;  %v2116_v6 = vrot.slane %v2089_v2, 2  ;;  %v1116_v8 = vsel %vm478_vm0, %v8364_v28, 0  ;;  %vm2117_vm7 = vcmask 1046534  }
  0xf7   : > { %v2095_v5 = vunpack.c.l.b16 %v8433_v3  ;;  %v1122_v11 = vsel %vm478_vm0, %v6116_v37, 0  ;;  %v8448_v12 = vcombine.high %v8372_v33, %v8372_v33  ;;  %vm2120_vm8 = vcmask 1047559  }
  0xf8   : > { %6097 = vmatmul.mubr.msk.bf16.vlgmr.msra.gmra.mrb[12].mxu0 %vm474_vm1, %v453_v42  ;;  %v2115_v9 = vsel %vm2114_vm6, %v2113_v4, %v2112_v43  ;;  %v8451_v13 = vcombine.high %v442_v53, %v442_v53  ;;  %v1128_v19 = vsel %vm478_vm0, %v8382_v39, 0  ;;  %v1275_v21 = vsel %vm478_vm0, %v6126_v55, 0  ;;  %v449_v43 = vld [vmem:[%s8265_s17 + $0xb0] sm:$0xff]  ;;  %s7871_s17 = sshll.u32 %s7964_s11, 4  ;;  %s7872_s17 = int_to_ptr.vmem [resolvable:$false] %s7871_s17 }
  0xf9   : > { %6099 = vmatmul.mubr.msk.bf16.vlgmr.msra.gmra.mrb[12].mxu1 %vm474_vm1, %v453_v42  ;;  %898 = vmatpush1.bf16.msra.mxu0 %v810_v45  ;;  %v2119_v7 = vrot.slane %v2095_v5, 1  ;;  %v2118_v14 = vsel %vm2117_vm7, %v2116_v6, %v2115_v9  ;;  %v8470_v22 = vcombine.high %v443_v17, %v443_v17  ;;  %v8473_v23 = vcombine.high %v444_v18, %v444_v18  ;;  %s7873_s12 = scalar_lea.vmem %s7872_s17, 256  ;;  %p7874_p12 = scmp.lt.s32.totalorder %s8914_s20, %s7872_s17 }
  0xfa   : > { %975 = vmatpush1.bf16.msra.mxu1 %v957_v47  ;;  %929 = vmatprep.mubr.bf16.mxu0 %v7960_v0  ;;  %v8477_v24 = vcombine.low %v443_v17, %v443_v17  ;;  %v8482_v25 = vcombine.low %v444_v18, %v444_v18  ;;  %v6139_v31 = vcombine.high %v8410_v54, %v8410_v54  ;;  %v1434_v35 = vsel %vm478_vm0, %v8418_v59, 0  ;;  %p7875_p13 = scmp.lt.s32.totalorder %s7873_s12, %s7867_s18 }
  0xfb   : > { %1006 = vmatprep.mubr.bf16.mxu1 %v7960_v0  ;;  %6110 = vmatprep.subr.msk.bf16.mxu0 %vm478_vm0, %v8392_v48  ;;  %v8456_v15 = vsel %vm2120_vm8, %v2119_v7, %v2118_v14  ;;  %v8495_v32 = vcombine.high %v446_v26, %v446_v26  ;;  %v8501_v33 = vcombine.low %v446_v26, %v446_v26  ;;  %v2072_v38 = vunpack.c.l.b16 %v8368_v30  ;;  %v7075_v7 = vld [vmem:[#allocation5 + $0x4] ss:$24 sps:$4 sm:$0xff]  }
  0xfc   : > { %6112 = vmatprep.subr.msk.bf16.mxu1 %vm478_vm0, %v8395_v50  ;;  %v1281_v28 = vsel %vm478_vm0, %v8477_v24, 0  ;;  %v1287_v29 = vsel %vm478_vm0, %v8482_v25, 0  ;;  %v8510_v37 = vcombine.high %v447_v34, %v447_v34  ;;  %v6151_v39 = vcombine.high %v8421_v60, %v8421_v60  ;;  %p7876_p8 = por %p7875_p13, %p7874_p12 }
  0xfd   : > { %v1440_v36 = vsel %vm478_vm0, %v8501_v33, 0  ;;  %v8518_v40 = vcombine.low %v447_v34, %v447_v34  ;;  %v2078_v41 = vunpack.c.l.b16 %v8424_v62  ;;  %v2126_v30 = vrot.slane %v2072_v38, 5 }
  0xfe   : > { %v2084_v45 = vunpack.c.l.b16 %v8451_v13  ;;  %v1593_v49 = vsel %vm478_vm0, %v8433_v3, 0  ;;  %v6153_v53 = vcombine.high %v449_v43, %v449_v43  ;;  %v8534_v54 = vcombine.high %v450_v44, %v450_v44  ;;  %p7877_p7 = pnand %p7876_p8, %p7870_p11 }
  0xff   : > { %v1446_v46 = vsel %vm478_vm0, %v8518_v40, 0  ;;  %v2128_v47 = vrot.slane %v2078_v41, 4  ;;  %v2127_v55 = vsel %vm2108_vm4, %v2126_v30, %v8341_v63  ;;  %v2080_v58 = vunpack.c.l.b16 %v8427_v1  ;;  %v7105_v41 = vld [vmem:[#allocation5 + $0x3c] ss:$24 sps:$4 sm:$0xff]  }
 0x100   : > { %6101 = vmatmul.mubr.msk.bf16.vlgmr.msra.gmra.mrb[16].mxu0 %vm474_vm1, %v453_v42  ;;  %v457_v42 = vld [vmem:[%s8295_s24 + $0x6] sm:$0x1]  ;;  %v2130_v59 = vrot.slane %v2084_v45, 3  ;;  %v6152_v60 = vcombine.low %v449_v43, %v449_v43  ;;  %v8545_v63 = vcombine.low %v450_v44, %v450_v44  ;;  %v2092_v2 = vunpack.c.l.b16 %v8495_v32  ;;  %v7076_v43 = vld [vmem:[#allocation5 + $0x30] ss:$24 sps:$4 sm:$0xff]  }
 0x101   : > { %6109 = vmatmul.mubr.msk.bf16.vlgmr.msra.gmra.mrb[16].mxu1 %vm474_vm1, %v454_v56  ;;  %1016 = vmatpush1.bf16.msra.mxu0 %v963_v57  ;;  %v2090_v57 = vunpack.c.l.b16 %v6139_v31  ;;  %v2096_v3 = vunpack.c.l.b16 %v6151_v39  ;;  %v2091_v6 = vunpack.c.l.b16 %v8501_v33  ;;  %v2098_v26 = vunpack.c.l.b16 %v6153_v53  ;;  %v7073_v33 = vld [vmem:[#allocation5] ss:$24 sps:$4 sm:$0xff]   ;;  %v7111_v45 = vld [vmem:[#allocation5 + $0x6c] ss:$24 sps:$4 sm:$0xff]  }
 0x102   : > { %1057 = vmatpush1.bf16.msra.mxu1 %v969_v61  ;;  %1047 = vmatprep.mubr.bf16.mxu0 %v7960_v0  ;;  %v2086_v61 = vunpack.c.l.b16 %v8470_v22  ;;  %v1599_v9 = vsel %vm478_vm0, %v6152_v60, 0  ;;  %v1605_v17 = vsel %vm478_vm0, %v8545_v63, 0  ;;  %v7103_v44 = vld [vmem:[#allocation5 + $0x38] ss:$24 sps:$4 sm:$0xff]   ;;  %vm7962_vm9 = vmmov 0  }
 0x103   : > { %1088 = vmatprep.mubr.bf16.mxu1 %v7960_v0  ;;  %6120 = vmatprep.subr.msk.bf16.mxu0 %vm478_vm0, %v8424_v62  ;;  %v2085_v62 = vunpack.c.l.b16 %v8477_v24  ;;  %v2132_v5 = vrot.slane %v2090_v57, 2  ;;  %v7115_v57 = vld [vmem:[#allocation5 + $0x98] ss:$24 sps:$4 sm:$0xff]  }
 0x104   : > { %6122 = vmatprep.subr.msk.bf16.mxu1 %vm478_vm0, %v8427_v1  ;;  %v458_v1 = vld [vmem:[%s8295_s24 + $0x7] sm:$0x1] }
 0x105   : > { %v2144_v18 = vrot.slane %v2085_v62, 3  ;;  %v7088_v62 = vld [vmem:[#allocation5 + $0xf0] ss:$24 sps:$4 sm:$0xff]  }
 0x108   : > { %6111 = vmatmul.mubr.msk.bf16.vlgmr.msra.gmra.mrb[20].mxu0 %vm474_vm1, %v454_v56 }
 0x109   : > { %6113 = vmatmul.mubr.msk.bf16.vlgmr.msra.gmra.mrb[20].mxu1 %vm474_vm1, %v454_v56  ;;  %1134 = vmatpush1.bf16.msra.mxu0 %v1116_v8  ;;  %v2074_v56 = vunpack.c.l.b16 %v8392_v48  ;;  %v2129_v48 = vsel %vm2111_vm5, %v2128_v47, %v2127_v55  ;;  %v2156_v8 = vrot.slane %v2080_v58, 4  ;;  %v7084_v47 = vld [vmem:[#allocation5 + $0x94] ss:$24 sps:$4 sm:$0xff]   ;;  %v7082_v55 = vld [vmem:[#allocation5 + $0x90] ss:$24 sps:$4 sm:$0xff]  }
 0x10a   : > { %1175 = vmatpush1.bf16.msra.mxu1 %v1122_v11  ;;  %1165 = vmatprep.mubr.bf16.mxu0 %v7960_v0  ;;  %v2097_v11 = vunpack.c.l.b16 %v6152_v60  ;;  %v2131_v14 = vsel %vm2114_vm6, %v2130_v59, %v2129_v48  ;;  %v7123_v58 = vld [vmem:[#allocation5 + $0xcc] ss:$24 sps:$4 sm:$0xff]   ;;  %v7085_v59 = vld [vmem:[#allocation5 + $0xc0] ss:$24 sps:$4 sm:$0xff]   ;;  %v7129_v48 = vld [vmem:[#allocation5 + $0xfc] ss:$24 sps:$4 sm:$0xff]  }
 0x10b   : > { %1206 = vmatprep.mubr.bf16.mxu1 %v7960_v0  ;;  %6124 = vmatprep.subr.msk.bf16.mxu0 %vm478_vm0, %v8448_v12  ;;  %v2154_v4 = vrot.slane %v2074_v56, 5  ;;  %v2133_v24 = vsel %vm2117_vm7, %v2132_v5, %v2131_v14  ;;  %v7087_v56 = vld [vmem:[#allocation5 + $0xc4] ss:$24 sps:$4 sm:$0xff]   ;;  %v7090_v60 = vld [vmem:[#allocation5 + $0xf4] ss:$24 sps:$4 sm:$0xff]  }
 0x10c   : > { %6132 = vmatprep.subr.msk.bf16.mxu1 %vm478_vm0, %v8451_v13  ;;  %v7099_v13 = vld [vmem:[#allocation5 + $0xc] ss:$24 sps:$4 sm:$0xff]   ;;  %v7100_v14 = vld [vmem:[#allocation5 + $0x180] ss:$24 sps:$4 sm:$0xff]  }
 0x10d   : > { %v7096_v5 = vld [vmem:[#allocation5 + $0x154] ss:$24 sps:$4 sm:$0xff]  }
 0x110   : > { %6121 = vmatmul.mubr.msk.bf16.vlgmr.msra.gmra.mrb[24].mxu0 %vm474_vm1, %v455_v16 }
 0x111   : > { %6123 = vmatmul.mubr.msk.bf16.vlgmr.msra.gmra.mrb[24].mxu1 %vm474_vm1, %v455_v16  ;;  %1216 = vmatpush1.bf16.msra.mxu0 %v1128_v19  ;;  %v2160_v19 = vrot.slane %v2092_v2, 2  ;;  %v7093_v2 = vld [vmem:[#allocation5 + $0x124] ss:$24 sps:$4 sm:$0xff]  }
 0x112   : > { %1293 = vmatpush1.bf16.msra.mxu1 %v1275_v21  ;;  %1247 = vmatprep.mubr.bf16.mxu0 %v7960_v0  ;;  %v2134_v21 = vrot.slane %v2096_v3, 1  ;;  %v7135_v3 = vld [vmem:[#allocation5 + $0x12c] ss:$24 sps:$4 sm:$0xff]  }
 0x113   : > { %1324 = vmatprep.mubr.bf16.mxu1 %v7960_v0  ;;  %6134 = vmatprep.subr.msk.bf16.mxu0 %vm478_vm0, %v8470_v22  ;;  %v2146_v22 = vrot.slane %v2091_v6, 2  ;;  %v7133_v6 = vld [vmem:[#allocation5 + $0x128] ss:$24 sps:$4 sm:$0xff]  }
 0x114   : > { %6136 = vmatprep.subr.msk.bf16.mxu1 %vm478_vm0, %v8473_v23  ;;  %v2135_v34 = vsel %vm2120_vm8, %v2134_v21, %v2133_v24  ;;  %v7114_v21 = vld [vmem:[#allocation5 + $0x1e4] ss:$24 sps:$4 sm:$0xff]  }
 0x115   : > { %v7159_v24 = vld [vmem:[#allocation5 + $0x1ec] ss:$24 sps:$4 sm:$0xff]  }
 0x118   : > { %6125 = vmatmul.mubr.msk.bf16.vlgmr.msra.gmra.mrb[28].mxu0 %vm474_vm1, %v455_v16  ;;  %v2158_v16 = vrot.slane %v2086_v61, 3  ;;  %v7121_v61 = vld [vmem:[#allocation5 + $0xc8] ss:$24 sps:$4 sm:$0xff]  }
 0x119   : > { %6133 = vmatmul.mubr.msk.bf16.vlgmr.msra.gmra.mrb[28].mxu1 %vm474_vm1, %v456_v27  ;;  %1334 = vmatpush1.bf16.msra.mxu0 %v1281_v28  ;;  %v2148_v28 = vrot.slane %v2097_v11, 1  ;;  %v7139_v11 = vld [vmem:[#allocation5 + $0x158] ss:$24 sps:$4 sm:$0xff]  }
 0x11a   : > { %1375 = vmatpush1.bf16.msra.mxu1 %v1287_v29  ;;  %1365 = vmatprep.mubr.bf16.mxu0 %v7960_v0 }
 0x11b   : > { %1406 = vmatprep.mubr.bf16.mxu1 %v7960_v0  ;;  %6144 = vmatprep.subr.msk.bf16.mxu0 %vm478_vm0, %v6139_v31 }
 0x11c   : > { %6146 = vmatprep.subr.msk.bf16.mxu1 %vm478_vm0, %v8495_v32  ;;  %v2162_v32 = vrot.slane %v2098_v26, 1  ;;  %v7112_v26 = vld [vmem:[#allocation5 + $0x1e0] ss:$24 sps:$4 sm:$0xff]  }
 0x120   : > { %6135 = vmatmul.mubr.msk.bf16.vlgmr.msra.gmra.mrb[32].mxu0 %vm474_vm1, %v456_v27 }
 0x121   : > { %6137 = vmatmul.mubr.msk.bf16.vlgmr.msra.gmra.mrb[32].mxu1 %vm474_vm1, %v456_v27  ;;  %1452 = vmatpush1.bf16.msra.mxu0 %v1434_v35  ;;  %v2155_v27 = vsel %vm2108_vm4, %v2154_v4, %v8350_v10  ;;  %v2145_v10 = vsel %vm2114_vm6, %v2144_v18, %v8398_v51  ;;  %v7081_v51 = vld [vmem:[#allocation5 + $0x64] ss:$24 sps:$4 sm:$0xff]   ;;  %v7091_v4 = vld [vmem:[#allocation5 + $0x120] ss:$24 sps:$4 sm:$0xff]  }
 0x122   : > { %1493 = vmatpush1.bf16.msra.mxu1 %v1440_v36  ;;  %1483 = vmatprep.mubr.bf16.mxu0 %v7960_v0  ;;  %v2157_v29 = vsel %vm2111_vm5, %v2156_v8, %v2155_v27  ;;  %v7078_v36 = vld [vmem:[#allocation5 + $0x34] ss:$24 sps:$4 sm:$0xff]   ;;  %v7094_v8 = vld [vmem:[#allocation5 + $0x150] ss:$24 sps:$4 sm:$0xff]  }
 0x123   : > { %1524 = vmatprep.mubr.bf16.mxu1 %v7960_v0  ;;  %6148 = vmatprep.subr.msk.bf16.mxu0 %vm478_vm0, %v8510_v37  ;;  %v2159_v31 = vsel %vm2114_vm6, %v2158_v16, %v2157_v29  ;;  %v7108_v16 = vld [vmem:[#allocation5 + $0x1b4] ss:$24 sps:$4 sm:$0xff]  }
 0x124   : > { %6156 = vmatprep.subr.msk.bf16.mxu1 %vm478_vm0, %v6151_v39  ;;  %v2161_v35 = vsel %vm2117_vm7, %v2160_v19, %v2159_v31  ;;  %v2147_v39 = vsel %vm2117_vm7, %v2146_v22, %v2145_v10  ;;  %v7153_v18 = vld [vmem:[#allocation5 + $0x1bc] ss:$24 sps:$4 sm:$0xff]   ;;  %v7106_v19 = vld [vmem:[#allocation5 + $0x1b0] ss:$24 sps:$4 sm:$0xff]  }
 0x125   : > { %v8572_v38 = vsel %vm2120_vm8, %v2162_v32, %v2161_v35  ;;  %v8576_v30 = vsel %vm2120_vm8, %v2148_v28, %v2147_v39  ;;  %v7151_v22 = vld [vmem:[#allocation5 + $0x1b8] ss:$24 sps:$4 sm:$0xff]   ;;  %v7120_v27 = vld [vmem:[#allocation5 + $0x214] ss:$24 sps:$4 sm:$0xff]   ;;  %v7157_v28 = vld [vmem:[#allocation5 + $0x1e8] ss:$24 sps:$4 sm:$0xff]  }
 0x126   : > { %v7165_v29 = vld [vmem:[#allocation5 + $0x21c] ss:$24 sps:$4 sm:$0xff]   ;;  %v7118_v31 = vld [vmem:[#allocation5 + $0x210] ss:$24 sps:$4 sm:$0xff]   ;;  %v7124_v35 = vld [vmem:[#allocation5 + $0x240] ss:$24 sps:$4 sm:$0xff]  }
 0x127   : > { %v7126_v32 = vld [vmem:[#allocation5 + $0x244] ss:$24 sps:$4 sm:$0xff]   ;;  %v7132_v10 = vld [vmem:[#allocation5 + $0x274] ss:$24 sps:$4 sm:$0xff]  }
 0x128   : > { %6145 = vmatmul.mubr.msk.bf16.vlgmr.msra.gmra.mrb[36].mxu0 %vm474_vm1, %v457_v42  ;;  %v7177_v39 = vld [vmem:[#allocation5 + $0x27c] ss:$24 sps:$4 sm:$0xff]  }
 0x129   : > { %6147 = vmatmul.mubr.msk.bf16.vlgmr.msra.gmra.mrb[36].mxu1 %vm474_vm1, %v457_v42  ;;  %1534 = vmatpush1.bf16.msra.mxu0 %v1446_v46  ;;  %v7079_v46 = vld [vmem:[#allocation5 + $0x60] ss:$24 sps:$4 sm:$0xff]  }
 0x12a   : > { %1611 = vmatpush1.bf16.msra.mxu1 %v1593_v49  ;;  %1565 = vmatprep.mubr.bf16.mxu0 %v7960_v0  ;;  %v7109_v49 = vld [vmem:[#allocation5 + $0x68] ss:$24 sps:$4 sm:$0xff]  }
 0x12b   : > { %1642 = vmatprep.mubr.bf16.mxu1 %v7960_v0  ;;  %6158 = vmatprep.subr.msk.bf16.mxu0 %vm478_vm0, %v6153_v53  ;;  %v7117_v53 = vld [vmem:[#allocation5 + $0x9c] ss:$24 sps:$4 sm:$0xff]  }
 0x12c   : > { %6160 = vmatprep.subr.msk.bf16.mxu1 %vm478_vm0, %v8534_v54 }
 0x130   : > { %6149 = vmatmul.mubr.msk.bf16.vlgmr.msra.gmra.mrb[40].mxu0 %vm474_vm1, %v457_v42  ;;  %v8578_v42 = vpack.c.b16 %v2135_v34, %v2135_v34  ;;  %v7171_v34 = vld [vmem:[#allocation5 + $0x24c] ss:$24 sps:$4 sm:$0xff]  }
 0x131   : > { %6157 = vmatmul.mubr.msk.bf16.vlgmr.msra.gmra.mrb[40].mxu1 %vm474_vm1, %v458_v1  ;;  %1652 = vmatpush1.bf16.msra.mxu0 %v1599_v9  ;;  %v7102_v9 = vld [vmem:[#allocation5 + $0x184] ss:$24 sps:$4 sm:$0xff]  }
 0x132   : > { %1693 = vmatpush1.bf16.msra.mxu1 %v1605_v17  ;;  %1683 = vmatprep.mubr.bf16.mxu0 %v7960_v0  ;;  %v7145_v17 = vld [vmem:[#allocation5 + $0x188] ss:$24 sps:$4 sm:$0xff]  }
 0x133   : > { %1724 = vmatprep.mubr.bf16.mxu1 %v7960_v0  ;;  %3644 = vmatprep.subr.bf16.mxu0 %v7075_v7  ;;  %v7097_v0 = vld [vmem:[#allocation5 + $0x8] ss:$24 sps:$4 sm:$0xff]   ;;  %v7141_v7 = vld [vmem:[#allocation5 + $0x15c] ss:$24 sps:$4 sm:$0xff]  }
 0x134   : > { %3767 = vmatprep.subr.bf16.mxu1 %v7099_v13  ;;  %v7147_v13 = vld [vmem:[#allocation5 + $0x18c] ss:$24 sps:$4 sm:$0xff]  }
 0x138   : > { %6159 = vmatmul.mubr.msk.bf16.vlgmr.msra.gmra.mrb[44].mxu0 %vm474_vm1, %v458_v1 }
 0x139   : > { %6161 = vmatmul.mubr.msk.bf16.vlgmr.msra.gmra.mrb[44].mxu1 %vm474_vm1, %v458_v1  ;;  %3645 = vmatpush1.bf16.msra.mxu0 %v7073_v33  ;;  %v7127_v1 = vld [vmem:[#allocation5 + $0xf8] ss:$24 sps:$4 sm:$0xff]  }
 0x13a   : > { %3646 = vmatprep.subr.bf16.mxu0 %v7078_v36  ;;  %3768 = vmatpush1.bf16.msra.mxu1 %v7097_v0  ;;  %v7163_v33 = vld [vmem:[#allocation5 + $0x218] ss:$24 sps:$4 sm:$0xff]   ;;  %v7169_v36 = vld [vmem:[#allocation5 + $0x248] ss:$24 sps:$4 sm:$0xff]   ;;  %v2076_v0 = vunpack.c.l.b16 %v8395_v50 }
 0x13b   : > { %3769 = vmatprep.subr.bf16.mxu1 %v7105_v41  ;;  %3676 = vmatprep.mubr.bf16.mxu0 %v8578_v42  ;;  %v7130_v41 = vld [vmem:[#allocation5 + $0x270] ss:$24 sps:$4 sm:$0xff]   ;;  %v7136_v50 = vld [vmem:[#allocation5 + $0x2a0] ss:$24 sps:$4 sm:$0xff]  }
 0x13c   : > { %3799 = vmatprep.mubr.bf16.mxu1 %v8578_v42 }
 0x13d   : > { %3647 = vmatpush1.bf16.msra.mxu0 %v7076_v43  ;;  %v2082_v43 = vunpack.c.l.b16 %v8448_v12  ;;  %v2099_v12 = vunpack.c.l.b16 %v8545_v63 }
 0x13e   : > { %3648 = vmatprep.subr.bf16.mxu0 %v7081_v51  ;;  %3770 = vmatpush1.bf16.msra.mxu1 %v7103_v44  ;;  %v7138_v51 = vld [vmem:[#allocation5 + $0x2a4] ss:$24 sps:$4 sm:$0xff]   ;;  %v2088_v44 = vunpack.c.l.b16 %v8473_v23  ;;  %v7181_v23 = vld [vmem:[#allocation5 + $0x2a8] ss:$24 sps:$4 sm:$0xff]  }
 0x13f   : > { %3771 = vmatprep.subr.bf16.mxu1 %v7111_v45  ;;  %v7175_v45 = vld [vmem:[#allocation5 + $0x278] ss:$24 sps:$4 sm:$0xff]  }
 0x141   : > { %3649 = vmatpush1.bf16.msra.mxu0 %v7079_v46  ;;  %v2087_v46 = vunpack.c.l.b16 %v8482_v25  ;;  %v7189_v25 = vld [vmem:[#allocation5 + $0x2dc] ss:$24 sps:$4 sm:$0xff]  }
 0x142   : > { %3650 = vmatprep.subr.bf16.mxu0 %v7084_v47  ;;  %3772 = vmatpush1.bf16.msra.mxu1 %v7109_v49  ;;  %v2094_v47 = vunpack.c.l.b16 %v8510_v37  ;;  %v7183_v49 = vld [vmem:[#allocation5 + $0x2ac] ss:$24 sps:$4 sm:$0xff]  }
 0x143   : > { %3773 = vmatprep.subr.bf16.mxu1 %v7117_v53  ;;  %v2182_v53 = vrot.slane %v2076_v0, 5  ;;  %v7229_v0 = vld [vmem:[#allocation5 + $0x428] ss:$24 sps:$4 sm:$0xff]  }
 0x145   : > { %3651 = vmatpush1.bf16.msra.mxu0 %v7082_v55  ;;  %v2093_v55 = vunpack.c.l.b16 %v8518_v40  ;;  %v2176_v40 = vrot.slane %v2099_v12, 1  ;;  %v7255_v12 = vld [vmem:[#allocation5 + $0x4ec] ss:$24 sps:$4 sm:$0xff]  }
 0x146   : > { %3652 = vmatprep.subr.bf16.mxu0 %v7087_v56  ;;  %3774 = vmatpush1.bf16.msra.mxu1 %v7115_v57  ;;  %v2184_v56 = vrot.slane %v2082_v43, 4  ;;  %v7144_v57 = vld [vmem:[#allocation5 + $0x2d4] ss:$24 sps:$4 sm:$0xff]   ;;  %v7190_v43 = vld [vmem:[#allocation5 + $0x450] ss:$24 sps:$4 sm:$0xff]  }
 0x147   : > { %3775 = vmatprep.subr.bf16.mxu1 %v7123_v58  ;;  %v2186_v58 = vrot.slane %v2088_v44, 3  ;;  %v2174_v37 = vrot.slane %v2093_v55, 2  ;;  %v7235_v44 = vld [vmem:[#allocation5 + $0x458] ss:$24 sps:$4 sm:$0xff]  }
 0x148   : > { %v7202_v55 = vld [vmem:[#allocation5 + $0x4b0] ss:$24 sps:$4 sm:$0xff]  }
 0x149   : > { %3653 = vmatpush1.bf16.msra.mxu0 %v7085_v59  ;;  %v2172_v59 = vrot.slane %v2087_v46, 3  ;;  %v7196_v46 = vld [vmem:[#allocation5 + $0x480] ss:$24 sps:$4 sm:$0xff]  }
 0x14a   : > { %3654 = vmatprep.subr.bf16.mxu0 %v7090_v60  ;;  %3776 = vmatpush1.bf16.msra.mxu1 %v7121_v61  ;;  %v2188_v60 = vrot.slane %v2094_v47, 2  ;;  %v7142_v61 = vld [vmem:[#allocation5 + $0x2d0] ss:$24 sps:$4 sm:$0xff]   ;;  %v7204_v47 = vld [vmem:[#allocation5 + $0x4b4] ss:$24 sps:$4 sm:$0xff]  }
 0x14b   : > { %3777 = vmatprep.subr.bf16.mxu1 %v7129_v48  ;;  %v2183_v48 = vsel %vm2108_vm4, %v2182_v53, %v8359_v20  ;;  %v8602_v20 = vpack.c.b16 %v8456_v15, %v8456_v15  ;;  %v7154_v15 = vld [vmem:[#allocation5 + $0x330] ss:$24 sps:$4 sm:$0xff]   ;;  %v7249_v53 = vld [vmem:[#allocation5 + $0x4bc] ss:$24 sps:$4 sm:$0xff]  }
 0x14c   : > { %v2185_v63 = vsel %vm2111_vm5, %v2184_v56, %v2183_v48  ;;  %v7247_v56 = vld [vmem:[#allocation5 + $0x4b8] ss:$24 sps:$4 sm:$0xff]  }
 0x14d   : > { %3655 = vmatpush1.bf16.msra.mxu0 %v7088_v62  ;;  %v7150_v62 = vld [vmem:[#allocation5 + $0x304] ss:$24 sps:$4 sm:$0xff]   ;;  %v7220_v48 = vld [vmem:[#allocation5 + $0x540] ss:$24 sps:$4 sm:$0xff]  }
 0x14e   : > { %3656 = vmatprep.subr.bf16.mxu0 %v7093_v2  ;;  %3778 = vmatpush1.bf16.msra.mxu1 %v7127_v1  ;;  %v7187_v2 = vld [vmem:[#allocation5 + $0x2d8] ss:$24 sps:$4 sm:$0xff]   ;;  %v2187_v1 = vsel %vm2114_vm6, %v2186_v58, %v2185_v63  ;;  %v7216_v58 = vld [vmem:[#allocation5 + $0x514] ss:$24 sps:$4 sm:$0xff]  }
 0x14f   : > { %3779 = vmatprep.subr.bf16.mxu1 %v7135_v3  ;;  %v7195_v3 = vld [vmem:[#allocation5 + $0x30c] ss:$24 sps:$4 sm:$0xff]   ;;  %v7273_v63 = vld [vmem:[#allocation5 + $0x57c] ss:$24 sps:$4 sm:$0xff]  }
 0x151   : > { %3657 = vmatpush1.bf16.msra.mxu0 %v7091_v4  ;;  %v8596_v4 = vsel %vm2117_vm7, %v2188_v60, %v2187_v1  ;;  %v7214_v60 = vld [vmem:[#allocation5 + $0x510] ss:$24 sps:$4 sm:$0xff]   ;;  %v7234_v1 = vld [vmem:[#allocation5 + $0x5a4] ss:$24 sps:$4 sm:$0xff]  }
 0x152   : > { %3658 = vmatprep.subr.bf16.mxu0 %v7096_v5  ;;  %3780 = vmatpush1.bf16.msra.mxu1 %v7133_v6  ;;  %v2173_v5 = vsel %vm2114_vm6, %v2172_v59, %v8402_v52  ;;  %v7148_v6 = vld [vmem:[#allocation5 + $0x300] ss:$24 sps:$4 sm:$0xff]   ;;  %v8610_v52 = vpack.c.b16 %v8572_v38, %v8572_v38  ;;  %v7168_v38 = vld [vmem:[#allocation5 + $0x394] ss:$24 sps:$4 sm:$0xff]  }
 0x153   : > { %3781 = vmatprep.subr.bf16.mxu1 %v7141_v7  ;;  %v2175_v7 = vsel %vm2117_vm7, %v2174_v37, %v2173_v5  ;;  %v7261_v59 = vld [vmem:[#allocation5 + $0x51c] ss:$24 sps:$4 sm:$0xff]   ;;  %v7259_v37 = vld [vmem:[#allocation5 + $0x518] ss:$24 sps:$4 sm:$0xff]   ;;  %v7279_v5 = vld [vmem:[#allocation5 + $0x5ac] ss:$24 sps:$4 sm:$0xff]  }
 0x155   : > { %3659 = vmatpush1.bf16.msra.mxu0 %v7094_v8  ;;  %v7156_v8 = vld [vmem:[#allocation5 + $0x334] ss:$24 sps:$4 sm:$0xff]  }
 0x156   : > { %3660 = vmatprep.subr.bf16.mxu0 %v7102_v9  ;;  %3782 = vmatpush1.bf16.msra.mxu1 %v7139_v11  ;;  %v8606_v9 = vsel %vm2120_vm8, %v2176_v40, %v2175_v7  ;;  %v7193_v11 = vld [vmem:[#allocation5 + $0x308] ss:$24 sps:$4 sm:$0xff]   ;;  %v7228_v40 = vld [vmem:[#allocation5 + $0x574] ss:$24 sps:$4 sm:$0xff]  }
 0x157   : > { %3783 = vmatprep.subr.bf16.mxu1 %v7147_v13  ;;  %v7201_v13 = vld [vmem:[#allocation5 + $0x33c] ss:$24 sps:$4 sm:$0xff]   ;;  %v7232_v7 = vld [vmem:[#allocation5 + $0x5a0] ss:$24 sps:$4 sm:$0xff]  }
 0x159   : > { %3661 = vmatpush1.bf16.msra.mxu0 %v7100_v14  ;;  %v7162_v14 = vld [vmem:[#allocation5 + $0x364] ss:$24 sps:$4 sm:$0xff]  }
 0x15a   : > { %3662 = vmatprep.subr.bf16.mxu0 %v7108_v16  ;;  %3784 = vmatpush1.bf16.msra.mxu1 %v7145_v17  ;;  %v7199_v16 = vld [vmem:[#allocation5 + $0x338] ss:$24 sps:$4 sm:$0xff]   ;;  %v7207_v17 = vld [vmem:[#allocation5 + $0x36c] ss:$24 sps:$4 sm:$0xff]  }
 0x15b   : > { %3785 = vmatprep.subr.bf16.mxu1 %v7153_v18  ;;  %v7160_v18 = vld [vmem:[#allocation5 + $0x360] ss:$24 sps:$4 sm:$0xff]  }
 0x15d   : > { %3663 = vmatpush1.bf16.msra.mxu0 %v7106_v19  ;;  %v7205_v19 = vld [vmem:[#allocation5 + $0x368] ss:$24 sps:$4 sm:$0xff]  }
 0x15e   : > { %3664 = vmatprep.subr.bf16.mxu0 %v7114_v21  ;;  %3786 = vmatpush1.bf16.msra.mxu1 %v7151_v22  ;;  %v7213_v21 = vld [vmem:[#allocation5 + $0x39c] ss:$24 sps:$4 sm:$0xff]   ;;  %v7166_v22 = vld [vmem:[#allocation5 + $0x390] ss:$24 sps:$4 sm:$0xff]  }
 0x15f   : > { %3787 = vmatprep.subr.bf16.mxu1 %v7159_v24  ;;  %v7174_v24 = vld [vmem:[#allocation5 + $0x3c4] ss:$24 sps:$4 sm:$0xff]  }
 0x161   : > { %3665 = vmatpush1.bf16.msra.mxu0 %v7112_v26  ;;  %v7211_v26 = vld [vmem:[#allocation5 + $0x398] ss:$24 sps:$4 sm:$0xff]  }
 0x162   : > { %3666 = vmatprep.subr.bf16.mxu0 %v7120_v27  ;;  %3788 = vmatpush1.bf16.msra.mxu1 %v7157_v28  ;;  %v7219_v27 = vld [vmem:[#allocation5 + $0x3cc] ss:$24 sps:$4 sm:$0xff]   ;;  %v7172_v28 = vld [vmem:[#allocation5 + $0x3c0] ss:$24 sps:$4 sm:$0xff]  }
 0x163   : > { %3789 = vmatprep.subr.bf16.mxu1 %v7165_v29  ;;  %v7180_v29 = vld [vmem:[#allocation5 + $0x3f4] ss:$24 sps:$4 sm:$0xff]  }
 0x165   : > { %3667 = vmatpush1.bf16.msra.mxu0 %v7118_v31  ;;  %v7217_v31 = vld [vmem:[#allocation5 + $0x3c8] ss:$24 sps:$4 sm:$0xff]  }
 0x166   : > { %3668 = vmatprep.subr.bf16.mxu0 %v7126_v32  ;;  %3790 = vmatpush1.bf16.msra.mxu1 %v7163_v33  ;;  %v7225_v32 = vld [vmem:[#allocation5 + $0x3fc] ss:$24 sps:$4 sm:$0xff]   ;;  %v7178_v33 = vld [vmem:[#allocation5 + $0x3f0] ss:$24 sps:$4 sm:$0xff]  }
 0x167   : > { %3791 = vmatprep.subr.bf16.mxu1 %v7171_v34  ;;  %v7186_v34 = vld [vmem:[#allocation5 + $0x424] ss:$24 sps:$4 sm:$0xff]  }
 0x169   : > { %3669 = vmatpush1.bf16.msra.mxu0 %v7124_v35  ;;  %v7223_v35 = vld [vmem:[#allocation5 + $0x3f8] ss:$24 sps:$4 sm:$0xff]  }
 0x16a   : > { %3670 = vmatprep.subr.bf16.mxu0 %v7132_v10  ;;  %3792 = vmatpush1.bf16.msra.mxu1 %v7169_v36  ;;  %v7231_v10 = vld [vmem:[#allocation5 + $0x42c] ss:$24 sps:$4 sm:$0xff]   ;;  %v7184_v36 = vld [vmem:[#allocation5 + $0x420] ss:$24 sps:$4 sm:$0xff]  }
 0x16b   : > { %3793 = vmatprep.subr.bf16.mxu1 %v7177_v39  ;;  %v7192_v39 = vld [vmem:[#allocation5 + $0x454] ss:$24 sps:$4 sm:$0xff]  }
 0x16d   : > { %3671 = vmatpush1.bf16.msra.mxu0 %v7130_v41  ;;  %v7237_v41 = vld [vmem:[#allocation5 + $0x45c] ss:$24 sps:$4 sm:$0xff]  }
 0x16e   : > { %3672 = vmatprep.subr.bf16.mxu0 %v7138_v51  ;;  %3794 = vmatpush1.bf16.msra.mxu1 %v7175_v45  ;;  %v7198_v51 = vld [vmem:[#allocation5 + $0x484] ss:$24 sps:$4 sm:$0xff]  }
 0x16f   : > { %3795 = vmatprep.subr.bf16.mxu1 %v7183_v49  ;;  %v7243_v45 = vld [vmem:[#allocation5 + $0x48c] ss:$24 sps:$4 sm:$0xff]   ;;  %v7241_v49 = vld [vmem:[#allocation5 + $0x488] ss:$24 sps:$4 sm:$0xff]  }
 0x171   : > { %3673 = vmatpush1.bf16.msra.mxu0 %v7136_v50  ;;  %v7210_v50 = vld [vmem:[#allocation5 + $0x4e4] ss:$24 sps:$4 sm:$0xff]  }
 0x172   : > { %3674 = vmatprep.subr.bf16.mxu0 %v7144_v57  ;;  %3796 = vmatpush1.bf16.msra.mxu1 %v7181_v23  ;;  %v7208_v57 = vld [vmem:[#allocation5 + $0x4e0] ss:$24 sps:$4 sm:$0xff]  }
 0x173   : > { %3797 = vmatprep.subr.bf16.mxu1 %v7189_v25  ;;  %v7253_v23 = vld [vmem:[#allocation5 + $0x4e8] ss:$24 sps:$4 sm:$0xff]   ;;  %v7222_v25 = vld [vmem:[#allocation5 + $0x544] ss:$24 sps:$4 sm:$0xff]  }
 0x175   : > { %3675 = vmatpush1.bf16.msra.mxu0 %v7142_v61  ;;  %v7267_v61 = vld [vmem:[#allocation5 + $0x54c] ss:$24 sps:$4 sm:$0xff]  }
 0x176   : > { %3685 = vmatprep.subr.bf16.mxu0 %v7150_v62  ;;  %3798 = vmatpush1.bf16.msra.mxu1 %v7187_v2  ;;  %v7265_v62 = vld [vmem:[#allocation5 + $0x548] ss:$24 sps:$4 sm:$0xff]  }
 0x177   : > { %3808 = vmatprep.subr.bf16.mxu1 %v7195_v3  ;;  %v7226_v2 = vld [vmem:[#allocation5 + $0x570] ss:$24 sps:$4 sm:$0xff]  }
 0x178   : > { %3677 = vmatmul.mubr.bf16.vlgmr.msra.gmra.mrb[48].mxu0 %v8602_v20  ;;  %v7271_v3 = vld [vmem:[#allocation5 + $0x578] ss:$24 sps:$4 sm:$0xff]  }
 0x179   : > { %3686 = vmatpush1.bf16.msra.mxu0 %v7148_v6  ;;  %3800 = vmatmul.mubr.bf16.vlgmr.msra.gmra.mrb[48].mxu1 %v8602_v20  ;;  %v2100_v6 = vunpack.c.l.b16 %v8534_v54 }
 0x17a   : > { %3687 = vmatprep.subr.bf16.mxu0 %v7156_v8  ;;  %3809 = vmatpush1.bf16.msra.mxu1 %v7193_v11  ;;  %v7240_v8 = vld [vmem:[#allocation5 + $0x5d4] ss:$24 sps:$4 sm:$0xff]   ;;  %v7277_v11 = vld [vmem:[#allocation5 + $0x5a8] ss:$24 sps:$4 sm:$0xff]  }
 0x17b   : > { %3810 = vmatprep.subr.bf16.mxu1 %v7201_v13  ;;  %3717 = vmatprep.mubr.bf16.mxu0 %v8610_v52  ;;  %v7285_v13 = vld [vmem:[#allocation5 + $0x5dc] ss:$24 sps:$4 sm:$0xff]  }
 0x17c   : > { %3840 = vmatprep.mubr.bf16.mxu1 %v8610_v52 }
 0x17d   : > { %3688 = vmatpush1.bf16.msra.mxu0 %v7154_v15  ;;  %v2190_v15 = vrot.slane %v2100_v6, 1 }
 0x17e   : > { %3689 = vmatprep.subr.bf16.mxu0 %v7162_v14  ;;  %3811 = vmatpush1.bf16.msra.mxu1 %v7199_v16  ;;  %v7238_v14 = vld [vmem:[#allocation5 + $0x5d0] ss:$24 sps:$4 sm:$0xff]   ;;  %v7246_v16 = vld [vmem:[#allocation5 + $0x604] ss:$24 sps:$4 sm:$0xff]  }
 0x17f   : > { %3812 = vmatprep.subr.bf16.mxu1 %v7207_v17  ;;  %v7283_v17 = vld [vmem:[#allocation5 + $0x5d8] ss:$24 sps:$4 sm:$0xff]  }
 0x181   : > { %3690 = vmatpush1.bf16.msra.mxu0 %v7160_v18  ;;  %v7291_v18 = vld [vmem:[#allocation5 + $0x60c] ss:$24 sps:$4 sm:$0xff]  }
 0x182   : > { %3691 = vmatprep.subr.bf16.mxu0 %v7168_v38  ;;  %3813 = vmatpush1.bf16.msra.mxu1 %v7205_v19 }
 0x183   : > { %3814 = vmatprep.subr.bf16.mxu1 %v7213_v21  ;;  %v8621_v21 = vpack.c.b16 %v8576_v30, %v8576_v30 }
 0x185   : > { %3692 = vmatpush1.bf16.msra.mxu0 %v7166_v22  ;;  %v2191_v22 = vsel %vm2120_vm8, %v2190_v15, %v8596_v4  ;;  %v7258_v4 = vld [vmem:[#allocation5 + $0x664] ss:$24 sps:$4 sm:$0xff]  }
 0x186   : > { %3693 = vmatprep.subr.bf16.mxu0 %v7174_v24  ;;  %3815 = vmatpush1.bf16.msra.mxu1 %v7211_v26  ;;  %v7244_v26 = vld [vmem:[#allocation5 + $0x600] ss:$24 sps:$4 sm:$0xff]   ;;  %v8627_v30 = vpack.c.b16 %v2191_v22, %v2191_v22 }
 0x187   : > { %3816 = vmatprep.subr.bf16.mxu1 %v7219_v27 }
 0x189   : > { %3694 = vmatpush1.bf16.msra.mxu0 %v7172_v28  ;;  %v7252_v28 = vld [vmem:[#allocation5 + $0x634] ss:$24 sps:$4 sm:$0xff]  }
 0x18a   : > { %3695 = vmatprep.subr.bf16.mxu0 %v7180_v29  ;;  %3817 = vmatpush1.bf16.msra.mxu1 %v7217_v31 }
 0x18b   : > { %3818 = vmatprep.subr.bf16.mxu1 %v7225_v32  ;;  %v7289_v32 = vld [vmem:[#allocation5 + $0x608] ss:$24 sps:$4 sm:$0xff]  }
 0x18d   : > { %3696 = vmatpush1.bf16.msra.mxu0 %v7178_v33  ;;  %v7297_v33 = vld [vmem:[#allocation5 + $0x63c] ss:$24 sps:$4 sm:$0xff]  }
 0x18e   : > { %3697 = vmatprep.subr.bf16.mxu0 %v7186_v34  ;;  %3819 = vmatpush1.bf16.msra.mxu1 %v7223_v35  ;;  %v7250_v35 = vld [vmem:[#allocation5 + $0x630] ss:$24 sps:$4 sm:$0xff]  }
 0x18f   : > { %3820 = vmatprep.subr.bf16.mxu1 %v7231_v10  ;;  %v7295_v10 = vld [vmem:[#allocation5 + $0x638] ss:$24 sps:$4 sm:$0xff]  }
 0x191   : > { %3698 = vmatpush1.bf16.msra.mxu0 %v7184_v36  ;;  %v7303_v36 = vld [vmem:[#allocation5 + $0x66c] ss:$24 sps:$4 sm:$0xff]  }
 0x192   : > { %3699 = vmatprep.subr.bf16.mxu0 %v7192_v39  ;;  %3821 = vmatpush1.bf16.msra.mxu1 %v7229_v0 }
 0x193   : > { %3822 = vmatprep.subr.bf16.mxu1 %v7237_v41  ;;  %v7256_v41 = vld [vmem:[#allocation5 + $0x660] ss:$24 sps:$4 sm:$0xff]  }
 0x195   : > { %3700 = vmatpush1.bf16.msra.mxu0 %v7190_v43 }
 0x196   : > { %3701 = vmatprep.subr.bf16.mxu0 %v7198_v51  ;;  %3823 = vmatpush1.bf16.msra.mxu1 %v7235_v44 }
 0x197   : > { %3824 = vmatprep.subr.bf16.mxu1 %v7243_v45  ;;  %v7264_v45 = vld [vmem:[#allocation5 + $0x694] ss:$24 sps:$4 sm:$0xff]  }
 0x199   : > { %3702 = vmatpush1.bf16.msra.mxu0 %v7196_v46 }
 0x19a   : > { %3703 = vmatprep.subr.bf16.mxu0 %v7204_v47  ;;  %3825 = vmatpush1.bf16.msra.mxu1 %v7241_v49 }
 0x19b   : > { %3826 = vmatprep.subr.bf16.mxu1 %v7249_v53 }
 0x19d   : > { %3704 = vmatpush1.bf16.msra.mxu0 %v7202_v55  ;;  %v7301_v55 = vld [vmem:[#allocation5 + $0x668] ss:$24 sps:$4 sm:$0xff]  }
 0x19e   : > { %3705 = vmatprep.subr.bf16.mxu0 %v7210_v50  ;;  %3827 = vmatpush1.bf16.msra.mxu1 %v7247_v56 }
 0x19f   : > { %3828 = vmatprep.subr.bf16.mxu1 %v7255_v12 }
 0x1a1   : > { %3706 = vmatpush1.bf16.msra.mxu0 %v7208_v57 }
 0x1a2   : > { %3707 = vmatprep.subr.bf16.mxu0 %v7216_v58  ;;  %3829 = vmatpush1.bf16.msra.mxu1 %v7253_v23  ;;  %v7309_v58 = vld [vmem:[#allocation5 + $0x69c] ss:$24 sps:$4 sm:$0xff]  }
 0x1a3   : > { %3830 = vmatprep.subr.bf16.mxu1 %v7261_v59 }
 0x1a5   : > { %3708 = vmatpush1.bf16.msra.mxu0 %v7214_v60 }
 0x1a6   : > { %3709 = vmatprep.subr.bf16.mxu0 %v7222_v25  ;;  %3831 = vmatpush1.bf16.msra.mxu1 %v7259_v37  ;;  %v7262_v25 = vld [vmem:[#allocation5 + $0x690] ss:$24 sps:$4 sm:$0xff]  }
 0x1a7   : > { %3832 = vmatprep.subr.bf16.mxu1 %v7267_v61  ;;  %v7270_v61 = vld [vmem:[#allocation5 + $0x6c4] ss:$24 sps:$4 sm:$0xff]  }
 0x1a9   : > { %3710 = vmatpush1.bf16.msra.mxu0 %v7220_v48  ;;  %v7307_v48 = vld [vmem:[#allocation5 + $0x698] ss:$24 sps:$4 sm:$0xff]  }
 0x1aa   : > { %3711 = vmatprep.subr.bf16.mxu0 %v7228_v40  ;;  %3833 = vmatpush1.bf16.msra.mxu1 %v7265_v62  ;;  %v7315_v62 = vld [vmem:[#allocation5 + $0x6cc] ss:$24 sps:$4 sm:$0xff]  }
 0x1ab   : > { %3834 = vmatprep.subr.bf16.mxu1 %v7273_v63 }
 0x1ad   : > { %3712 = vmatpush1.bf16.msra.mxu0 %v7226_v2 }
 0x1ae   : > { %3713 = vmatprep.subr.bf16.mxu0 %v7234_v1  ;;  %3835 = vmatpush1.bf16.msra.mxu1 %v7271_v3  ;;  %v7268_v1 = vld [vmem:[#allocation5 + $0x6c0] ss:$24 sps:$4 sm:$0xff]  }
 0x1af   : > { %3836 = vmatprep.subr.bf16.mxu1 %v7279_v5 }
 0x1b1   : > { %3714 = vmatpush1.bf16.msra.mxu0 %v7232_v7 }
 0x1b2   : > { %3715 = vmatprep.subr.bf16.mxu0 %v7240_v8  ;;  %3837 = vmatpush1.bf16.msra.mxu1 %v7277_v11  ;;  %v7276_v11 = vld [vmem:[#allocation5 + $0x6f4] ss:$24 sps:$4 sm:$0xff]  }
 0x1b3   : > { %v531_v54 = vpop.f32.mrb[0].mxu0  ;;  %3838 = vmatprep.subr.bf16.mxu1 %v7285_v13 }
 0x1b4   : > { %v533_v38 = vpop.f32.mrb[1].mxu0  ;;  %v8617_v19 = vpop.f32.mrb[0].mxu1  ;;  %v4157_v39 = vrot.slane %v531_v54, 1 }
 0x1b5   : > { %3716 = vmatpush1.bf16.msra.mxu0 %v7238_v14  ;;  %v535_v24 = vpop.f32.mrb[2].mxu0  ;;  %v8625_v27 = vpop.f32.mrb[1].mxu1  ;;  %v4171_v43 = vrot.slane %v533_v38, 1  ;;  %v4185_v23 = vrot.slane %v8617_v19, 1 }
 0x1b6   : > { %v536_v29 = vpop.f32.mrb[3].mxu0  ;;  %3726 = vmatprep.subr.bf16.mxu0 %v7246_v16  ;;  %v576_v31 = vpop.f32.mrb[2].mxu1  ;;  %3839 = vmatpush1.bf16.msra.mxu1 %v7283_v17  ;;  %v4199_v40 = vrot.slane %v8625_v27, 1 }
 0x1b7   : > { %v577_v34 = vpop.f32.mrb[3].mxu1  ;;  %3849 = vmatprep.subr.bf16.mxu1 %v7291_v18  ;;  %v7321_v29 = vld [vmem:[#allocation5 + $0x6fc] ss:$24 sps:$4 sm:$0xff]  }
 0x1b8   : > { %3718 = vmatmul.mubr.bf16.vlgmr.msra.gmra.mrb[48].mxu0 %v8621_v21  ;;  %v7274_v34 = vld [vmem:[#allocation5 + $0x6f0] ss:$24 sps:$4 sm:$0xff]  }
 0x1b9   : > { %3727 = vmatpush1.bf16.msra.mxu0 %v7244_v26  ;;  %3841 = vmatmul.mubr.bf16.vlgmr.msra.gmra.mrb[48].mxu1 %v8621_v21 }
 0x1ba   : > { %3728 = vmatprep.subr.bf16.mxu0 %v7252_v28  ;;  %3850 = vmatpush1.bf16.msra.mxu1 %v7289_v32 }
 0x1bb   : > { %v613_v0 = vpop.f32.mrb[4].mxu0  ;;  %3851 = vmatprep.subr.bf16.mxu1 %v7297_v33  ;;  %3758 = vmatprep.mubr.bf16.mxu0 %v8627_v30 }
 0x1bc   : > { %v690_v51 = vpop.f32.mrb[4].mxu1  ;;  %v615_v44 = vpop.f32.mrb[5].mxu0  ;;  %3881 = vmatprep.mubr.bf16.mxu1 %v8627_v30  ;;  %v4213_v63 = vrot.slane %v613_v0, 1 }
 0x1bd   : > { %v4067_v46 = vrot.slane %v690_v51, 7  ;;  %v8634_v47 = vsel %vm2102_vm2, %v690_v51, %v4157_v39  ;;  %v692_v49 = vpop.f32.mrb[5].mxu1  ;;  %3729 = vmatpush1.bf16.msra.mxu0 %v7250_v35  ;;  %v617_v53 = vpop.f32.mrb[6].mxu0  ;;  %v4227_v3 = vrot.slane %v615_v44, 1  ;;  %v7282_v35 = vld [vmem:[#allocation5 + $0x724] ss:$24 sps:$4 sm:$0xff]  }
 0x1be   : > { %v4081_v50 = vrot.slane %v692_v49, 7  ;;  %v8637_v56 = vsel %vm2102_vm2, %v692_v49, %v4171_v43  ;;  %v618_v12 = vpop.f32.mrb[7].mxu0  ;;  %3730 = vmatprep.subr.bf16.mxu0 %v7258_v4  ;;  %v694_v57 = vpop.f32.mrb[6].mxu1  ;;  %3852 = vmatpush1.bf16.msra.mxu1 %v7295_v10  ;;  %v7319_v4 = vld [vmem:[#allocation5 + $0x6f8] ss:$24 sps:$4 sm:$0xff]  }
 0x1bf   : > { %v8641_v59 = vsel %vm2102_vm2, %v4067_v46, %v531_v54  ;;  %v695_v60 = vpop.f32.mrb[7].mxu1  ;;  %3853 = vmatprep.subr.bf16.mxu1 %v7303_v36  ;;  %v7313_v54 = vld [vmem:[#allocation5 + $0x6c8] ss:$24 sps:$4 sm:$0xff]   ;;  %v7327_v10 = vld [vmem:[#allocation5 + $0x72c] ss:$24 sps:$4 sm:$0xff]  }
 0x1c0   : > { %v8644_v37 = vsel %vm2102_vm2, %v4081_v50, %v533_v38  ;;  %v7280_v39 = vld [vmem:[#allocation5 + $0x720] ss:$24 sps:$4 sm:$0xff]  }
 0x1c1   : > { %3731 = vmatpush1.bf16.msra.mxu0 %v7256_v41 }
 0x1c2   : > { %3732 = vmatprep.subr.bf16.mxu0 %v7264_v45  ;;  %3854 = vmatpush1.bf16.msra.mxu1 %v7301_v55 }
 0x1c3   : > { %v731_v2 = vpop.f32.mrb[8].mxu0  ;;  %3855 = vmatprep.subr.bf16.mxu1 %v7309_v58 }
 0x1c4   : > { %v4095_v5 = vrot.slane %v731_v2, 7  ;;  %v4186_v6 = vsel %vm2102_vm2, %v731_v2, %v4185_v23  ;;  %v772_v7 = vpop.f32.mrb[8].mxu1  ;;  %v733_v8 = vpop.f32.mrb[9].mxu0 }
 0x1c5   : > { %v4123_v13 = vrot.slane %v772_v7, 7  ;;  %v8649_v15 = vsel %vm2102_vm2, %v772_v7, %v4213_v63  ;;  %v4109_v14 = vrot.slane %v733_v8, 7  ;;  %v4200_v16 = vsel %vm2102_vm2, %v733_v8, %v4199_v40  ;;  %v774_v17 = vpop.f32.mrb[9].mxu1  ;;  %3733 = vmatpush1.bf16.msra.mxu0 %v7262_v25  ;;  %v735_v18 = vpop.f32.mrb[10].mxu0  ;;  %v7325_v25 = vld [vmem:[#allocation5 + $0x728] ss:$24 sps:$4 sm:$0xff]  }
 0x1c6   : > { %v4096_v38 = vsel %vm2102_vm2, %v4095_v5, %v8617_v19  ;;  %v4137_v22 = vrot.slane %v774_v17, 7  ;;  %v8655_v24 = vsel %vm2102_vm2, %v774_v17, %v4227_v3  ;;  %v736_v26 = vpop.f32.mrb[11].mxu0  ;;  %3734 = vmatprep.subr.bf16.mxu0 %v7270_v61  ;;  %v776_v28 = vpop.f32.mrb[10].mxu1  ;;  %3856 = vmatpush1.bf16.msra.mxu1 %v7307_v48  ;;  %v7333_v63 = vld [vmem:[#allocation5 + $0x75c] ss:$24 sps:$4 sm:$0xff]  }
 0x1c7   : > { %v8658_v31 = vsel %vm2102_vm2, %v4123_v13, %v613_v0  ;;  %v4110_v32 = vsel %vm2102_vm2, %v4109_v14, %v8625_v27  ;;  %v777_v33 = vpop.f32.mrb[11].mxu1  ;;  %3857 = vmatprep.subr.bf16.mxu1 %v7315_v62  ;;  %v7288_v27 = vld [vmem:[#allocation5 + $0x754] ss:$24 sps:$4 sm:$0xff]   ;;  %v7286_v62 = vld [vmem:[#allocation5 + $0x750] ss:$24 sps:$4 sm:$0xff]  }
 0x1c8   : > { %v8663_v19 = vsel %vm2102_vm2, %v4137_v22, %v615_v44  ;;  %v7294_v3 = vld [vmem:[#allocation5 + $0x784] ss:$24 sps:$4 sm:$0xff]   ;;  %v7331_v5 = vld [vmem:[#allocation5 + $0x758] ss:$24 sps:$4 sm:$0xff]   ;;  %v7300_v14 = vld [vmem:[#allocation5 + $0x7b4] ss:$24 sps:$4 sm:$0xff]  }
 0x1c9   : > { %3735 = vmatpush1.bf16.msra.mxu0 %v7268_v1  ;;  %v7292_v7 = vld [vmem:[#allocation5 + $0x780] ss:$24 sps:$4 sm:$0xff]  }
 0x1ca   : > { %3736 = vmatprep.subr.bf16.mxu0 %v7276_v11  ;;  %3858 = vmatpush1.bf16.msra.mxu1 %v7313_v54 }
 0x1cb   : > { %v849_v36 = vpop.f32.mrb[12].mxu0  ;;  %3859 = vmatprep.subr.bf16.mxu1 %v7321_v29 }
 0x1cc   : > { %v4069_v0 = vrot.slane %v849_v36, 6  ;;  %v4159_v41 = vrot.slane %v849_v36, 7  ;;  %v890_v43 = vpop.f32.mrb[12].mxu1  ;;  %v851_v51 = vpop.f32.mrb[13].mxu0 }
 0x1cd   : > { %v4097_v45 = vrot.slane %v890_v43, 6  ;;  %v4187_v46 = vrot.slane %v890_v43, 7  ;;  %v4083_v49 = vrot.slane %v851_v51, 6  ;;  %v4173_v53 = vrot.slane %v851_v51, 7  ;;  %v892_v44 = vpop.f32.mrb[13].mxu1  ;;  %3737 = vmatpush1.bf16.msra.mxu0 %v7274_v34  ;;  %v853_v55 = vpop.f32.mrb[14].mxu0 }
 0x1ce   : > { %v4070_v50 = vsel %vm2105_vm3, %v4069_v0, %v8641_v59  ;;  %v4160_v12 = vsel %vm2105_vm3, %v4159_v41, %v8634_v47  ;;  %v4111_v57 = vrot.slane %v892_v44, 6  ;;  %v4201_v58 = vrot.slane %v892_v44, 7  ;;  %v854_v23 = vpop.f32.mrb[15].mxu0  ;;  %3738 = vmatprep.subr.bf16.mxu0 %v7282_v35  ;;  %v894_v60 = vpop.f32.mrb[14].mxu1  ;;  %3860 = vmatpush1.bf16.msra.mxu1 %v7319_v4  ;;  %v7337_v35 = vld [vmem:[#allocation5 + $0x788] ss:$24 sps:$4 sm:$0xff]  }
 0x1cf   : > { %v8670_v61 = vsel %vm2105_vm3, %v4097_v45, %v4096_v38  ;;  %v8673_v48 = vsel %vm2105_vm3, %v4187_v46, %v4186_v6  ;;  %v4084_v40 = vsel %vm2105_vm3, %v4083_v49, %v8644_v37  ;;  %v4174_v59 = vsel %vm2105_vm3, %v4173_v53, %v8637_v56  ;;  %v895_v47 = vpop.f32.mrb[15].mxu1  ;;  %3861 = vmatprep.subr.bf16.mxu1 %v7327_v10  ;;  %v7339_v6 = vld [vmem:[#allocation5 + $0x78c] ss:$24 sps:$4 sm:$0xff]   ;;  %v7345_v0 = vld [vmem:[#allocation5 + $0x7bc] ss:$24 sps:$4 sm:$0xff]  }
 0x1d0   : > { %v8680_v2 = vsel %vm2105_vm3, %v4111_v57, %v4110_v32  ;;  %v8683_v1 = vsel %vm2105_vm3, %v4201_v58, %v4200_v16  ;;  %v7306_v51 = vld [vmem:[#allocation5 + $0x7e4] ss:$24 sps:$4 sm:$0xff]   ;;  %v7304_v46 = vld [vmem:[#allocation5 + $0x7e0] ss:$24 sps:$4 sm:$0xff]   ;;  %v7312_v55 = vld [vmem:[#allocation5 + $0x814] ss:$24 sps:$4 sm:$0xff]  }
 0x1d1   : > { %3739 = vmatpush1.bf16.msra.mxu0 %v7280_v39  ;;  %v7298_v39 = vld [vmem:[#allocation5 + $0x7b0] ss:$24 sps:$4 sm:$0xff]   ;;  %v7351_v45 = vld [vmem:[#allocation5 + $0x7ec] ss:$24 sps:$4 sm:$0xff]  }
 0x1d2   : > { %3740 = vmatprep.subr.bf16.mxu0 %v7288_v27  ;;  %3862 = vmatpush1.bf16.msra.mxu1 %v7325_v25  ;;  %v7343_v27 = vld [vmem:[#allocation5 + $0x7b8] ss:$24 sps:$4 sm:$0xff]  }
 0x1d3   : > { %v931_v37 = vpop.f32.mrb[16].mxu0  ;;  %3863 = vmatprep.subr.bf16.mxu1 %v7333_v63 }
 0x1d4   : > { %v4125_v56 = vrot.slane %v931_v37, 6  ;;  %v4215_v8 = vrot.slane %v931_v37, 7  ;;  %v1008_v11 = vpop.f32.mrb[16].mxu1  ;;  %v933_v13 = vpop.f32.mrb[17].mxu0 }
 0x1d5   : > { %v4071_v17 = vrot.slane %v1008_v11, 5  ;;  %v4161_v18 = vrot.slane %v1008_v11, 6  ;;  %v4139_v54 = vrot.slane %v933_v13, 6  ;;  %v4229_v38 = vrot.slane %v933_v13, 7  ;;  %v1010_v16 = vpop.f32.mrb[17].mxu1  ;;  %3741 = vmatpush1.bf16.msra.mxu0 %v7286_v62  ;;  %v935_v22 = vpop.f32.mrb[18].mxu0 }
 0x1d6   : > { %v4126_v26 = vsel %vm2105_vm3, %v4125_v56, %v8658_v31  ;;  %v4216_v28 = vsel %vm2105_vm3, %v4215_v8, %v8649_v15  ;;  %v4085_v29 = vrot.slane %v1010_v16, 5  ;;  %v4175_v32 = vrot.slane %v1010_v16, 6  ;;  %v936_v33 = vpop.f32.mrb[19].mxu0  ;;  %3742 = vmatprep.subr.bf16.mxu0 %v7294_v3  ;;  %v1012_v34 = vpop.f32.mrb[18].mxu1  ;;  %3864 = vmatpush1.bf16.msra.mxu1 %v7331_v5  ;;  %v7349_v3 = vld [vmem:[#allocation5 + $0x7e8] ss:$24 sps:$4 sm:$0xff]  }
 0x1d7   : > { %v8690_v4 = vsel %vm2108_vm4, %v4071_v17, %v4070_v50  ;;  %v8693_v10 = vsel %vm2108_vm4, %v4161_v18, %v4160_v12  ;;  %v4140_v36 = vsel %vm2105_vm3, %v4139_v54, %v8663_v19  ;;  %v4230_v31 = vsel %vm2105_vm3, %v4229_v38, %v8655_v24  ;;  %v1013_v15 = vpop.f32.mrb[19].mxu1  ;;  %3865 = vmatprep.subr.bf16.mxu1 %v7339_v6  ;;  %v7357_v56 = vld [vmem:[#allocation5 + $0x81c] ss:$24 sps:$4 sm:$0xff]   ;;  %v7363_v17 = vld [vmem:[#allocation5 + $0x84c] ss:$24 sps:$4 sm:$0xff]  }
 0x1d8   : > { %v8700_v41 = vsel %vm2108_vm4, %v4085_v29, %v4084_v40  ;;  %v8703_v43 = vsel %vm2108_vm4, %v4175_v32, %v4174_v59  ;;  %v7318_v13 = vld [vmem:[#allocation5 + $0x844] ss:$24 sps:$4 sm:$0xff]   ;;  %v7316_v18 = vld [vmem:[#allocation5 + $0x840] ss:$24 sps:$4 sm:$0xff]   ;;  %v7324_v22 = vld [vmem:[#allocation5 + $0x874] ss:$24 sps:$4 sm:$0xff]  }
 0x1d9   : > { %3743 = vmatpush1.bf16.msra.mxu0 %v7292_v7  ;;  %v7310_v7 = vld [vmem:[#allocation5 + $0x810] ss:$24 sps:$4 sm:$0xff]  }
 0x1da   : > { %3744 = vmatprep.subr.bf16.mxu0 %v7300_v14  ;;  %3866 = vmatpush1.bf16.msra.mxu1 %v7337_v35  ;;  %v7355_v14 = vld [vmem:[#allocation5 + $0x818] ss:$24 sps:$4 sm:$0xff]  }
 0x1db   : > { %v1049_v19 = vpop.f32.mrb[20].mxu0  ;;  %3867 = vmatprep.subr.bf16.mxu1 %v7345_v0 }
 0x1dc   : > { %v4099_v24 = vrot.slane %v1049_v19, 5  ;;  %v4189_v49 = vrot.slane %v1049_v19, 6  ;;  %v1090_v53 = vpop.f32.mrb[20].mxu1  ;;  %v1051_v44 = vpop.f32.mrb[21].mxu0 }
 0x1dd   : > { %v4127_v50 = vrot.slane %v1090_v53, 5  ;;  %v4217_v12 = vrot.slane %v1090_v53, 6  ;;  %v4113_v57 = vrot.slane %v1051_v44, 5  ;;  %v4203_v58 = vrot.slane %v1051_v44, 6  ;;  %v1092_v23 = vpop.f32.mrb[21].mxu1  ;;  %3745 = vmatpush1.bf16.msra.mxu0 %v7298_v39  ;;  %v1053_v60 = vpop.f32.mrb[22].mxu0 }
 0x1de   : > { %v4100_v25 = vsel %vm2108_vm4, %v4099_v24, %v8670_v61  ;;  %v4190_v40 = vsel %vm2108_vm4, %v4189_v49, %v8673_v48  ;;  %v4141_v59 = vrot.slane %v1092_v23, 5  ;;  %v4231_v47 = vrot.slane %v1092_v23, 6  ;;  %v1054_v62 = vpop.f32.mrb[23].mxu0  ;;  %3746 = vmatprep.subr.bf16.mxu0 %v7306_v51  ;;  %v1094_v63 = vpop.f32.mrb[22].mxu1  ;;  %3868 = vmatpush1.bf16.msra.mxu1 %v7343_v27  ;;  %v7361_v51 = vld [vmem:[#allocation5 + $0x848] ss:$24 sps:$4 sm:$0xff]  }
 0x1df   : > { %v8710_v5 = vsel %vm2108_vm4, %v4127_v50, %v4126_v26  ;;  %v8713_v6 = vsel %vm2108_vm4, %v4217_v12, %v4216_v28  ;;  %v4114_v37 = vsel %vm2108_vm4, %v4113_v57, %v8680_v2  ;;  %v4204_v61 = vsel %vm2108_vm4, %v4203_v58, %v8683_v1  ;;  %v1095_v48 = vpop.f32.mrb[23].mxu1  ;;  %3869 = vmatprep.subr.bf16.mxu1 %v7351_v45  ;;  %v7369_v24 = vld [vmem:[#allocation5 + $0x87c] ss:$24 sps:$4 sm:$0xff]   ;;  %v7375_v50 = vld [vmem:[#allocation5 + $0x8ac] ss:$24 sps:$4 sm:$0xff]  }
 0x1e0   : > { %v8720_v8 = vsel %vm2108_vm4, %v4141_v59, %v4140_v36  ;;  %v8723_v11 = vsel %vm2108_vm4, %v4231_v47, %v4230_v31  ;;  %v7330_v44 = vld [vmem:[#allocation5 + $0x8a4] ss:$24 sps:$4 sm:$0xff]   ;;  %v7328_v12 = vld [vmem:[#allocation5 + $0x8a0] ss:$24 sps:$4 sm:$0xff]   ;;  %v7336_v60 = vld [vmem:[#allocation5 + $0x8d4] ss:$24 sps:$4 sm:$0xff]  }
 0x1e1   : > { %3747 = vmatpush1.bf16.msra.mxu0 %v7304_v46  ;;  %v7322_v46 = vld [vmem:[#allocation5 + $0x870] ss:$24 sps:$4 sm:$0xff]  }
 0x1e2   : > { %3748 = vmatprep.subr.bf16.mxu0 %v7312_v55  ;;  %3870 = vmatpush1.bf16.msra.mxu1 %v7349_v3  ;;  %v7367_v55 = vld [vmem:[#allocation5 + $0x878] ss:$24 sps:$4 sm:$0xff]  }
 0x1e3   : > { %v1167_v2 = vpop.f32.mrb[24].mxu0  ;;  %3871 = vmatprep.subr.bf16.mxu1 %v7357_v56 }
 0x1e4   : > { %v4073_v1 = vrot.slane %v1167_v2, 4  ;;  %v4163_v54 = vrot.slane %v1167_v2, 5  ;;  %v1208_v38 = vpop.f32.mrb[24].mxu1  ;;  %v1169_v16 = vpop.f32.mrb[25].mxu0 }
 0x1e5   : > { %v4101_v26 = vrot.slane %v1208_v38, 4  ;;  %v4191_v28 = vrot.slane %v1208_v38, 5  ;;  %v4087_v29 = vrot.slane %v1169_v16, 4  ;;  %v4177_v32 = vrot.slane %v1169_v16, 5  ;;  %v1210_v33 = vpop.f32.mrb[25].mxu1  ;;  %3749 = vmatpush1.bf16.msra.mxu0 %v7310_v7  ;;  %v1171_v34 = vpop.f32.mrb[26].mxu0 }
 0x1e6   : > { %v4074_v35 = vsel %vm2111_vm5, %v4073_v1, %v8690_v4  ;;  %v4164_v36 = vsel %vm2111_vm5, %v4163_v54, %v8693_v10  ;;  %v4115_v31 = vrot.slane %v1210_v33, 4  ;;  %v4205_v15 = vrot.slane %v1210_v33, 5  ;;  %v1172_v39 = vpop.f32.mrb[27].mxu0  ;;  %3750 = vmatprep.subr.bf16.mxu0 %v7318_v13  ;;  %v1212_v0 = vpop.f32.mrb[26].mxu1  ;;  %3872 = vmatpush1.bf16.msra.mxu1 %v7355_v14  ;;  %v7373_v13 = vld [vmem:[#allocation5 + $0x8a8] ss:$24 sps:$4 sm:$0xff]  }
 0x1e7   : > { %v8730_v27 = vsel %vm2111_vm5, %v4101_v26, %v4100_v25  ;;  %v8733_v45 = vsel %vm2111_vm5, %v4191_v28, %v4190_v40  ;;  %v4088_v19 = vsel %vm2111_vm5, %v4087_v29, %v8700_v41  ;;  %v4178_v4 = vsel %vm2111_vm5, %v4177_v32, %v8703_v43  ;;  %v1213_v10 = vpop.f32.mrb[27].mxu1  ;;  %3873 = vmatprep.subr.bf16.mxu1 %v7363_v17  ;;  %v7381_v1 = vld [vmem:[#allocation5 + $0x8dc] ss:$24 sps:$4 sm:$0xff]  }
 0x1e8   : > { %v8740_v49 = vsel %vm2111_vm5, %v4115_v31, %v4114_v37  ;;  %v8743_v53 = vsel %vm2111_vm5, %v4205_v15, %v4204_v61  ;;  %v7342_v16 = vld [vmem:[#allocation5 + $0x14] ss:$24 sps:$4 sm:$0xff]   ;;  %v8767_v33 = vpack.c.b16 %v8606_v9, %v8606_v9  ;;  %v7348_v9 = vld [vmem:[#allocation5 + $0x44] ss:$24 sps:$4 sm:$0xff]  }
 0x1e9   : > { %3751 = vmatpush1.bf16.msra.mxu0 %v7316_v18  ;;  %v7334_v18 = vld [vmem:[#allocation5 + $0x8d0] ss:$24 sps:$4 sm:$0xff]  }
 0x1ea   : > { %3752 = vmatprep.subr.bf16.mxu0 %v7324_v22  ;;  %3874 = vmatpush1.bf16.msra.mxu1 %v7361_v51  ;;  %v7379_v22 = vld [vmem:[#allocation5 + $0x8d8] ss:$24 sps:$4 sm:$0xff]  }
 0x1eb   : > { %v1249_v41 = vpop.f32.mrb[28].mxu0  ;;  %3875 = vmatprep.subr.bf16.mxu1 %v7369_v24 }
 0x1ec   : > { %v4129_v43 = vrot.slane %v1249_v41, 4  ;;  %v4219_v57 = vrot.slane %v1249_v41, 5  ;;  %v1326_v58 = vpop.f32.mrb[28].mxu1  ;;  %v1251_v23 = vpop.f32.mrb[29].mxu0 }
 0x1ed   : > { %v4075_v25 = vrot.slane %v1326_v58, 3  ;;  %v4165_v40 = vrot.slane %v1326_v58, 4  ;;  %v4143_v59 = vrot.slane %v1251_v23, 4  ;;  %v4233_v47 = vrot.slane %v1251_v23, 5  ;;  %v1328_v62 = vpop.f32.mrb[29].mxu1  ;;  %3753 = vmatpush1.bf16.msra.mxu0 %v7322_v46  ;;  %v1253_v63 = vpop.f32.mrb[30].mxu0 }
 0x1ee   : > { %v4130_v3 = vsel %vm2111_vm5, %v4129_v43, %v8710_v5  ;;  %v4220_v37 = vsel %vm2111_vm5, %v4219_v57, %v8713_v6  ;;  %v4089_v61 = vrot.slane %v1328_v62, 3  ;;  %v4179_v48 = vrot.slane %v1328_v62, 4  ;;  %v1254_v7 = vpop.f32.mrb[31].mxu0  ;;  %3754 = vmatprep.subr.bf16.mxu0 %v7330_v44  ;;  %v1330_v56 = vpop.f32.mrb[30].mxu1  ;;  %3876 = vmatpush1.bf16.msra.mxu1 %v7367_v55  ;;  %v7354_v43 = vld [vmem:[#allocation5 + $0x74] ss:$24 sps:$4 sm:$0xff]  }
 0x1ef   : > { %v8750_v14 = vsel %vm2114_vm6, %v4075_v25, %v4074_v35  ;;  %v8753_v17 = vsel %vm2114_vm6, %v4165_v40, %v4164_v36  ;;  %v4144_v2 = vsel %vm2111_vm5, %v4143_v59, %v8720_v8  ;;  %v4234_v5 = vsel %vm2111_vm5, %v4233_v47, %v8723_v11  ;;  %v1331_v6 = vpop.f32.mrb[31].mxu1  ;;  %3877 = vmatprep.subr.bf16.mxu1 %v7375_v50  ;;  %v7340_v8 = vld [vmem:[#allocation5 + $0x10] ss:$24 sps:$4 sm:$0xff]   ;;  %v7360_v56 = vld [vmem:[#allocation5 + $0xa4] ss:$24 sps:$4 sm:$0xff]  }
 0x1f0   : > { %v8760_v54 = vsel %vm2114_vm6, %v4089_v61, %v4088_v19  ;;  %v8763_v38 = vsel %vm2114_vm6, %v4179_v48, %v4178_v4  ;;  %v7352_v57 = vld [vmem:[#allocation5 + $0x70] ss:$24 sps:$4 sm:$0xff]  }
 0x1f1   : > { %3755 = vmatpush1.bf16.msra.mxu0 %v7328_v12  ;;  %v7346_v12 = vld [vmem:[#allocation5 + $0x40] ss:$24 sps:$4 sm:$0xff]  }
 0x1f2   : > { %3756 = vmatprep.subr.bf16.mxu0 %v7336_v60  ;;  %3878 = vmatpush1.bf16.msra.mxu1 %v7373_v13 }
 0x1f3   : > { %v1367_v26 = vpop.f32.mrb[32].mxu0  ;;  %3879 = vmatprep.subr.bf16.mxu1 %v7381_v1  ;;  %v7358_v1 = vld [vmem:[#allocation5 + $0xa0] ss:$24 sps:$4 sm:$0xff]  }
 0x1f4   : > { %v4103_v28 = vrot.slane %v1367_v26, 3  ;;  %v4193_v11 = vrot.slane %v1367_v26, 4  ;;  %v1408_v29 = vpop.f32.mrb[32].mxu1  ;;  %v1369_v32 = vpop.f32.mrb[33].mxu0  ;;  %v7364_v26 = vld [vmem:[#allocation5 + $0xd0] ss:$24 sps:$4 sm:$0xff]  }
 0x1f5   : > { %v4131_v34 = vrot.slane %v1408_v29, 3  ;;  %v4221_v35 = vrot.slane %v1408_v29, 4  ;;  %v4117_v36 = vrot.slane %v1369_v32, 3  ;;  %v4207_v31 = vrot.slane %v1369_v32, 4  ;;  %v1410_v15 = vpop.f32.mrb[33].mxu1  ;;  %3757 = vmatpush1.bf16.msra.mxu0 %v7334_v18  ;;  %v1371_v39 = vpop.f32.mrb[34].mxu0 }
 0x1f6   : > { %v4104_v0 = vsel %vm2114_vm6, %v4103_v28, %v8730_v27  ;;  %v4194_v51 = vsel %vm2114_vm6, %v4193_v11, %v8733_v45  ;;  %v4145_v19 = vrot.slane %v1410_v15, 3  ;;  %v4235_v4 = vrot.slane %v1410_v15, 4  ;;  %v1372_v10 = vpop.f32.mrb[35].mxu0  ;;  %3890 = vmatprep.subr.bf16.mxu0 %v7342_v16  ;;  %v1412_v46 = vpop.f32.mrb[34].mxu1  ;;  %3880 = vmatpush1.bf16.msra.mxu1 %v7379_v22  ;;  %v7366_v16 = vld [vmem:[#allocation5 + $0xd4] ss:$24 sps:$4 sm:$0xff]  }
 0x1f7   : > { %v4132_v24 = vsel %vm2114_vm6, %v4131_v34, %v4130_v3  ;;  %v4222_v44 = vsel %vm2114_vm6, %v4221_v35, %v4220_v37  ;;  %v4118_v55 = vsel %vm2114_vm6, %v4117_v36, %v8740_v49  ;;  %v4208_v27 = vsel %vm2114_vm6, %v4207_v31, %v8743_v53  ;;  %v1413_v50 = vpop.f32.mrb[35].mxu1 }
 0x1f8   : > { %v8780_v45 = vsel %vm2114_vm6, %v4145_v19, %v4144_v2  ;;  %v8783_v41 = vsel %vm2114_vm6, %v4235_v4, %v4234_v5  ;;  %3759 = vmatmul.mubr.bf16.vlgmr.msra.gmra.mrb[48].mxu0 %v8767_v33  ;;  %v7372_v4 = vld [vmem:[#allocation5 + $0x104] ss:$24 sps:$4 sm:$0xff]   ;;  %v7370_v50 = vld [vmem:[#allocation5 + $0x100] ss:$24 sps:$4 sm:$0xff]  }
 0x1f9   : > { %3891 = vmatpush1.bf16.msra.mxu0 %v7340_v8  ;;  %3882 = vmatmul.mubr.bf16.vlgmr.msra.gmra.mrb[48].mxu1 %v8767_v33 }
 0x1fa   : > { %3892 = vmatprep.subr.bf16.mxu0 %v7348_v9  ;;  %3922 = vmatprep.mubr.bf16.mxu0 %v8578_v42 }
 0x1fb   : > { %v1485_v49 = vpop.f32.mrb[36].mxu0 }
 0x1fc   : > { %v4077_v53 = vrot.slane %v1485_v49, 2  ;;  %v4167_v58 = vrot.slane %v1485_v49, 3  ;;  %v1526_v23 = vpop.f32.mrb[36].mxu1  ;;  %v1487_v60 = vpop.f32.mrb[37].mxu0  ;;  %v7376_v49 = vld [vmem:[#allocation5 + $0x130] ss:$24 sps:$4 sm:$0xff]  }
 0x1fd   : > { %v4105_v25 = vrot.slane %v1526_v23, 2  ;;  %v4195_v40 = vrot.slane %v1526_v23, 3  ;;  %v4091_v59 = vrot.slane %v1487_v60, 2  ;;  %v4181_v47 = vrot.slane %v1487_v60, 3  ;;  %v1528_v62 = vpop.f32.mrb[37].mxu1  ;;  %3893 = vmatpush1.bf16.msra.mxu0 %v7346_v12  ;;  %v1489_v63 = vpop.f32.mrb[38].mxu0 }
 0x1fe   : > { %v4078_v3 = vsel %vm2117_vm7, %v4077_v53, %v8750_v14  ;;  %v4168_v37 = vsel %vm2117_vm7, %v4167_v58, %v8753_v17  ;;  %v4119_v42 = vrot.slane %v1528_v62, 2  ;;  %v4209_v61 = vrot.slane %v1528_v62, 3  ;;  %v1490_v48 = vpop.f32.mrb[39].mxu0  ;;  %3894 = vmatprep.subr.bf16.mxu0 %v7354_v43  ;;  %v1530_v7 = vpop.f32.mrb[38].mxu1  ;;  %v7378_v12 = vld [vmem:[#allocation5 + $0x134] ss:$24 sps:$4 sm:$0xff]  }
 0x1ff   : > { %v4106_v13 = vsel %vm2117_vm7, %v4105_v25, %v4104_v0  ;;  %v4196_v2 = vsel %vm2117_vm7, %v4195_v40, %v4194_v51  ;;  %v4092_v5 = vsel %vm2117_vm7, %v4091_v59, %v8760_v54  ;;  %v4182_v6 = vsel %vm2117_vm7, %v4181_v47, %v8763_v38  ;;  %v1531_v14 = vpop.f32.mrb[39].mxu1 }
 0x200   : > { %v8799_v18 = vsel %vm2117_vm7, %v4119_v42, %v4118_v55  ;;  %v8802_v17 = vsel %vm2117_vm7, %v4209_v61, %v4208_v27  ;;  %v7384_v42 = vld [vmem:[#allocation5 + $0x164] ss:$24 sps:$4 sm:$0xff]  }
 0x201   : > { %3895 = vmatpush1.bf16.msra.mxu0 %v7352_v57 }
 0x202   : > { %3896 = vmatprep.subr.bf16.mxu0 %v7360_v56 }
 0x203   : > { %v1567_v22 = vpop.f32.mrb[40].mxu0 }
 0x204   : > { %v4133_v8 = vrot.slane %v1567_v22, 2  ;;  %v4223_v28 = vrot.slane %v1567_v22, 3  ;;  %v1644_v11 = vpop.f32.mrb[40].mxu1  ;;  %v1569_v54 = vpop.f32.mrb[41].mxu0  ;;  %v7390_v22 = vld [vmem:[#allocation5 + $0x1c4] ss:$24 sps:$4 sm:$0xff]  }
 0x205   : > { %v4079_v29 = vrot.slane %v1644_v11, 1  ;;  %v4169_v32 = vrot.slane %v1644_v11, 2  ;;  %v4147_v38 = vrot.slane %v1569_v54, 2  ;;  %v4237_v34 = vrot.slane %v1569_v54, 3  ;;  %v1646_v35 = vpop.f32.mrb[41].mxu1  ;;  %3897 = vmatpush1.bf16.msra.mxu0 %v7358_v1  ;;  %v1571_v36 = vpop.f32.mrb[42].mxu0 }
 0x206   : > { %v4134_v31 = vsel %vm2117_vm7, %v4133_v8, %v4132_v24  ;;  %v4224_v15 = vsel %vm2117_vm7, %v4223_v28, %v4222_v44  ;;  %v4093_v39 = vrot.slane %v1646_v35, 1  ;;  %v4183_v0 = vrot.slane %v1646_v35, 2  ;;  %v1572_v51 = vpop.f32.mrb[43].mxu0  ;;  %3898 = vmatprep.subr.bf16.mxu0 %v7366_v16  ;;  %v1648_v19 = vpop.f32.mrb[42].mxu1  ;;  %v7385_v16 = vld [vmem:[#allocation5 + $0x190] ss:$24 sps:$4 sm:$0xff]  }
 0x207   : > { %v8807_v10 = vsel %vm2120_vm8, %v4079_v29, %v4078_v3  ;;  %v8810_v46 = vsel %vm2120_vm8, %v4169_v32, %v4168_v37  ;;  %v4148_v9 = vsel %vm2117_vm7, %v4147_v38, %v8780_v45  ;;  %v4238_v24 = vsel %vm2117_vm7, %v4237_v34, %v8783_v41  ;;  %v1649_v55 = vpop.f32.mrb[43].mxu1  ;;  %v7393_v8 = vld [vmem:[#allocation5 + $0x1f4] ss:$24 sps:$4 sm:$0xff]   ;;  %v7396_v28 = vld [vmem:[#allocation5 + $0x224] ss:$24 sps:$4 sm:$0xff]  }
 0x208   : > { %v8817_v44 = vsel %vm2120_vm8, %v4183_v0, %v4182_v6  ;;  %v8820_v27 = vsel %vm2120_vm8, %v4093_v39, %v4092_v5  ;;  %v7387_v6 = vld [vmem:[#allocation5 + $0x194] ss:$24 sps:$4 sm:$0xff]   ;;  %v7394_v11 = vld [vmem:[#allocation5 + $0x220] ss:$24 sps:$4 sm:$0xff]   ;;  %v7402_v29 = vld [vmem:[#allocation5 + $0x284] ss:$24 sps:$4 sm:$0xff]  }
 0x209   : > { %3899 = vmatpush1.bf16.msra.mxu0 %v7364_v26  ;;  %v7388_v26 = vld [vmem:[#allocation5 + $0x1c0] ss:$24 sps:$4 sm:$0xff]   ;;  %v7399_v54 = vld [vmem:[#allocation5 + $0x254] ss:$24 sps:$4 sm:$0xff]   ;;  %v7403_v34 = vld [vmem:[#allocation5 + $0x2b0] ss:$24 sps:$4 sm:$0xff]  }
 0x20a   : > { %3900 = vmatprep.subr.bf16.mxu0 %v7372_v4  ;;  %v7400_v32 = vld [vmem:[#allocation5 + $0x280] ss:$24 sps:$4 sm:$0xff]   ;;  %v7405_v38 = vld [vmem:[#allocation5 + $0x2b4] ss:$24 sps:$4 sm:$0xff]   ;;  %v7408_v35 = vld [vmem:[#allocation5 + $0x2e4] ss:$24 sps:$4 sm:$0xff]  }
 0x20b   : > { %v1685_v43 = vpop.f32.mrb[44].mxu0  ;;  %v7406_v36 = vld [vmem:[#allocation5 + $0x2e0] ss:$24 sps:$4 sm:$0xff]   ;;  %v7414_v39 = vld [vmem:[#allocation5 + $0x344] ss:$24 sps:$4 sm:$0xff]  }
 0x20c   : > { %v4107_v57 = vrot.slane %v1685_v43, 1  ;;  %v4197_v53 = vrot.slane %v1685_v43, 2  ;;  %v1726_v58 = vpop.f32.mrb[44].mxu1  ;;  %v1687_v45 = vpop.f32.mrb[45].mxu0  ;;  %v7412_v0 = vld [vmem:[#allocation5 + $0x340] ss:$24 sps:$4 sm:$0xff]  }
 0x20d   : > { %v4135_v23 = vrot.slane %v1726_v58, 1  ;;  %v4225_v60 = vrot.slane %v1726_v58, 2  ;;  %v4121_v41 = vrot.slane %v1687_v45, 1  ;;  %v4211_v25 = vrot.slane %v1687_v45, 2  ;;  %v1728_v40 = vpop.f32.mrb[45].mxu1  ;;  %3901 = vmatpush1.bf16.msra.mxu0 %v7370_v50  ;;  %v1689_v59 = vpop.f32.mrb[46].mxu0 }
 0x20e   : > { %v8823_v47 = vsel %vm2120_vm8, %v4107_v57, %v4106_v13  ;;  %v8826_v62 = vsel %vm2120_vm8, %v4197_v53, %v4196_v2  ;;  %v4149_v63 = vrot.slane %v1728_v40, 1  ;;  %v4239_v3 = vrot.slane %v1728_v40, 2  ;;  %v1690_v37 = vpop.f32.mrb[47].mxu0  ;;  %3902 = vmatprep.subr.bf16.mxu0 %v7378_v12  ;;  %v1730_v61 = vpop.f32.mrb[46].mxu1  ;;  %v7382_v2 = vld [vmem:[#allocation5 + $0x160] ss:$24 sps:$4 sm:$0xff]  }
 0x20f   : > { %v8829_v48 = vsel %vm2120_vm8, %v4135_v23, %v4134_v31  ;;  %v8832_v7 = vsel %vm2120_vm8, %v4225_v60, %v4224_v15  ;;  %v1731_v56 = vpop.f32.mrb[47].mxu1  ;;  %v8839_v13 = vsel %vm2120_vm8, %v4121_v41, %v8799_v18  ;;  %v8846_v1 = vsel %vm2120_vm8, %v4211_v25, %v8802_v17  ;;  %v7391_v18 = vld [vmem:[#allocation5 + $0x1f0] ss:$24 sps:$4 sm:$0xff]   ;;  %v7411_v31 = vld [vmem:[#allocation5 + $0x314] ss:$24 sps:$4 sm:$0xff]   ;;  %v7519_v57 = vld [vmem:[#allocation8 + $0x58] sm:$0xff]  }
 0x210   : > { %v8835_v5 = vsel %vm2120_vm8, %v4239_v3, %v4238_v24  ;;  %v8842_v14 = vsel %vm2120_vm8, %v4149_v63, %v4148_v9  ;;  %v7397_v17 = vld [vmem:[#allocation5 + $0x250] ss:$24 sps:$4 sm:$0xff]   ;;  %v7417_v19 = vld [vmem:[#allocation5 + $0x374] ss:$24 sps:$4 sm:$0xff]   ;;  %v7420_v55 = vld [vmem:[#allocation5 + $0x3a4] ss:$24 sps:$4 sm:$0xff]  }
 0x211   : > { %3903 = vmatpush1.bf16.msra.mxu0 %v7376_v49  ;;  %v7409_v15 = vld [vmem:[#allocation5 + $0x310] ss:$24 sps:$4 sm:$0xff]   ;;  %v7515_v12 = vld [vmem:[#allocation8 + $0x50] sm:$0xff]   ;;  %v7521_v58 = vld [vmem:[#allocation8 + $0x18] sm:$0xff]  }
 0x212   : > { %3904 = vmatprep.subr.bf16.mxu0 %v7384_v42  ;;  %v7507_v51 = vld [vmem:[#allocation8 + $0x40] sm:$0xff]   ;;  %v7511_v24 = vld [vmem:[#allocation8 + $0x48] sm:$0xff]   ;;  %v7424_v45 = vld [vmem:[#allocation5 + $0x400] ss:$24 sps:$4 sm:$0xff]  }
 0x213   : > { %v7509_v4 = vld [vmem:[#allocation8] sm:$0xff]   ;;  %6601 = vmatprep.subr.bf16.mxu1 %v7507_v51  ;;  %v7513_v50 = vld [vmem:[#allocation8 + $0x8] sm:$0xff]   ;;  %v7430_v3 = vld [vmem:[#allocation5 + $0x460] ss:$24 sps:$4 sm:$0xff]  }
 0x214   : > { %6602 = vmatpush3.bf16.msra.mxu1 %v7509_v4  ;;  %v7415_v9 = vld [vmem:[#allocation5 + $0x370] ss:$24 sps:$4 sm:$0xff]   ;;  %v7423_v43 = vld [vmem:[#allocation5 + $0x3d4] ss:$24 sps:$4 sm:$0xff]   ;;  %v7426_v53 = vld [vmem:[#allocation5 + $0x404] ss:$24 sps:$4 sm:$0xff]  }
 0x215   : > { %3905 = vmatpush1.bf16.msra.mxu0 %v7382_v2  ;;  %6603 = vmatprep.subr.bf16.mxu1 %v7511_v24  ;;  %v7421_v49 = vld [vmem:[#allocation5 + $0x3d0] ss:$24 sps:$4 sm:$0xff]   ;;  %v7429_v23 = vld [vmem:[#allocation5 + $0x434] ss:$24 sps:$4 sm:$0xff]   ;;  %v7432_v40 = vld [vmem:[#allocation5 + $0x464] ss:$24 sps:$4 sm:$0xff]  }
 0x216   : > { %3906 = vmatprep.subr.bf16.mxu0 %v7387_v6  ;;  %v7523_v60 = vld [vmem:[#allocation8 + $0x60] sm:$0xff]   ;;  %v7527_v59 = vld [vmem:[#allocation8 + $0x68] sm:$0xff]   ;;  %v7531_v42 = vld [vmem:[#allocation8 + $0x70] sm:$0xff]  }
 0x217   : > { %v7525_v41 = vld [vmem:[#allocation8 + $0x20] sm:$0xff]   ;;  %v7529_v63 = vld [vmem:[#allocation8 + $0x28] sm:$0xff]   ;;  %v7533_v61 = vld [vmem:[#allocation8 + $0x30] sm:$0xff]  }
 0x218   : > { %6604 = vmatpush3.bf16.msra.mxu1 %v7513_v50  ;;  %v7427_v25 = vld [vmem:[#allocation5 + $0x430] ss:$24 sps:$4 sm:$0xff]   ;;  %v7435_v37 = vld [vmem:[#allocation5 + $0x494] ss:$24 sps:$4 sm:$0xff]   ;;  %v7438_v2 = vld [vmem:[#allocation5 + $0x4c4] ss:$24 sps:$4 sm:$0xff]  }
 0x219   : > { %3907 = vmatpush1.bf16.msra.mxu0 %v7385_v16  ;;  %6605 = vmatprep.subr.bf16.mxu1 %v7515_v12  ;;  %v7433_v56 = vld [vmem:[#allocation5 + $0x490] ss:$24 sps:$4 sm:$0xff]   ;;  %v7535_v6 = vld [vmem:[#allocation8 + $0x78] sm:$0xff]   ;;  %v7465_v51 = vld [vmem:[#allocation5 + $0x674] ss:$24 sps:$4 sm:$0xff]  }
 0x21a   : > { %3908 = vmatprep.subr.bf16.mxu0 %v7390_v22  ;;  %v7537_v16 = vld [vmem:[#allocation8 + $0x38] sm:$0xff]   ;;  %v7471_v24 = vld [vmem:[#allocation5 + $0x6d4] ss:$24 sps:$4 sm:$0xff]  }
 0x21b   : > { %v7436_v22 = vld [vmem:[#allocation5 + $0x4c0] ss:$24 sps:$4 sm:$0xff]   ;;  %v7468_v4 = vld [vmem:[#allocation5 + $0x6a4] ss:$24 sps:$4 sm:$0xff]  }
 0x21c   : > { %v7474_v50 = vld [vmem:[#allocation5 + $0x704] ss:$24 sps:$4 sm:$0xff]  }
 0x21d   : > { %3909 = vmatpush1.bf16.msra.mxu0 %v7388_v26  ;;  %v7441_v26 = vld [vmem:[#allocation5 + $0x4f4] ss:$24 sps:$4 sm:$0xff]   ;;  %v7480_v12 = vld [vmem:[#allocation5 + $0x764] ss:$24 sps:$4 sm:$0xff]  }
 0x21e   : > { %3910 = vmatprep.subr.bf16.mxu0 %v7393_v8  ;;  %v7539_v8 = vld [vmem:[#allocation8 + $0xc0] sm:$0xff]  }
 0x221   : > { %3911 = vmatpush1.bf16.msra.mxu0 %v7391_v18  ;;  %v7439_v18 = vld [vmem:[#allocation5 + $0x4f0] ss:$24 sps:$4 sm:$0xff]  }
 0x222   : > { %3912 = vmatprep.subr.bf16.mxu0 %v7396_v28  ;;  %v7444_v28 = vld [vmem:[#allocation5 + $0x524] ss:$24 sps:$4 sm:$0xff]  }
 0x225   : > { %3913 = vmatpush1.bf16.msra.mxu0 %v7394_v11  ;;  %v7442_v11 = vld [vmem:[#allocation5 + $0x520] ss:$24 sps:$4 sm:$0xff]  }
 0x226   : > { %3914 = vmatprep.subr.bf16.mxu0 %v7399_v54  ;;  %v7447_v54 = vld [vmem:[#allocation5 + $0x554] ss:$24 sps:$4 sm:$0xff]  }
 0x229   : > { %3915 = vmatpush1.bf16.msra.mxu0 %v7397_v17  ;;  %v7445_v17 = vld [vmem:[#allocation5 + $0x550] ss:$24 sps:$4 sm:$0xff]  }
 0x22a   : > { %3916 = vmatprep.subr.bf16.mxu0 %v7402_v29  ;;  %v7450_v29 = vld [vmem:[#allocation5 + $0x584] ss:$24 sps:$4 sm:$0xff]  }
 0x22d   : > { %3917 = vmatpush1.bf16.msra.mxu0 %v7400_v32  ;;  %v7448_v32 = vld [vmem:[#allocation5 + $0x580] ss:$24 sps:$4 sm:$0xff]  }
 0x22e   : > { %3918 = vmatprep.subr.bf16.mxu0 %v7405_v38  ;;  %v7453_v38 = vld [vmem:[#allocation5 + $0x5b4] ss:$24 sps:$4 sm:$0xff]  }
 0x231   : > { %3919 = vmatpush1.bf16.msra.mxu0 %v7403_v34  ;;  %v7451_v34 = vld [vmem:[#allocation5 + $0x5b0] ss:$24 sps:$4 sm:$0xff]  }
 0x232   : > { %3920 = vmatprep.subr.bf16.mxu0 %v7408_v35  ;;  %v7456_v35 = vld [vmem:[#allocation5 + $0x5e4] ss:$24 sps:$4 sm:$0xff]  }
 0x235   : > { %3921 = vmatpush1.bf16.msra.mxu0 %v7406_v36  ;;  %v7454_v36 = vld [vmem:[#allocation5 + $0x5e0] ss:$24 sps:$4 sm:$0xff]  }
 0x236   : > { %3931 = vmatprep.subr.bf16.mxu0 %v7411_v31  ;;  %v7459_v31 = vld [vmem:[#allocation5 + $0x614] ss:$24 sps:$4 sm:$0xff]  }
 0x238   : > { %3923 = vmatmul.mubr.bf16.vlgmr.msra.gmra.mrb[52].mxu0 %v8602_v20  ;;  %v7418_v20 = vld [vmem:[#allocation5 + $0x3a0] ss:$24 sps:$4 sm:$0xff]  }
 0x239   : > { %3932 = vmatpush1.bf16.msra.mxu0 %v7409_v15  ;;  %3963 = vmatprep.mubr.bf16.mxu0 %v8610_v52  ;;  %v7517_v52 = vld [vmem:[#allocation8 + $0x10] sm:$0xff]   ;;  %v7457_v15 = vld [vmem:[#allocation5 + $0x610] ss:$24 sps:$4 sm:$0xff]  }
 0x23a   : > { %3933 = vmatprep.subr.bf16.mxu0 %v7414_v39  ;;  %6606 = vmatpush3.bf16.msra.mxu1 %v7517_v52  ;;  %v7462_v39 = vld [vmem:[#allocation5 + $0x644] ss:$24 sps:$4 sm:$0xff]   ;;  %v7483_v52 = vld [vmem:[#allocation5 + $0x794] ss:$24 sps:$4 sm:$0xff]  }
 0x23b   : > { %6607 = vmatprep.subr.bf16.mxu1 %v7519_v57  ;;  %v7486_v57 = vld [vmem:[#allocation5 + $0x7c4] ss:$24 sps:$4 sm:$0xff]  }
 0x23d   : > { %3934 = vmatpush1.bf16.msra.mxu0 %v7412_v0  ;;  %v7460_v0 = vld [vmem:[#allocation5 + $0x640] ss:$24 sps:$4 sm:$0xff]  }
 0x23e   : > { %3935 = vmatprep.subr.bf16.mxu0 %v7417_v19  ;;  %6608 = vmatpush3.bf16.msra.mxu1 %v7521_v58  ;;  %v7463_v19 = vld [vmem:[#allocation5 + $0x670] ss:$24 sps:$4 sm:$0xff]   ;;  %v7489_v58 = vld [vmem:[#allocation5 + $0x7f4] ss:$24 sps:$4 sm:$0xff]  }
 0x23f   : > { %6609 = vmatprep.subr.bf16.mxu1 %v7523_v60  ;;  %v7490_v60 = vld [vmem:[#allocation5 + $0x820] ss:$24 sps:$4 sm:$0xff]  }
 0x241   : > { %3936 = vmatpush1.bf16.msra.mxu0 %v7415_v9  ;;  %v7466_v9 = vld [vmem:[#allocation5 + $0x6a0] ss:$24 sps:$4 sm:$0xff]  }
 0x242   : > { %3937 = vmatprep.subr.bf16.mxu0 %v7420_v55  ;;  %6610 = vmatpush3.bf16.msra.mxu1 %v7525_v41  ;;  %v7469_v55 = vld [vmem:[#allocation5 + $0x6d0] ss:$24 sps:$4 sm:$0xff]   ;;  %v7495_v41 = vld [vmem:[#allocation5 + $0x854] ss:$24 sps:$4 sm:$0xff]  }
 0x243   : > { %6611 = vmatprep.subr.bf16.mxu1 %v7527_v59  ;;  %v7496_v59 = vld [vmem:[#allocation5 + $0x880] ss:$24 sps:$4 sm:$0xff]  }
 0x245   : > { %3938 = vmatpush1.bf16.msra.mxu0 %v7418_v20  ;;  %v7477_v20 = vld [vmem:[#allocation5 + $0x734] ss:$24 sps:$4 sm:$0xff]  }
 0x246   : > { %3939 = vmatprep.subr.bf16.mxu0 %v7423_v43  ;;  %6612 = vmatpush3.bf16.msra.mxu1 %v7529_v63  ;;  %v7478_v43 = vld [vmem:[#allocation5 + $0x760] ss:$24 sps:$4 sm:$0xff]   ;;  %v7501_v63 = vld [vmem:[#allocation5 + $0x8b4] ss:$24 sps:$4 sm:$0xff]  }
 0x247   : > { %6613 = vmatprep.subr.bf16.mxu1 %v7531_v42  ;;  %v7502_v42 = vld [vmem:[#allocation5 + $0x8e0] ss:$24 sps:$4 sm:$0xff]  }
 0x249   : > { %3940 = vmatpush1.bf16.msra.mxu0 %v7421_v49  ;;  %v7481_v49 = vld [vmem:[#allocation5 + $0x790] ss:$24 sps:$4 sm:$0xff]  }
 0x24a   : > { %3941 = vmatprep.subr.bf16.mxu0 %v7426_v53  ;;  %6614 = vmatpush3.bf16.msra.mxu1 %v7533_v61  ;;  %v7484_v53 = vld [vmem:[#allocation5 + $0x7c0] ss:$24 sps:$4 sm:$0xff]   ;;  %v7505_v61 = vld [vmem:[#allocation8 + $0x340] sm:$0xff]  }
 0x24b   : > { %6615 = vmatprep.subr.bf16.mxu1 %v7535_v6  ;;  %v4260_v6 = vpack.c.bf16 %v8817_v44, %v8817_v44 }
 0x24d   : > { %3942 = vmatpush1.bf16.msra.mxu0 %v7424_v45  ;;  %v7487_v45 = vld [vmem:[#allocation5 + $0x7f0] ss:$24 sps:$4 sm:$0xff]  }
 0x24e   : > { %3943 = vmatprep.subr.bf16.mxu0 %v7429_v23  ;;  %6616 = vmatpush3.bf16.msra.mxu1 %v7537_v16  ;;  %v7492_v23 = vld [vmem:[#allocation5 + $0x824] ss:$24 sps:$4 sm:$0xff]   ;;  %v7510_v16 = vld [vmem:[#allocation8 + $0x308] sm:$0xff]  }
 0x24f   : > { %6623 = vmatprep.subr.bf16.mxu1 %v7539_v8  ;;  %v7514_v8 = vld [vmem:[#allocation8 + $0x310] sm:$0xff]  }
 0x251   : > { %3944 = vmatpush1.bf16.msra.mxu0 %v7427_v25  ;;  %v7493_v25 = vld [vmem:[#allocation5 + $0x850] ss:$24 sps:$4 sm:$0xff]  }
 0x252   : > { %3945 = vmatprep.subr.bf16.mxu0 %v7432_v40  ;;  %v7498_v40 = vld [vmem:[#allocation5 + $0x884] ss:$24 sps:$4 sm:$0xff]  }
 0x255   : > { %3946 = vmatpush1.bf16.msra.mxu0 %v7430_v3  ;;  %v7499_v3 = vld [vmem:[#allocation5 + $0x8b0] ss:$24 sps:$4 sm:$0xff]  }
 0x256   : > { %3947 = vmatprep.subr.bf16.mxu0 %v7435_v37  ;;  %v7504_v37 = vld [vmem:[#allocation5 + $0x8e4] ss:$24 sps:$4 sm:$0xff]  }
 0x259   : > { %3948 = vmatpush1.bf16.msra.mxu0 %v7433_v56  ;;  %v7506_v56 = vld [vmem:[#allocation8 + $0x300] sm:$0xff]  }
 0x25a   : > { %3949 = vmatprep.subr.bf16.mxu0 %v7438_v2  ;;  %v7508_v2 = vld [vmem:[#allocation8 + $0x348] sm:$0xff]  }
 0x25d   : > { %3950 = vmatpush1.bf16.msra.mxu0 %v7436_v22  ;;  %v7512_v22 = vld [vmem:[#allocation8 + $0x350] sm:$0xff]  }
 0x25e   : > { %3951 = vmatprep.subr.bf16.mxu0 %v7441_v26  ;;  %v2023_v26 = vlaneseq }
 0x261   : > { %3952 = vmatpush1.bf16.msra.mxu0 %v7439_v18  ;;  %v7516_v18 = vld [vmem:[#allocation8 + $0x358] sm:$0xff]  }
 0x262   : > { %3953 = vmatprep.subr.bf16.mxu0 %v7444_v28  ;;  %v8856_v28 = vshrl.u32 %v2023_v26, 7 }
 0x264   : > { %v2025_v44 = vsub.s32 0, %v8856_v28 }
 0x265   : > { %3954 = vmatpush1.bf16.msra.mxu0 %v7442_v11  ;;  %v7518_v11 = vld [vmem:[#allocation8 + $0x318] sm:$0xff]  }
 0x266   : > { %3955 = vmatprep.subr.bf16.mxu0 %v7447_v54  ;;  %v7520_v54 = vld [vmem:[#allocation8 + $0x360] sm:$0xff]  }
 0x269   : > { %3956 = vmatpush1.bf16.msra.mxu0 %v7445_v17  ;;  %v8859_v17 = vld [vmem:[#allocation7] sm:$0x3f] }
 0x26a   : > { %3957 = vmatprep.subr.bf16.mxu0 %v7450_v29  ;;  %v2029_v29 = vsub.s32 1, %v8856_v28 }
 0x26d   : > { %3958 = vmatpush1.bf16.msra.mxu0 %v7448_v32  ;;  %v7524_v32 = vld [vmem:[#allocation8 + $0x368] sm:$0xff]  }
 0x26e   : > { %3959 = vmatprep.subr.bf16.mxu0 %v7453_v38  ;;  %v2037_v38 = vsub.s32 3, %v8856_v28 }
 0x271   : > { %3960 = vmatpush1.bf16.msra.mxu0 %v7451_v34  ;;  %v2026_v34 = vrot.slane %v8859_v17, %v2025_v44  ;;  %v7555_v44 = vld [vmem:[#allocation8 + $0xe0] sm:$0xff]  }
 0x272   : > { %3961 = vmatprep.subr.bf16.mxu0 %v7456_v35  ;;  %v2030_v35 = vrot.slane %v8859_v17, %v2029_v29  ;;  %v7558_v29 = vld [vmem:[#allocation8 + $0x428] sm:$0xff]  }
 0x275   : > { %3962 = vmatpush1.bf16.msra.mxu0 %v7454_v36  ;;  %v7526_v36 = vld [vmem:[#allocation8 + $0x328] sm:$0xff]  }
 0x276   : > { %3972 = vmatprep.subr.bf16.mxu0 %v7459_v31  ;;  %v7528_v31 = vld [vmem:[#allocation8 + $0x370] sm:$0xff]  }
 0x278   : > { %3964 = vmatmul.mubr.bf16.vlgmr.msra.gmra.mrb[52].mxu0 %v8621_v21  ;;  %v7472_v21 = vld [vmem:[#allocation5 + $0x700] ss:$24 sps:$4 sm:$0xff]  }
 0x279   : > { %3973 = vmatpush1.bf16.msra.mxu0 %v7457_v15  ;;  %4004 = vmatprep.mubr.bf16.mxu0 %v8627_v30  ;;  %v7475_v30 = vld [vmem:[#allocation5 + $0x730] ss:$24 sps:$4 sm:$0xff]   ;;  %v2038_v15 = vrot.slane %v8859_v17, %v2037_v38  ;;  %v7560_v38 = vld [vmem:[#allocation8 + $0x470] sm:$0xff]  }
 0x27a   : > { %3974 = vmatprep.subr.bf16.mxu0 %v7462_v39 }
 0x27d   : > { %3975 = vmatpush1.bf16.msra.mxu0 %v7460_v0 }
 0x27e   : > { %3976 = vmatprep.subr.bf16.mxu0 %v7465_v51 }
 0x281   : > { %3977 = vmatpush1.bf16.msra.mxu0 %v7463_v19 }
 0x282   : > { %3978 = vmatprep.subr.bf16.mxu0 %v7468_v4 }
 0x285   : > { %3979 = vmatpush1.bf16.msra.mxu0 %v7466_v9 }
 0x286   : > { %3980 = vmatprep.subr.bf16.mxu0 %v7471_v24  ;;  %v7530_v24 = vld [vmem:[#allocation8 + $0x330] sm:$0xff]  }
 0x289   : > { %3981 = vmatpush1.bf16.msra.mxu0 %v7469_v55 }
 0x28a   : > { %3982 = vmatprep.subr.bf16.mxu0 %v7474_v50 }
 0x28d   : > { %3983 = vmatpush1.bf16.msra.mxu0 %v7472_v21  ;;  %v7532_v21 = vld [vmem:[#allocation8 + $0x378] sm:$0xff]  }
 0x28e   : > { %3984 = vmatprep.subr.bf16.mxu0 %v7477_v20 }
 0x291   : > { %3985 = vmatpush1.bf16.msra.mxu0 %v7475_v30 }
 0x292   : > { %3986 = vmatprep.subr.bf16.mxu0 %v7480_v12 }
 0x295   : > { %3987 = vmatpush1.bf16.msra.mxu0 %v7478_v43  ;;  %v7534_v43 = vld [vmem:[#allocation8 + $0x338] sm:$0xff]  }
 0x296   : > { %3988 = vmatprep.subr.bf16.mxu0 %v7483_v52  ;;  %v7536_v52 = vld [vmem:[#allocation8 + $0x440] sm:$0xff]  }
 0x299   : > { %3989 = vmatpush1.bf16.msra.mxu0 %v7481_v49  ;;  %v7538_v49 = vld [vmem:[#allocation8 + $0x400] sm:$0xff]  }
 0x29a   : > { %3990 = vmatprep.subr.bf16.mxu0 %v7486_v57  ;;  %v4259_v57 = vpack.c.bf16 %v8810_v46, %v8810_v46 }
 0x29d   : > { %3991 = vmatpush1.bf16.msra.mxu0 %v7484_v53  ;;  %v7540_v53 = vld [vmem:[#allocation8 + $0x448] sm:$0xff]  }
 0x29e   : > { %3992 = vmatprep.subr.bf16.mxu0 %v7489_v58  ;;  %v4264_v58 = vpack.c.bf16 %v8835_v5, %v8835_v5  ;;  %v7545_v5 = vld [vmem:[#allocation8 + $0x88] sm:$0xff]  }
 0x2a1   : > { %3993 = vmatpush1.bf16.msra.mxu0 %v7487_v45 }
 0x2a2   : > { %3994 = vmatprep.subr.bf16.mxu0 %v7492_v23 }
 0x2a5   : > { %3995 = vmatpush1.bf16.msra.mxu0 %v7490_v60  ;;  %v7542_v60 = vld [vmem:[#allocation8 + $0x408] sm:$0xff]  }
 0x2a6   : > { %3996 = vmatprep.subr.bf16.mxu0 %v7495_v41 }
 0x2a9   : > { %3997 = vmatpush1.bf16.msra.mxu0 %v7493_v25  ;;  %v7541_v25 = vld [vmem:[#allocation8 + $0x80] sm:$0xff]  }
 0x2aa   : > { %3998 = vmatprep.subr.bf16.mxu0 %v7498_v40  ;;  %v7544_v40 = vld [vmem:[#allocation8 + $0x450] sm:$0xff]  }
 0x2ad   : > { %3999 = vmatpush1.bf16.msra.mxu0 %v7496_v59 }
 0x2ae   : > { %4000 = vmatprep.subr.bf16.mxu0 %v7501_v63 }
 0x2b1   : > { %4001 = vmatpush1.bf16.msra.mxu0 %v7499_v3  ;;  %v7543_v3 = vld [vmem:[#allocation8 + $0xc8] sm:$0xff]  }
 0x2b2   : > { %4002 = vmatprep.subr.bf16.mxu0 %v7504_v37  ;;  %v7546_v37 = vld [vmem:[#allocation8 + $0x410] sm:$0xff]  }
 0x2b5   : > { %4003 = vmatpush1.bf16.msra.mxu0 %v7502_v42  ;;  %v7548_v42 = vld [vmem:[#allocation8 + $0x458] sm:$0xff]  }
 0x2b6   : > { %6733 = vmatprep.subr.bf16.mxu0 %v7505_v61  ;;  %v7547_v61 = vld [vmem:[#allocation8 + $0xd0] sm:$0xff]  }
 0x2b8   : > { %4005 = vmatmul.mubr.bf16.vlgmr.msra.gmra.mrb[52].mxu0 %v8767_v33  ;;  %v7522_v33 = vld [vmem:[#allocation8 + $0x320] sm:$0xff]  }
 0x2b9   : > { %6734 = vmatpush3.bf16.msra.mxu0 %v7506_v56  ;;  %5696 = vmatprep.mubr.bf16.mxu0 %v4260_v6  ;;  %v2033_v56 = vsub.s32 2, %v8856_v28  ;;  %v7549_v6 = vld [vmem:[#allocation8 + $0x90] sm:$0xff]  }
 0x2ba   : > { %6735 = vmatprep.subr.bf16.mxu0 %v7508_v2  ;;  %v7550_v2 = vld [vmem:[#allocation8 + $0x418] sm:$0xff]  }
 0x2bd   : > { %6736 = vmatpush3.bf16.msra.mxu0 %v7510_v16  ;;  %v7552_v16 = vld [vmem:[#allocation8 + $0x460] sm:$0xff]  }
 0x2be   : > { %6737 = vmatprep.subr.bf16.mxu0 %v7512_v22  ;;  %v7551_v22 = vld [vmem:[#allocation8 + $0xd8] sm:$0xff]  }
 0x2c1   : > { %6738 = vmatpush3.bf16.msra.mxu0 %v7514_v8  ;;  %v2034_v8 = vrot.slane %v8859_v17, %v2033_v56 }
 0x2c2   : > { %6739 = vmatprep.subr.bf16.mxu0 %v7516_v18  ;;  %v7554_v18 = vld [vmem:[#allocation8 + $0x420] sm:$0xff]  }
 0x2c5   : > { %6740 = vmatpush3.bf16.msra.mxu0 %v7518_v11  ;;  %v7553_v11 = vld [vmem:[#allocation8 + $0x98] sm:$0xff]  }
 0x2c6   : > { %6741 = vmatprep.subr.bf16.mxu0 %v7520_v54  ;;  %v7556_v54 = vld [vmem:[#allocation8 + $0x468] sm:$0xff]  }
 0x2c9   : > { %6742 = vmatpush3.bf16.msra.mxu0 %v7522_v33 }
 0x2ca   : > { %6743 = vmatprep.subr.bf16.mxu0 %v7524_v32  ;;  %v7557_v32 = vld [vmem:[#allocation8 + $0xa0] sm:$0xff]  }
 0x2cb   : > { %v3760_v39 = vpop.f32.mrb[48].mxu0 }
 0x2cc   : > { %v6875_v0 = vadd.f32 %v3760_v39, %v2026_v34  ;;  %v3762_v51 = vpop.f32.mrb[49].mxu0  ;;  %v8866_v19 = vpop.f32.mrb[48].mxu1  ;;  %v7559_v34 = vld [vmem:[#allocation8 + $0xe8] sm:$0xff]   ;;  %v7566_v39 = vld [vmem:[#allocation8 + $0x438] sm:$0xff]  }
 0x2cd   : > { %v6876_v4 = vadd.f32 %v3762_v51, %v2030_v35  ;;  %v3764_v9 = vpop.f32.mrb[50].mxu0  ;;  %6744 = vmatpush3.bf16.msra.mxu0 %v7526_v36  ;;  %v3885_v55 = vpop.f32.mrb[49].mxu1  ;;  %v6877_v33 = vadd.f32 %v8866_v19, %v2034_v8  ;;  %v7562_v35 = vld [vmem:[#allocation8 + $0x430] sm:$0xff]   ;;  %v7561_v36 = vld [vmem:[#allocation8 + $0xa8] sm:$0xff]   ;;  %v7567_v51 = vld [vmem:[#allocation8 + $0xf8] sm:$0xff]  }
 0x2ce   : > { %7649 = vtanh.f32 %v6875_v0  ;;  %v3765_v50 = vpop.f32.mrb[51].mxu0  ;;  %6745 = vmatprep.subr.bf16.mxu0 %v7528_v31  ;;  %v6878_v20 = vadd.f32 %v3885_v55, %v2038_v15  ;;  %v3887_v30 = vpop.f32.mrb[50].mxu1  ;;  %v7564_v31 = vld [vmem:[#allocation8 + $0x478] sm:$0xff]   ;;  %v7563_v15 = vld [vmem:[#allocation8 + $0xf0] sm:$0xff]   ;;  %v7587_v8 = vld [vmem:[#allocation8 + $0x1c8] sm:$0xff]  }
 0x2cf   : > { %7651 = vtanh.f32 %v6876_v4  ;;  %v3888_v12 = vpop.f32.mrb[51].mxu1  ;;  %v7565_v0 = vld [vmem:[#allocation8 + $0xb0] sm:$0xff]   ;;  %v4263_v4 = vpack.c.bf16 %v8832_v7, %v8832_v7  ;;  %v7568_v9 = vld [vmem:[#allocation8 + $0xb8] sm:$0xff]   ;;  %v7570_v50 = vld [vmem:[#allocation8 + $0x100] sm:$0xff]  }
 0x2d0   : > { %7653 = vtanh.f32 %v6878_v20  ;;  %v7572_v20 = vld [vmem:[#allocation8 + $0x108] sm:$0xff]   ;;  %v7573_v30 = vld [vmem:[#allocation8 + $0x150] sm:$0xff]   ;;  %v7576_v7 = vld [vmem:[#allocation8 + $0x118] sm:$0xff]  }
 0x2d1   : > { %6746 = vmatpush3.bf16.msra.mxu0 %v7530_v24  ;;  %7655 = vtanh.f32 %v6877_v33  ;;  %v7569_v24 = vld [vmem:[#allocation8 + $0x140] sm:$0xff]   ;;  %v7574_v12 = vld [vmem:[#allocation8 + $0x110] sm:$0xff]  }
 0x2d2   : > { %6747 = vmatprep.subr.bf16.mxu0 %v7532_v21  ;;  %v7571_v21 = vld [vmem:[#allocation8 + $0x148] sm:$0xff]   ;;  %v7593_v33 = vld [vmem:[#allocation8 + $0x1e0] sm:$0xff]  }
 0x2d5   : > { %6748 = vmatpush3.bf16.msra.mxu0 %v7534_v43  ;;  %v7575_v43 = vld [vmem:[#allocation8 + $0x158] sm:$0xff]  }
 0x2d6   : > { %6777 = vmatprep.subr.bf16.mxu0 %v7536_v52  ;;  %v7577_v52 = vld [vmem:[#allocation8 + $0x160] sm:$0xff]  }
 0x2d8   : > { %v7650_v45 = vpop.eup %7649  ;;  %5697 = vmatmul.mubr.bf16.vlgmr.msra.gmra.mrb[56].mxu0 %v4259_v57  ;;  %v7579_v57 = vld [vmem:[#allocation8 + $0x168] sm:$0xff]  }
 0x2d9   : > { %v7652_v23 = vpop.eup %7651  ;;  %6778 = vmatpush3.bf16.msra.mxu0 %v7538_v49  ;;  %5776 = vmatprep.mubr.bf16.mxu0 %v4264_v58  ;;  %v4247_v63 = vpack.c.bf16 %v7650_v45, %v7650_v45  ;;  %v7578_v49 = vld [vmem:[#allocation8 + $0x120] sm:$0xff]   ;;  %v7581_v58 = vld [vmem:[#allocation8 + $0x170] sm:$0xff]  }
 0x2da   : > { %v4248_v41 = vpack.c.bf16 %v7652_v23, %v7652_v23  ;;  %6779 = vmatprep.subr.bf16.mxu0 %v7540_v53  ;;  %v7654_v59 = vpop.eup %7653  ;;  %v7580_v53 = vld [vmem:[#allocation8 + $0x128] sm:$0xff]   ;;  %v7582_v45 = vld [vmem:[#allocation8 + $0x130] sm:$0xff]   ;;  %v7583_v23 = vld [vmem:[#allocation8 + $0x178] sm:$0xff]  }
 0x2db   : > { %v4250_v46 = vpack.c.bf16 %v7654_v59, %v7654_v59  ;;  %v7656_v19 = vpop.eup %7655 }
 0x2dc   : > { %5456 = vmatprep.mubr.bf16.mxu1 %v4248_v41  ;;  %v4249_v55 = vpack.c.bf16 %v7656_v19, %v7656_v19  ;;  %v7585_v41 = vld [vmem:[#allocation8 + $0x1c0] sm:$0xff]  }
 0x2dd   : > { %5457 = vmatmul.mubr.bf16.vlgmr.msra.gmra.mrb[52].mxu1 %v4247_v63  ;;  %6780 = vmatpush3.bf16.msra.mxu0 %v7542_v60  ;;  %v7584_v60 = vld [vmem:[#allocation8 + $0x138] sm:$0xff]  }
 0x2de   : > { %6624 = vmatpush3.bf16.msra.mxu1 %v7541_v25  ;;  %6781 = vmatprep.subr.bf16.mxu0 %v7544_v40  ;;  %v2041_v25 = vsub.s32 4, %v8856_v28  ;;  %v2045_v40 = vsub.s32 5, %v8856_v28  ;;  %v4254_v28 = vpack.c.bf16 %v8820_v27, %v8820_v27 }
 0x2df   : > { %6625 = vmatprep.subr.bf16.mxu1 %v7543_v3  ;;  %5496 = vmatprep.mubr.bf16.mxu1 %v4250_v46 }
 0x2e0   : > { %v2042_v59 = vrot.slane %v8859_v17, %v2041_v25  ;;  %v2046_v63 = vrot.slane %v8859_v17, %v2045_v40  ;;  %v7588_v17 = vld [vmem:[#allocation8 + $0x188] sm:$0xff]   ;;  %v6450_v40 = vld [vmem:[#allocation10] ss:$0 sm:$0xff] }
 0x2e1   : > { %6782 = vmatpush3.bf16.msra.mxu0 %v7546_v37  ;;  %v7612_v25 = vld [vmem:[#allocation8 + $0x228] sm:$0xff]  }
 0x2e2   : > { %6626 = vmatpush3.bf16.msra.mxu1 %v7545_v5  ;;  %6783 = vmatprep.subr.bf16.mxu0 %v7548_v42 }
 0x2e3   : > { %6627 = vmatprep.subr.bf16.mxu1 %v7547_v61 }
 0x2e5   : > { %6784 = vmatpush3.bf16.msra.mxu0 %v7550_v2 }
 0x2e6   : > { %6628 = vmatpush3.bf16.msra.mxu1 %v7549_v6  ;;  %6785 = vmatprep.subr.bf16.mxu0 %v7552_v16  ;;  %v7586_v16 = vld [vmem:[#allocation8 + $0x180] sm:$0xff]  }
 0x2e7   : > { %6629 = vmatprep.subr.bf16.mxu1 %v7551_v22 }
 0x2e9   : > { %6786 = vmatpush3.bf16.msra.mxu0 %v7554_v18  ;;  %v7589_v18 = vld [vmem:[#allocation8 + $0x1d0] sm:$0xff]  }
 0x2ea   : > { %6630 = vmatpush3.bf16.msra.mxu1 %v7553_v11  ;;  %6787 = vmatprep.subr.bf16.mxu0 %v7556_v54  ;;  %v7590_v11 = vld [vmem:[#allocation8 + $0x190] sm:$0xff]   ;;  %v7591_v54 = vld [vmem:[#allocation8 + $0x1d8] sm:$0xff]  }
 0x2eb   : > { %6631 = vmatprep.subr.bf16.mxu1 %v7555_v44  ;;  %v7592_v44 = vld [vmem:[#allocation8 + $0x198] sm:$0xff]  }
 0x2ed   : > { %6788 = vmatpush3.bf16.msra.mxu0 %v7558_v29  ;;  %v7594_v29 = vld [vmem:[#allocation8 + $0x1a0] sm:$0xff]  }
 0x2ee   : > { %6632 = vmatpush3.bf16.msra.mxu1 %v7557_v32  ;;  %6789 = vmatprep.subr.bf16.mxu0 %v7560_v38  ;;  %v7595_v38 = vld [vmem:[#allocation8 + $0x1e8] sm:$0xff]  }
 0x2ef   : > { %6633 = vmatprep.subr.bf16.mxu1 %v7559_v34 }
 0x2f1   : > { %6790 = vmatpush3.bf16.msra.mxu0 %v7562_v35 }
 0x2f2   : > { %6634 = vmatpush3.bf16.msra.mxu1 %v7561_v36  ;;  %6791 = vmatprep.subr.bf16.mxu0 %v7564_v31  ;;  %v7596_v31 = vld [vmem:[#allocation8 + $0x1a8] sm:$0xff]  }
 0x2f3   : > { %6635 = vmatprep.subr.bf16.mxu1 %v7563_v15  ;;  %v7597_v15 = vld [vmem:[#allocation8 + $0x1f0] sm:$0xff]  }
 0x2f5   : > { %6792 = vmatpush3.bf16.msra.mxu0 %v7566_v39 }
 0x2f6   : > { %6636 = vmatpush3.bf16.msra.mxu1 %v7565_v0 }
 0x2f7   : > { %6637 = vmatprep.subr.bf16.mxu1 %v7567_v51 }
 0x2f8   : > { %5777 = vmatmul.mubr.bf16.vlgmr.msra.gmra.mrb[60].mxu0 %v4263_v4  ;;  %v7598_v4 = vld [vmem:[#allocation8 + $0x1b0] sm:$0xff]  }
 0x2fa   : > { %6638 = vmatpush3.bf16.msra.mxu1 %v7568_v9 }
 0x2fb   : > { %6645 = vmatprep.subr.bf16.mxu1 %v7569_v24  ;;  %v7599_v24 = vld [vmem:[#allocation8 + $0x1f8] sm:$0xff]  }
 0x2fd   : > { %5497 = vmatmul.mubr.bf16.vlgmr.msra.gmra.mrb[56].mxu1 %v4249_v55  ;;  %v7600_v55 = vld [vmem:[#allocation8 + $0x1b8] sm:$0xff]  }
 0x2fe   : > { %6646 = vmatpush3.bf16.msra.mxu1 %v7570_v50  ;;  %v7601_v50 = vld [vmem:[#allocation8 + $0x240] sm:$0xff]  }
 0x2ff   : > { %6647 = vmatprep.subr.bf16.mxu1 %v7571_v21  ;;  %v7602_v21 = vld [vmem:[#allocation8 + $0x200] sm:$0xff]  }
 0x302   : > { %6648 = vmatpush3.bf16.msra.mxu1 %v7572_v20  ;;  %v4253_v20 = vpack.c.bf16 %v8807_v10, %v8807_v10  ;;  %v7610_v10 = vld [vmem:[#allocation8 + $0x220] sm:$0xff]  }
 0x303   : > { %6649 = vmatprep.subr.bf16.mxu1 %v7573_v30  ;;  %v7603_v30 = vld [vmem:[#allocation8 + $0x248] sm:$0xff]  }
 0x306   : > { %6650 = vmatpush3.bf16.msra.mxu1 %v7574_v12  ;;  %v4256_v12 = vpack.c.bf16 %v8839_v13, %v8839_v13 }
 0x307   : > { %6651 = vmatprep.subr.bf16.mxu1 %v7575_v43  ;;  %v7604_v43 = vld [vmem:[#allocation8 + $0x208] sm:$0xff]  }
 0x30a   : > { %6652 = vmatpush3.bf16.msra.mxu1 %v7576_v7  ;;  %v7605_v7 = vld [vmem:[#allocation8 + $0x250] sm:$0xff]  }
 0x30b   : > { %6653 = vmatprep.subr.bf16.mxu1 %v7577_v52  ;;  %v7606_v52 = vld [vmem:[#allocation8 + $0x210] sm:$0xff]  }
 0x30e   : > { %6654 = vmatpush3.bf16.msra.mxu1 %v7578_v49  ;;  %v7607_v49 = vld [vmem:[#allocation8 + $0x258] sm:$0xff]  }
 0x30f   : > { %6655 = vmatprep.subr.bf16.mxu1 %v7579_v57  ;;  %v7608_v57 = vld [vmem:[#allocation8 + $0x218] sm:$0xff]  }
 0x312   : > { %6656 = vmatpush3.bf16.msra.mxu1 %v7580_v53  ;;  %v7609_v53 = vld [vmem:[#allocation8 + $0x260] sm:$0xff]  }
 0x313   : > { %6657 = vmatprep.subr.bf16.mxu1 %v7581_v58 }
 0x316   : > { %6658 = vmatpush3.bf16.msra.mxu1 %v7582_v45  ;;  %v7611_v45 = vld [vmem:[#allocation8 + $0x268] sm:$0xff]  }
 0x317   : > { %6659 = vmatprep.subr.bf16.mxu1 %v7583_v23 }
 0x31a   : > { %6660 = vmatpush3.bf16.msra.mxu1 %v7584_v60 }
 0x31b   : > { %6667 = vmatprep.subr.bf16.mxu1 %v7585_v41 }
 0x38b   : > { %v4006_v3 = vpop.f32.mrb[52].mxu0 }
 0x38c   : > { %v6879_v46 = vadd.f32 %v4006_v3, %v2042_v59  ;;  %v4008_v37 = vpop.f32.mrb[53].mxu0  ;;  %v7613_v59 = vld [vmem:[#allocation8 + $0x270] sm:$0xff]  }
 0x38d   : > { %v6880_v5 = vadd.f32 %v4008_v37, %v2046_v63  ;;  %v4010_v42 = vpop.f32.mrb[54].mxu0 }
 0x38e   : > { %7657 = vtanh.f32 %v6879_v46  ;;  %v4011_v61 = vpop.f32.mrb[55].mxu0  ;;  %v7614_v42 = vld [vmem:[#allocation8 + $0x230] sm:$0xff]  }
 0x38f   : > { %7659 = vtanh.f32 %v6880_v5 }
 0x398   : > { %v7658_v56 = vpop.eup %7657 }
 0x399   : > { %v7660_v2 = vpop.eup %7659  ;;  %v4251_v22 = vpack.c.bf16 %v7658_v56, %v7658_v56  ;;  %v7615_v56 = vld [vmem:[#allocation8 + $0x278] sm:$0xff]  }
 0x39a   : > { %v4252_v6 = vpack.c.bf16 %v7660_v2, %v7660_v2 }
 0x39c   : > { %5536 = vmatprep.mubr.bf16.mxu1 %v4252_v6  ;;  %v7616_v6 = vld [vmem:[#allocation8 + $0x238] sm:$0xff]  }
 0x39d   : > { %5537 = vmatmul.mubr.bf16.vlgmr.msra.gmra.mrb[60].mxu1 %v4251_v22  ;;  %v7618_v22 = vld [vmem:[#allocation8 + $0x280] sm:$0xff]  }
 0x39e   : > { %6668 = vmatpush3.bf16.msra.mxu1 %v7586_v16  ;;  %5576 = vmatprep.mubr.bf16.mxu1 %v4254_v28  ;;  %v7617_v16 = vld [vmem:[#allocation8 + $0x2c0] sm:$0xff]   ;;  %v7619_v28 = vld [vmem:[#allocation8 + $0x2c8] sm:$0xff]  }
 0x39f   : > { %6669 = vmatprep.subr.bf16.mxu1 %v7587_v8  ;;  %v4255_v8 = vpack.c.bf16 %v8823_v47, %v8823_v47  ;;  %v7626_v47 = vld [vmem:[#allocation8 + $0x2a0] sm:$0xff]  }
 0x3a2   : > { %6670 = vmatpush3.bf16.msra.mxu1 %v7588_v17  ;;  %v4258_v17 = vpack.c.bf16 %v8842_v14, %v8842_v14  ;;  %v7628_v14 = vld [vmem:[#allocation8 + $0x2a8] sm:$0xff]  }
 0x3a3   : > { %6671 = vmatprep.subr.bf16.mxu1 %v7589_v18  ;;  %v7620_v18 = vld [vmem:[#allocation8 + $0x288] sm:$0xff]  }
 0x3a6   : > { %6672 = vmatpush3.bf16.msra.mxu1 %v7590_v11  ;;  %v7621_v11 = vld [vmem:[#allocation8 + $0x2d0] sm:$0xff]  }
 0x3a7   : > { %6673 = vmatprep.subr.bf16.mxu1 %v7591_v54  ;;  %v7622_v54 = vld [vmem:[#allocation8 + $0x290] sm:$0xff]  }
 0x3aa   : > { %6674 = vmatpush3.bf16.msra.mxu1 %v7592_v44  ;;  %v7623_v44 = vld [vmem:[#allocation8 + $0x2d8] sm:$0xff]  }
 0x3ab   : > { %v6749_v32 = vpop.f32.mrb[56].mxu0  ;;  %6675 = vmatprep.subr.bf16.mxu1 %v7593_v33  ;;  %v7624_v33 = vld [vmem:[#allocation8 + $0x298] sm:$0xff]  }
 0x3ac   : > { %v6750_v27 = vpop.f32.mrb[57].mxu0 }
 0x3ad   : > { %v8883_v34 = vadd.f32 %v6750_v27, %v6749_v32  ;;  %v6752_v35 = vpop.f32.mrb[58].mxu0  ;;  %v7627_v32 = vld [vmem:[#allocation8 + $0x2e8] sm:$0xff]   ;;  %v7630_v27 = vld [vmem:[#allocation8 + $0x2b0] sm:$0xff]  }
 0x3ae   : > { %6676 = vmatpush3.bf16.msra.mxu1 %v7594_v29  ;;  %v6753_v36 = vpop.f32.mrb[59].mxu0  ;;  %v7625_v29 = vld [vmem:[#allocation8 + $0x2e0] sm:$0xff]   ;;  %v7631_v35 = vld [vmem:[#allocation8 + $0x2f8] sm:$0xff]  }
 0x3af   : > { %6677 = vmatprep.subr.bf16.mxu1 %v7595_v38  ;;  %v7629_v38 = vld [vmem:[#allocation8 + $0x2f0] sm:$0xff]   ;;  %v7632_v36 = vld [vmem:[#allocation8 + $0x2b8] sm:$0xff]  }
 0x3b0   : > { %v6617_v39 = vpop.f32.mrb[52].mxu1 }
 0x3b1   : > { %v6618_v0 = vpop.f32.mrb[53].mxu1 }
 0x3b2   : > { %v6619_v51 = vadd.f32 %v6618_v0, %v6617_v39  ;;  %6678 = vmatpush3.bf16.msra.mxu1 %v7596_v31  ;;  %v6620_v19 = vpop.f32.mrb[54].mxu1  ;;  %v7633_v31 = vld [vmem:[#allocation8 + $0x3c0] sm:$0xff]   ;;  %v4257_v39 = vpack.c.bf16 %v8829_v48, %v8829_v48  ;;  %v7635_v0 = vld [vmem:[#allocation8 + $0x3c8] sm:$0xff]  }
 0x3b3   : > { %v6621_v9 = vpop.f32.mrb[55].mxu1  ;;  %6679 = vmatprep.subr.bf16.mxu1 %v7597_v15  ;;  %v7634_v15 = vld [vmem:[#allocation8 + $0x380] sm:$0xff]   ;;  %v7636_v19 = vld [vmem:[#allocation8 + $0x388] sm:$0xff]  }
 0x3b4   : > { %v5459_v46 = vadd.f32 %v6619_v51, %v6450_v40  ;;  %v4262_v51 = vpack.c.bf16 %v8846_v1, %v8846_v1  ;;  %v7638_v9 = vld [vmem:[#allocation8 + $0x390] sm:$0xff]   ;;  %v7642_v48 = vld [vmem:[#allocation8 + $0x3a0] sm:$0xff]   ;;  %v7644_v1 = vld [vmem:[#allocation8 + $0x3a8] sm:$0xff]  }
 0x3b5   : > { %v5792_v40 = vld [vmem:[#allocation11 + $0x38] sm:$0xff] }
 0x3b6   : > { %6680 = vmatpush3.bf16.msra.mxu1 %v7598_v4  ;;  %v7637_v4 = vld [vmem:[#allocation8 + $0x3d0] sm:$0xff]  }
 0x3b7   : > { %6681 = vmatprep.subr.bf16.mxu1 %v7599_v24  ;;  %v7639_v24 = vld [vmem:[#allocation8 + $0x3d8] sm:$0xff]  }
 0x3ba   : > { %6682 = vmatpush3.bf16.msra.mxu1 %v7600_v55  ;;  %v7640_v55 = vld [vmem:[#allocation8 + $0x398] sm:$0xff]  }
 0x3bb   : > { %6689 = vmatprep.subr.bf16.mxu1 %v7601_v50  ;;  %v7641_v50 = vld [vmem:[#allocation8 + $0x3e0] sm:$0xff]  }
 0x3bd   : > { %5577 = vmatmul.mubr.bf16.vlgmr.msra.gmra.mrb[64].mxu1 %v4253_v20  ;;  %v7645_v20 = vld [vmem:[#allocation8 + $0x3f0] sm:$0xff]  }
 0x3be   : > { %6690 = vmatpush3.bf16.msra.mxu1 %v7602_v21  ;;  %5616 = vmatprep.mubr.bf16.mxu1 %v4256_v12  ;;  %v7643_v21 = vld [vmem:[#allocation8 + $0x3e8] sm:$0xff]   ;;  %v7647_v12 = vld [vmem:[#allocation8 + $0x3f8] sm:$0xff]  }
 0x3bf   : > { %6691 = vmatprep.subr.bf16.mxu1 %v7603_v30  ;;  %v7646_v30 = vld [vmem:[#allocation8 + $0x3b0] sm:$0xff]  }
 0x3c2   : > { %6692 = vmatpush3.bf16.msra.mxu1 %v7604_v43  ;;  %v7648_v43 = vld [vmem:[#allocation8 + $0x3b8] sm:$0xff]  }
 0x3c3   : > { %6693 = vmatprep.subr.bf16.mxu1 %v7605_v7  ;;  %v4261_v7 = vpack.c.bf16 %v8826_v62, %v8826_v62 }
 0x3c6   : > { %6694 = vmatpush3.bf16.msra.mxu1 %v7606_v52  ;;  %v5785_v52 = vld [vmem:[#allocation11] sm:$0xff] }
 0x3c7   : > { %6695 = vmatprep.subr.bf16.mxu1 %v7607_v49  ;;  %v5786_v49 = vld [vmem:[#allocation11 + $0x8] sm:$0xff] }
 0x3ca   : > { %6696 = vmatpush3.bf16.msra.mxu1 %v7608_v57  ;;  %v5787_v57 = vld [vmem:[#allocation11 + $0x10] sm:$0xff] }
 0x3cb   : > { %v6793_v58 = vpop.f32.mrb[60].mxu0  ;;  %6697 = vmatprep.subr.bf16.mxu1 %v7609_v53  ;;  %v7961_v53 = vmov 0.0|0.0  }
 0x3cc   : > { %v6794_v13 = vpop.f32.mrb[61].mxu0 }
 0x3cd   : > { %v8889_v23 = vadd.f32 %v6794_v13, %v6793_v58  ;;  %v6796_v60 = vpop.f32.mrb[62].mxu0  ;;  %v5788_v58 = vld [vmem:[#allocation11 + $0x18] sm:$0xff]  ;;  %v5789_v13 = vld [vmem:[#allocation11 + $0x20] sm:$0xff] }
 0x3ce   : > { %6698 = vmatpush3.bf16.msra.mxu1 %v7610_v10  ;;  %v6797_v41 = vpop.f32.mrb[63].mxu0  ;;  %v6852_v10 = vpack.c.bf16 %v5786_v49, %v5785_v52  ;;  %v5790_v60 = vld [vmem:[#allocation11 + $0x28] sm:$0xff] }
 0x3cf   : > { %6699 = vmatprep.subr.bf16.mxu1 %v7611_v45  ;;  %v6855_v45 = vpack.c.bf16 %v5788_v58, %v5787_v57  ;;  %v6858_v41 = vpack.c.bf16 %v5790_v60, %v5789_v13 }
 0x3d0   : > { %v6639_v63 = vpop.f32.mrb[56].mxu1 }
 0x3d1   : > { %v6640_v3 = vpop.f32.mrb[57].mxu1 }
 0x3d2   : > { %v6641_v37 = vadd.f32 %v6640_v3, %v6639_v63  ;;  %v6642_v5 = vpop.f32.mrb[58].mxu1  ;;  %6700 = vmatpush3.bf16.msra.mxu1 %v7612_v25  ;;  %v5791_v25 = vld [vmem:[#allocation11 + $0x30] sm:$0xff]  ;;  %v5794_v63 = vld [vmem:[#allocation11 + $0x48] sm:$0xff] }
 0x3d3   : > { %v6643_v61 = vpop.f32.mrb[59].mxu1  ;;  %6701 = vmatprep.subr.bf16.mxu1 %v7613_v59  ;;  %v6861_v62 = vpack.c.bf16 %v5792_v40, %v5791_v25  ;;  %v5793_v59 = vld [vmem:[#allocation11 + $0x40] sm:$0xff] }
 0x3d4   : > { %v8891_v2 = vadd.f32 %v6641_v37, %v5459_v46  ;;  %v6864_v3 = vpack.c.bf16 %v5794_v63, %v5793_v59  ;;  %v5795_v46 = vld [vmem:[#allocation11 + $0x50] sm:$0xff]  ;;  %v5796_v37 = vld [vmem:[#allocation11 + $0x58] sm:$0xff]  ;;  %v5797_v61 = vld [vmem:[#allocation11 + $0x60] sm:$0xff] }
 0x3d5   : > { %v6867_v5 = vpack.c.bf16 %v5796_v37, %v5795_v46 }
 0x3d6   : > { %6702 = vmatpush3.bf16.msra.mxu1 %v7614_v42 }
 0x3d7   : > { %6703 = vmatprep.subr.bf16.mxu1 %v7615_v56  ;;  %v5798_v56 = vld [vmem:[#allocation11 + $0x68] sm:$0xff] }
 0x3da   : > { %6704 = vmatpush3.bf16.msra.mxu1 %v7616_v6 }
 0x3db   : > { %6711 = vmatprep.subr.bf16.mxu1 %v7617_v16  ;;  %v6870_v16 = vpack.c.bf16 %v5798_v56, %v5797_v61 }
 0x3dd   : > { %5617 = vmatmul.mubr.bf16.vlgmr.msra.gmra.mrb[68].mxu1 %v4255_v8 }
 0x3de   : > { %6712 = vmatpush3.bf16.msra.mxu1 %v7618_v22  ;;  %5656 = vmatprep.mubr.bf16.mxu1 %v4258_v17 }
 0x3df   : > { %6713 = vmatprep.subr.bf16.mxu1 %v7619_v28 }
 0x3e2   : > { %6714 = vmatpush3.bf16.msra.mxu1 %v7620_v18  ;;  %v5799_v18 = vld [vmem:[#allocation11 + $0x70] sm:$0xff] }
 0x3e3   : > { %6715 = vmatprep.subr.bf16.mxu1 %v7621_v11  ;;  %v5800_v11 = vld [vmem:[#allocation11 + $0x78] sm:$0xff] }
 0x3e6   : > { %6716 = vmatpush3.bf16.msra.mxu1 %v7622_v54  ;;  %v6873_v54 = vpack.c.bf16 %v5800_v11, %v5799_v18 }
 0x3e7   : > { %6717 = vmatprep.subr.bf16.mxu1 %v7623_v44  ;;  %v7963_v44 = vmov 0.0  }
 0x3ea   : > { %6718 = vmatpush3.bf16.msra.mxu1 %v7624_v33 }
 0x3eb   : > { %6719 = vmatprep.subr.bf16.mxu1 %v7625_v29 }
 0x3ee   : > { %6720 = vmatpush3.bf16.msra.mxu1 %v7626_v47 }
 0x3ef   : > { %6721 = vmatprep.subr.bf16.mxu1 %v7627_v32 }
 0x3f2   : > { %6722 = vmatpush3.bf16.msra.mxu1 %v7628_v14 }
 0x3f3   : > { %6723 = vmatprep.subr.bf16.mxu1 %v7629_v38 }
 0x3f6   : > { %6724 = vmatpush3.bf16.msra.mxu1 %v7630_v27 }
 0x3f7   : > { %6725 = vmatprep.subr.bf16.mxu1 %v7631_v35 }
 0x3fa   : > { %6726 = vmatpush3.bf16.msra.mxu1 %v7632_v36 }
 0x3fb   : > { %6755 = vmatprep.subr.bf16.mxu1 %v7633_v31 }
 0x3fd   : > { %5657 = vmatmul.mubr.bf16.vlgmr.msra.gmra.mrb[72].mxu1 %v4257_v39 }
 0x3fe   : > { %6756 = vmatpush3.bf16.msra.mxu1 %v7634_v15  ;;  %5736 = vmatprep.mubr.bf16.mxu1 %v4262_v51 }
 0x3ff   : > { %6757 = vmatprep.subr.bf16.mxu1 %v7635_v0 }
 0x402   : > { %6758 = vmatpush3.bf16.msra.mxu1 %v7636_v19 }
 0x403   : > { %6759 = vmatprep.subr.bf16.mxu1 %v7637_v4 }
 0x406   : > { %6760 = vmatpush3.bf16.msra.mxu1 %v7638_v9 }
 0x407   : > { %6761 = vmatprep.subr.bf16.mxu1 %v7639_v24 }
 0x40a   : > { %6762 = vmatpush3.bf16.msra.mxu1 %v7640_v55 }
 0x40b   : > { %6763 = vmatprep.subr.bf16.mxu1 %v7641_v50 }
 0x40e   : > { %6764 = vmatpush3.bf16.msra.mxu1 %v7642_v48 }
 0x40f   : > { %6765 = vmatprep.subr.bf16.mxu1 %v7643_v21 }
 0x412   : > { %6766 = vmatpush3.bf16.msra.mxu1 %v7644_v1 }
 0x413   : > { %6767 = vmatprep.subr.bf16.mxu1 %v7645_v20 }
 0x416   : > { %6768 = vmatpush3.bf16.msra.mxu1 %v7646_v30 }
 0x417   : > { %6769 = vmatprep.subr.bf16.mxu1 %v7647_v12 }
 0x41a   : > { %6770 = vmatpush3.bf16.msra.mxu1 %v7648_v43  ;;  %v6595_v43 = vld [vmem:[#allocation13] ss:$0 sm:$0xff] }
 0x41b   : > { %6851 = vmatprep.subr.bf16.mxu1 %v7961_v53 }
 0x41d   : > { %5737 = vmatmul.mubr.bf16.vlgmr.msra.gmra.mrb[76].mxu1 %v4261_v7 }
 0x41e   : > { %6853 = vmatpush3.bf16.msra.mxu1 %v6852_v10  ;;  %6848 = vmatprep.mubr.msk.f32.mxu1 %vm7962_vm9, %v7963_v44 }
 0x41f   : > { %6854 = vmatprep.subr.bf16.mxu1 %v7961_v53 }
 0x422   : > { %6856 = vmatpush3.bf16.msra.mxu1 %v6855_v45  ;;  %v5885_v45 = vand.u32 127, %v2023_v26 }
 0x423   : > { %6857 = vmatprep.subr.bf16.mxu1 %v7961_v53 }
 0x424   : > { %vm5886_vm10 = vcmp.lt.s32.totalorder %v5885_v45, 2 }
 0x426   : > { %6859 = vmatpush3.bf16.msra.mxu1 %v6858_v41 }
 0x427   : > { %6860 = vmatprep.subr.bf16.mxu1 %v7961_v53 }
 0x42a   : > { %6862 = vmatpush3.bf16.msra.mxu1 %v6861_v62 }
 0x42b   : > { %6863 = vmatprep.subr.bf16.mxu1 %v7961_v53 }
 0x42e   : > { %6865 = vmatpush3.bf16.msra.mxu1 %v6864_v3 }
 0x42f   : > { %6866 = vmatprep.subr.bf16.mxu1 %v7961_v53 }
 0x432   : > { %6868 = vmatpush3.bf16.msra.mxu1 %v6867_v5 }
 0x433   : > { %6869 = vmatprep.subr.bf16.mxu1 %v7961_v53 }
 0x436   : > { %6871 = vmatpush3.bf16.msra.mxu1 %v6870_v16 }
 0x437   : > { %6872 = vmatprep.subr.bf16.mxu1 %v7961_v53 }
 0x43a   : > { %6874 = vmatpush3.bf16.msra.mxu1 %v6873_v54 }
 0x470   : > { %v6661_v42 = vpop.f32.mrb[60].mxu1 }
 0x471   : > { %v6662_v6 = vpop.f32.mrb[61].mxu1 }
 0x472   : > { %v6663_v22 = vadd.f32 %v6662_v6, %v6661_v42  ;;  %v6664_v8 = vpop.f32.mrb[62].mxu1 }
 0x473   : > { %v6665_v28 = vpop.f32.mrb[63].mxu1 }
 0x474   : > { %v5539_v17 = vadd.f32 %v6663_v22, %v8891_v2 }
 0x490   : > { %v6683_v33 = vpop.f32.mrb[64].mxu1 }
 0x491   : > { %v6684_v29 = vpop.f32.mrb[65].mxu1 }
 0x492   : > { %v6685_v47 = vadd.f32 %v6684_v29, %v6683_v33  ;;  %v6686_v32 = vpop.f32.mrb[66].mxu1 }
 0x493   : > { %v6687_v14 = vpop.f32.mrb[67].mxu1 }
 0x494   : > { %v5579_v38 = vadd.f32 %v6685_v47, %v5539_v17 }
 0x4b0   : > { %v6705_v27 = vpop.f32.mrb[68].mxu1 }
 0x4b1   : > { %v6706_v35 = vpop.f32.mrb[69].mxu1 }
 0x4b2   : > { %v6707_v36 = vadd.f32 %v6706_v35, %v6705_v27  ;;  %v6708_v31 = vpop.f32.mrb[70].mxu1 }
 0x4b3   : > { %v6709_v15 = vpop.f32.mrb[71].mxu1 }
 0x4b4   : > { %v5619_v2 = vadd.f32 %v6707_v36, %v5579_v38 }
 0x4d0   : > { %v6727_v39 = vpop.f32.mrb[72].mxu1 }
 0x4d1   : > { %v6728_v0 = vpop.f32.mrb[73].mxu1 }
 0x4d2   : > { %v6729_v51 = vadd.f32 %v6728_v0, %v6727_v39  ;;  %v6730_v19 = vpop.f32.mrb[74].mxu1 }
 0x4d3   : > { %v6731_v4 = vpop.f32.mrb[75].mxu1 }
 0x4d4   : > { %v5659_v9 = vadd.f32 %v6729_v51, %v5619_v2 }
 0x4d6   : > { %v5699_v24 = vadd.f32 %v8883_v34, %v5659_v9 }
 0x4f0   : > { %v6771_v55 = vpop.f32.mrb[76].mxu1 }
 0x4f1   : > { %v6772_v50 = vpop.f32.mrb[77].mxu1 }
 0x4f2   : > { %v6773_v48 = vadd.f32 %v6772_v50, %v6771_v55  ;;  %v6774_v21 = vpop.f32.mrb[78].mxu1 }
 0x4f3   : > { %v6775_v1 = vpop.f32.mrb[79].mxu1 }
 0x4f4   : > { %v5739_v20 = vadd.f32 %v6773_v48, %v5699_v24 }
 0x4f6   : > { %v5779_v30 = vadd.f32 %v8889_v23, %v5739_v20 }
 0x4f8   : > { %v5784_v12 = vmax.f32 %v5779_v30, 0.0 }
 0x4fa   : > { %6849 = vmatmul.mubr.f32.vlgmr.msra.gmra.mrb[80].mxu1 %v5784_v12 }
 0x5cd   : > { %v5874_v7 = vpop.f32.mrb[80].mxu1 }
 0x5ce   : > { %v5875_v52 = vadd.f32 %v6595_v43, %v5874_v7  ;;  %v6850_v49 = vpop.f32.mrb[81].mxu1 }
 0x5d0   : > { %v6596_v57 = vmul.f32 -1.442695, %v5875_v52 }
 0x5d2   : > { %7661 = vpow2.f32 %v6596_v57 }
 0x5dc   : > { %v7662_v53 = vpop.eup %7661 }
 0x5dd   : > { %v5881_v34 = vadd.f32 1.0, %v7662_v53 }
 0x5df   : > { %7663 = vrcp.f32 %v5881_v34 }
 0x5e9   : > { %v7664_v10 = vpop.eup %7663 }
 0x5ea   : > { %v5887_v58 = vmul.f32 1.442695, %v7664_v10 }
 0x5ec   : > { %7665 = vpow2.f32 %v5887_v58 }
 0x5f6   : > { %v7666_v23 = vpop.eup %7665 }
 0x5f7   : > { %v5889_v13 = vsel %vm5886_vm10, %v7666_v23, 0.0 }
 0x5f8   : > { %5890 = vadd.xlane.f32.xlu0 %v5889_v13 }
 0x685   : > { %v5891_v60 = vpop.xlane.xlu0 %5890 }
 0x686   : > { %7667 = vrcp.f32 %v5891_v60 }
 0x690   : > { %v7668_v41 = vpop.eup %7667 }
 0x691   : > { %v5893_v25 = vmul.f32 %v7668_v41, %v5889_v13 }
 0x693   : > { %5894 = vst [vmem:[%s419_s2] sm:$0xff] %v5893_v25 }
 0x694   : > { %7880 = shalt.err (!%p7877_p7)
}
 0x695   : > { %s7881_s4 = scalar_lea.hbm %s8912_s26, 128  ;;  %s7885_s24 = scalar_lea.hbm %s8964_s8, 256 }
 0x696   : > { %p7882_p9 = scmp.ne.s32.totalorder %s8912_s26, %s7881_s4  ;;  %p7886_p6 = scmp.lt.u32.totalorder %s8912_s26, %s8964_s8 }
 0x697   : > { %p7887_p2 = scmp.lt.u32.totalorder %s7885_s24, %s7881_s4  ;;  %p7889_p5 = scmp.lt.u32.totalorder %s7881_s4, %s8912_s26 }
 0x698   : > { %p7883_p4 = pnand %p7882_p9, %p8991_p10 }
 0x699   : > { %p7888_p0 = por %p7887_p2, %p7886_p6 }
 0x69a   : > { %p7884_p3 = pneg %p7883_p4 }
 0x69b   : > { %p7890_p1 = por %p7889_p5, %p7888_p0 }
 0x69d   : > { %p7891_p11 = pnand %p7890_p1, %p7884_p3 }
 0x69f   : > { %7894 = shalt.err (!%p7891_p11)
}
 0x6a0   : > { %6934 = dma.vmem_to_hbm [thread:$0]  (%p8991_p10), %s8914_s20, 128, %s8912_s26, %s5896_s9  }
 0x6a1 PF: > { %s5921_s2 = sand.u32 1, %s7933_s27   ;;  %p8992_p12 = scmp.ne.s32.totalorder %s8980_s14, 0 }
 0x6a2   : > { %p8993_p13 = scmp.ge.s32.totalorder %s7945_s30, 2  ;;  %s5922_s21 = scalar_lea.sflag [#allocation4], %s5921_s2 }
 0x6a4   : > { %p6960_p8 = pnand %p8993_p13, %p8992_p12 }
 0x6a6   : > { %7928 = dma.done.wait (!%p6960_p8), %s5922_s21, 128  }
 0x6a7   : > { %7930 = vsyncadd (!%p6960_p8), %s5922_s21, 4294967168  ;;  %p24_p7 = scmp.ge.s32.totalorder %s8185_s15, 4   ;;  %s8994_s27 = smov %s7937_s28 }
 0x6a8   : > { %s8995_s28 = smov %s7941_s29  ;;  %s8996_s29 = smov %s8196_s10 }
 0x6a9   : > { %s8997_s30 = smov %s8185_s15  ;;  %26 = sbr.rel (!%p24_p7) target bundleno = 11 (0xb), region = 124 }
 0x6b0   :  { %5927 = vsyncpa [#allocation3], 1 }
 0x6b1   :  { %5929 = vsyncpa [#allocation3 + $0x1], 1 }
 0x6b2   :  { %5930 = vsyncpa [#allocation6], 1 }
 0x6b3   :  { %5931 = vsyncpa [#allocation9], 1 }
 0x6b4   :  { %5932 = vsyncpa [#allocation12], 1 }
 0x6b5   :  { %5933 = vsyncpa [#allocation4], 1 }
 0x6b6   :  { %5935 = vsyncpa [#allocation4 + $0x1], 1 }

</bundles_post_ra>
